<compile_context>
chip_gen: v5e
topology: v5e:2x2
jax: 0.10.0
libtpu: 0.0.40
codegen_flags: <defaults>
</compile_context>

<pallas_src>
import functools

import jax
import jax.numpy as jnp
from jax import lax
from jax.experimental import pallas as pl
from jax.experimental.pallas import tpu as pltpu


def _round_up(x, m):
    return (x + m - 1) // m * m


def _vmem_limit_bytes():
    # Adaptive VMEM budget: ~3/4 of physical VMEM (96 MiB on v5e/v6e,
    # 48 MiB on v7x); conservative fallback if the query is unavailable.
    try:
        cap = int(pltpu.get_tpu_info().vmem_capacity_bytes)
        return max(32 * 1024 * 1024, (cap * 3) // 4)
    except Exception:
        return 48 * 1024 * 1024


# --------------------------------------------------------------------------
# Conv3d(3x3x3) plane kernel.
#
# One grid step = one output depth-plane of one sample:
#   * x0/x1/x2 are the three depth-tap (Hp, Wp, Cin) planes selected by
#     depth-shifted BlockSpec index maps (same HBM array passed three times).
#   * the 3x3 in-plane taps come from static shifted slices of each (Wp, Cin)
#     row band; 27 small MXU matmuls accumulate in f32.
#   * optionally the input is conv_13's raw output: it is normalized + ReLU'd
#     per band (fused InstanceNorm) and the zero-padding border is recreated
#     with masks, so the normalized intermediate never exists in HBM.
#   * outputs: the raw conv plane (bf16, real channel count; optionally
#     written into a 1-voxel zero border ready for the next conv) and a
#     per-plane (sum, sumsq) partial-stats block taken from the f32 acc.
# --------------------------------------------------------------------------
def _conv_plane_kernel(*refs, dil, depth, pad_out, norm_input, c_store):
    if norm_input:
        x_refs, w_ref, ms_ref = refs[0:3], refs[3], refs[4]
        y_ref, st_ref = refs[5], refs[6]
    else:
        x_refs, w_ref = refs[0:3], refs[3]
        ms_ref = None
        y_ref, st_ref = refs[4], refs[5]

    wp_in, c_in = x_refs[0].shape[-2], x_refs[0].shape[-1]
    cp = w_ref.shape[-1]
    if pad_out:
        hgt, wid = y_ref.shape[0] - 2, y_ref.shape[1] - 2
    else:
        hgt, wid = y_ref.shape[0], y_ref.shape[1]

    dp = pl.program_id(1)

    if norm_input:
        ms = ms_ref[...]                               # (2, cp): mean / scale
        mu, sc = ms[0:1, :c_in], ms[1:2, :c_in]
        col = lax.broadcasted_iota(jnp.int32, (wp_in, 1), 0)
        col_mask = jnp.where((col >= 1) & (col <= wid), 1.0,
                             0.0).astype(jnp.float32)
        # depth validity of each tap plane (padded depth index = dp + kd)
        dfac = [jnp.where((dp + kd >= 1) & (dp + kd <= depth), 1.0, 0.0)
                for kd in range(3)]

    def load_band(kd, r):
        band = x_refs[kd][r, :, :]                      # (Wp, Cin)
        if norm_input:
            b = band.astype(jnp.float32)
            b = jnp.maximum((b - mu) * sc, 0.0)         # fused IN + ReLU
            rfac = jnp.where((r >= 1) & (r <= hgt), 1.0, 0.0)
            b = b * (col_mask * (dfac[kd] * rfac))      # recreate zero padding
            band = b.astype(jnp.bfloat16)
        return band

    def compute_plane():
        def row_body(h, stats):
            acc = jnp.zeros((wid, cp), jnp.float32)
            for kd in range(3):
                for kh in range(3):
                    band = load_band(kd, h + kh * dil)
                    for kw in range(3):
                        tap = band[kw * dil:kw * dil + wid, :]      # (W, Cin)
                        acc = acc + jnp.dot(
                            tap, w_ref[kd * 9 + kh * 3 + kw],
                            preferred_element_type=jnp.float32)
            row = acc[:, :c_store].astype(y_ref.dtype)
            if pad_out:
                zc = jnp.zeros((1, row.shape[1]), row.dtype)
                y_ref[h + 1, :, :] = jnp.concatenate([zc, row, zc], axis=0)
            else:
                y_ref[h, :, :] = row
            # per-plane stats from the f32 accumulator (before the bf16 cast)
            rs = jnp.sum(acc, axis=0, keepdims=True)
            rq = jnp.sum(acc * acc, axis=0, keepdims=True)
            return stats + jnp.concatenate([rs, rq], axis=0)

        st_ref[...] = lax.fori_loop(0, hgt, row_body,
                                    jnp.zeros((2, cp), jnp.float32))

    if pad_out:
        # Grid runs over depth+2 planes so this kernel also fills the depth
        # border of the next conv's zero-padded input.
        interior = (dp >= 1) & (dp <= depth)
        y_ref[...] = jnp.zeros(y_ref.shape, y_ref.dtype)

        @pl.when(interior)
        def _():
            compute_plane()

        @pl.when(jnp.logical_not(interior))
        def _():
            st_ref[...] = jnp.zeros(st_ref.shape, st_ref.dtype)
    else:
        compute_plane()


def _conv_plane_call(x_pad, w_mat, *, depth, height, width, c_store, dil,
                     pad_out, norm_input, mscale=None,
                     out_dtype=jnp.bfloat16):
    assert not (pad_out and norm_input)
    n = x_pad.shape[0]
    hp_in, wp_in, c_in = x_pad.shape[2], x_pad.shape[3], x_pad.shape[4]
    cp = w_mat.shape[-1]
    n_planes = depth + 2 if pad_out else depth

    def x_map(kd):
        if pad_out:
            # output depth = dp - 1; clamp for the two border planes (their
            # fetched data is unused).
            return lambda nn, dp: (nn,
                                   jnp.clip(dp - 1, 0, depth - 1) + kd * dil,
                                   0, 0, 0)
        return lambda nn, d: (nn, d + kd * dil, 0, 0, 0)

    in_specs = [pl.BlockSpec((None, None, hp_in, wp_in, c_in), x_map(kd))
                for kd in range(3)]
    # Weight slab: constant index_map keeps it resident in VMEM across steps.
    # (pl.Buffered(1) would drop the second buffer; left at the default here
    #  since the slab is tiny at these channel counts.)
    in_specs.append(pl.BlockSpec((27, c_in, cp), lambda nn, d: (0, 0, 0)))
    operands = [x_pad, x_pad, x_pad, w_mat]
    if norm_input:
        in_specs.append(pl.BlockSpec((None, 2, cp), lambda nn, d: (nn, 0, 0)))
        operands.append(mscale)

    if pad_out:
        hp_out, wp_out = height + 2, width + 2
        y_shape = (n, depth + 2, hp_out, wp_out, c_store)
        y_block = (None, None, hp_out, wp_out, c_store)
    else:
        y_shape = (n, depth, height, width, c_store)
        y_block = (None, None, height, width, c_store)

    out_shape = (jax.ShapeDtypeStruct(y_shape, out_dtype),
                 jax.ShapeDtypeStruct((n, n_planes, 2, cp), jnp.float32))
    out_specs = (pl.BlockSpec(y_block, lambda nn, d: (nn, d, 0, 0, 0)),
                 pl.BlockSpec((None, None, 2, cp), lambda nn, d: (nn, d, 0, 0)))

    kernel = functools.partial(_conv_plane_kernel, dil=dil, depth=depth,
                               pad_out=pad_out, norm_input=norm_input,
                               c_store=c_store)
    return pl.pallas_call(
        kernel,
        grid=(n, n_planes),
        in_specs=in_specs,
        out_specs=out_specs,
        out_shape=out_shape,
        compiler_params=pltpu.CompilerParams(
            dimension_semantics=("parallel", "parallel"),
            vmem_limit_bytes=_vmem_limit_bytes()),
    )(*operands)


# --------------------------------------------------------------------------
# Final InstanceNorm + ReLU (only needed once, for the module output).
# --------------------------------------------------------------------------
def _norm_relu_kernel(y_ref, ms_ref, o_ref, *, c_out):
    ms = ms_ref[...]
    mu, sc = ms[0:1, :c_out], ms[1:2, :c_out]
    y = y_ref[...].astype(jnp.float32)[:, :, :c_out]
    o_ref[...] = jnp.maximum((y - mu) * sc, 0.0)


def _norm_relu_call(y, mscale, *, c_out):
    n, depth, height, width, c_s = y.shape
    cp = mscale.shape[-1]
    return pl.pallas_call(
        functools.partial(_norm_relu_kernel, c_out=c_out),
        grid=(n, depth),
        in_specs=[pl.BlockSpec((None, None, height, width, c_s),
                               lambda nn, d: (nn, d, 0, 0, 0)),
                  pl.BlockSpec((None, 2, cp), lambda nn, d: (nn, 0, 0))],
        out_specs=pl.BlockSpec((None, None, height, width, c_out),
                               lambda nn, d: (nn, d, 0, 0, 0)),
        out_shape=jax.ShapeDtypeStruct((n, depth, height, width, c_out),
                                       jnp.float32),
        compiler_params=pltpu.CompilerParams(
            dimension_semantics=("parallel", "parallel"),
            vmem_limit_bytes=_vmem_limit_bytes()),
    )(y, mscale)


# --------------------------------------------------------------------------
# Plain-JAX glue: layout only (transpose, zero-pad, weight repack, tiny
# per-channel statistics reductions).  No bulk math in XLA.
# --------------------------------------------------------------------------
def _weight_matrix(w_oidhw, c_in_pad, c_out_pad, dtype):
    """PyTorch (O, I, kd, kh, kw) -> (27, c_in_pad, c_out_pad), tap-major."""
    o, i = w_oidhw.shape[0], w_oidhw.shape[1]
    m = jnp.transpose(w_oidhw, (2, 3, 4, 1, 0)).reshape(27, i, o)
    m = jnp.pad(m, ((0, 0), (0, c_in_pad - i), (0, c_out_pad - o)))
    return m.astype(dtype)


def _mean_scale(stats_partial, count, eps):
    """Per-plane (sum, sumsq) partials -> (N, 2, Cp) [mean ; rsqrt(var+eps)]."""
    s = jnp.sum(stats_partial, axis=1)                  # tiny (N, 2, Cp) reduce
    mean = s[:, 0:1, :] * (1.0 / count)
    ex2 = s[:, 1:2, :] * (1.0 / count)
    var = jnp.maximum(ex2 - mean * mean, 0.0)
    return jnp.concatenate([mean, lax.rsqrt(var + eps)], axis=1)


def double_conv2_forward(x_ncdhw, w1, b1, w2, b2, *, eps=1e-5):
    # Conv biases dropped: the affine-free InstanceNorm3d that follows each
    # conv cancels a per-channel constant exactly (mean shift, var unchanged).
    del b1, b2

    n, c1, d, h, w = x_ncdhw.shape
    c2 = w1.shape[0]
    c1s = _round_up(c1, 8)           # stored input channels (sublane friendly)
    c2s = _round_up(c2, 8)           # stored intermediate channels
    cp = _round_up(c2, 128)          # MXU / statistics width (zero-padded cols)
    count = d * h * w

    # NCDHW -> NDHWC, zero-pad (pad = dilation = 2) for the dilated conv.
    x = jnp.transpose(x_ncdhw, (0, 2, 3, 4, 1))
    xp = jnp.pad(x, ((0, 0), (2, 2), (2, 2), (2, 2), (0, c1s - c1)))
    xp = xp.astype(jnp.bfloat16)

    w1m = _weight_matrix(w1, c1s, cp, jnp.bfloat16)
    w2m = _weight_matrix(w2, c2s, cp, jnp.bfloat16)

    # conv_13: raw output written bf16 into a 1-voxel zero border (it is
    # directly conv_2's padded input) + per-plane stats partials.
    y1p, st1 = _conv_plane_call(xp, w1m, depth=d, height=h, width=w,
                                c_store=c2s, dil=2, pad_out=True,
                                norm_input=False)
    ms1 = _mean_scale(st1, count, eps)

    # conv_2 with conv_13's InstanceNorm + ReLU fused into its tap path.
    y2, st2 = _conv_plane_call(y1p, w2m, depth=d, height=h, width=w,
                               c_store=c2s, dil=1, pad_out=False,
                               norm_input=True, mscale=ms1)
    ms2 = _mean_scale(st2, count, eps)

    out = _norm_relu_call(y2, ms2, c_out=c2)             # (N, D, H, W, C2) f32
    return jnp.transpose(out, (0, 4, 1, 2, 3))           # NDHWC -> NCDHW


# --------------------------------------------------------------------------
# Pure-JAX reference (mirrors PyTorch semantics, biases included).
# --------------------------------------------------------------------------
def ref_forward(x, w1, b1, w2, b2, eps=1e-5):
    def in_relu(z):
        m = z.mean(axis=(2, 3, 4), keepdims=True)
        v = jnp.square(z - m).mean(axis=(2, 3, 4), keepdims=True)
        return jnp.maximum((z - m) * lax.rsqrt(v + eps), 0.0)

    dn = ("NCDHW", "OIDHW", "NCDHW")
    y = lax.conv_general_dilated(x, w1, (1, 1, 1), [(2, 2)] * 3,
                                 rhs_dilation=(2, 2, 2), dimension_numbers=dn,
                                 precision=lax.Precision.HIGHEST)
    y = in_relu(y + b1.reshape(1, -1, 1, 1, 1))
    y = lax.conv_general_dilated(y, w2, (1, 1, 1), [(1, 1)] * 3,
                                 dimension_numbers=dn,
                                 precision=lax.Precision.HIGHEST)
    y = in_relu(y + b2.reshape(1, -1, 1, 1, 1))
    return y


if __name__ == "__main__":
    key = jax.random.PRNGKey(0)
    k0, k1, k2, k3, k4 = jax.random.split(key, 5)

    n, cin, cout, s = 2, 4, 8, 16
    x = jax.random.normal(k0, (n, cin, s, s, s), jnp.float32)
    w1 = jax.random.normal(k1, (cout, cin, 3, 3, 3), jnp.float32) * 0.1
    b1 = jax.random.normal(k2, (cout,), jnp.float32) * 0.1
    w2 = jax.random.normal(k3, (cout, cout, 3, 3, 3), jnp.float32) * 0.1
    b2 = jax.random.normal(k4, (cout,), jnp.float32) * 0.1

    out = jax.block_until_ready(jax.jit(double_conv2_forward)(x, w1, b1, w2, b2))
    ref = jax.block_until_ready(ref_forward(x, w1, b1, w2, b2))

    assert out.shape == (n, cout, s, s, s), out.shape
    err = float(jnp.max(jnp.abs(out - ref)))
    # bf16 taps/weights/intermediates with f32 accumulation -> loose tolerance.
    assert jnp.allclose(out, ref, atol=7e-2, rtol=7e-2), err

    print("KERNEL_OK")
</pallas_src>

<mosaic_0001>
module attributes {stable_mosaic.version = 11 : i64} {
  func.func @_conv_plane_kernel(%arg0: i32, %arg1: i32, %arg2: memref<1x1x20x20x8xbf16, #tpu.memory_space<vmem>>, %arg3: memref<1x1x20x20x8xbf16, #tpu.memory_space<vmem>>, %arg4: memref<1x1x20x20x8xbf16, #tpu.memory_space<vmem>>, %arg5: memref<27x8x128xbf16, #tpu.memory_space<vmem>>, %arg6: memref<1x1x18x18x8xbf16, #tpu.memory_space<vmem>>, %arg7: memref<1x1x2x128xf32, #tpu.memory_space<vmem>>) attributes {dimension_semantics = [#tpu.dimension_semantics<parallel>, #tpu.dimension_semantics<parallel>], iteration_bounds = array<i64: 2, 18>, scalar_prefetch = 0 : i64, scratch_operands = 0 : i64, tpu.core_type = #tpu.core_type<tc>, window_params = [{transform_indices = @transform_0, window_bounds = array<i64: 1, 1, 20, 20, 8>}, {transform_indices = @transform_1, window_bounds = array<i64: 1, 1, 20, 20, 8>}, {transform_indices = @transform_2, window_bounds = array<i64: 1, 1, 20, 20, 8>}, {pipeline_mode = #tpu.pipeline_mode<synchronous>, transform_indices = @transform_3, window_bounds = array<i64: 27, 8, 128>}, {transform_indices = @transform_4, window_bounds = array<i64: 1, 1, 18, 18, 8>}, {transform_indices = @transform_5, window_bounds = array<i64: 1, 1, 2, 128>}]} {
    %c1_i32 = arith.constant 1 : i32
    %0 = arith.cmpi sge, %arg1, %c1_i32 : i32
    %c16_i32 = arith.constant 16 : i32
    %1 = arith.cmpi sle, %arg1, %c16_i32 : i32
    %2 = arith.andi %0, %1 : i1
    %cst = arith.constant 0.000000e+00 : bf16
    %3 = vector.broadcast %cst : bf16 to vector<18x18x8xbf16>
    %c0 = arith.constant 0 : index
    %c0_0 = arith.constant 0 : index
    %c0_1 = arith.constant 0 : index
    %c0_2 = arith.constant 0 : index
    %c0_3 = arith.constant 0 : index
    %4 = vector.load %arg6[%c0, %c0_0, %c0_1, %c0_2, %c0_3] : memref<1x1x18x18x8xbf16, #tpu.memory_space<vmem>>, vector<1x1x18x18x8xbf16>
    %5 = vector.shape_cast %4 : vector<1x1x18x18x8xbf16> to vector<18x18x8xbf16>
    %6 = vector.shape_cast %3 : vector<18x18x8xbf16> to vector<1x1x18x18x8xbf16>
    tpu.vector_store %arg6[%c0, %c0_0, %c0_1, %c0_2, %c0_3], %6 {strides = array<i32>} : memref<1x1x18x18x8xbf16, #tpu.memory_space<vmem>>, vector<1x1x18x18x8xbf16>,
    %7 = arith.extui %2 : i1 to i32
    %c0_i32 = arith.constant 0 : i32
    %8 = arith.cmpi ne, %7, %c0_i32 : i32
    scf.if %8 {
      %cst_5 = arith.constant 0.000000e+00 : f32
      %12 = vector.broadcast %cst_5 : f32 to vector<2x128xf32>
      %c0_i32_6 = arith.constant 0 : i32
      %c16_i32_7 = arith.constant 16 : i32
      %13 = arith.addi %c0_i32_6, %c16_i32_7 : i32
      %c1_i32_8 = arith.constant 1 : i32
      %14 = scf.for %arg8 = %c0_i32_6 to %13 step %c1_i32_8 iter_args(%arg9 = %12) -> (vector<2x128xf32>)  : i32 {
        %cst_14 = arith.constant 0.000000e+00 : f32
        %18 = vector.broadcast %cst_14 : f32 to vector<16x128xf32>
        %c0_i32_15 = arith.constant 0 : i32
        %19 = arith.addi %arg8, %c0_i32_15 : i32
        %c0_16 = arith.constant 0 : index
        %c0_17 = arith.constant 0 : index
        %20 = arith.index_cast %19 : i32 to index
        %c0_18 = arith.constant 0 : index
        %c0_19 = arith.constant 0 : index
        %21 = vector.load %arg2[%c0_16, %c0_17, %20, %c0_18, %c0_19] : memref<1x1x20x20x8xbf16, #tpu.memory_space<vmem>>, vector<1x1x1x20x8xbf16>
        %22 = vector.shape_cast %21 : vector<1x1x1x20x8xbf16> to vector<20x8xbf16>
        %23 = vector.extract_strided_slice %22 {offsets = [0, 0], sizes = [16, 8], strides = [1, 1]} : vector<20x8xbf16> to vector<16x8xbf16>
        %c0_20 = arith.constant 0 : index
        %c0_21 = arith.constant 0 : index
        %c0_22 = arith.constant 0 : index
        %24 = vector.load %arg5[%c0_20, %c0_21, %c0_22] : memref<27x8x128xbf16, #tpu.memory_space<vmem>>, vector<1x8x128xbf16>
        %25 = vector.shape_cast %24 : vector<1x8x128xbf16> to vector<8x128xbf16>
        %cst_23 = arith.constant dense<0.000000e+00> : vector<16x128xf32>
        %26 = tpu.matmul %23, %25, %cst_23 {dimension_numbers = #tpu.dot_dimension_numbers<[1], [0], [0], [1], [0, 0, 1, 1], [], []>} : vector<16x8xbf16>, vector<8x128xbf16>, vector<16x128xf32> -> vector<16x128xf32>
        %27 = arith.addf %18, %26 : vector<16x128xf32>
        %28 = vector.extract_strided_slice %22 {offsets = [2, 0], sizes = [16, 8], strides = [1, 1]} : vector<20x8xbf16> to vector<16x8xbf16>
        %c1 = arith.constant 1 : index
        %c0_24 = arith.constant 0 : index
        %c0_25 = arith.constant 0 : index
        %29 = vector.load %arg5[%c1, %c0_24, %c0_25] : memref<27x8x128xbf16, #tpu.memory_space<vmem>>, vector<1x8x128xbf16>
        %30 = vector.shape_cast %29 : vector<1x8x128xbf16> to vector<8x128xbf16>
        %cst_26 = arith.constant dense<0.000000e+00> : vector<16x128xf32>
        %31 = tpu.matmul %28, %30, %cst_26 {dimension_numbers = #tpu.dot_dimension_numbers<[1], [0], [0], [1], [0, 0, 1, 1], [], []>} : vector<16x8xbf16>, vector<8x128xbf16>, vector<16x128xf32> -> vector<16x128xf32>
        %32 = arith.addf %27, %31 : vector<16x128xf32>
        %33 = vector.extract_strided_slice %22 {offsets = [4, 0], sizes = [16, 8], strides = [1, 1]} : vector<20x8xbf16> to vector<16x8xbf16>
        %c2 = arith.constant 2 : index
        %c0_27 = arith.constant 0 : index
        %c0_28 = arith.constant 0 : index
        %34 = vector.load %arg5[%c2, %c0_27, %c0_28] : memref<27x8x128xbf16, #tpu.memory_space<vmem>>, vector<1x8x128xbf16>
        %35 = vector.shape_cast %34 : vector<1x8x128xbf16> to vector<8x128xbf16>
        %cst_29 = arith.constant dense<0.000000e+00> : vector<16x128xf32>
        %36 = tpu.matmul %33, %35, %cst_29 {dimension_numbers = #tpu.dot_dimension_numbers<[1], [0], [0], [1], [0, 0, 1, 1], [], []>} : vector<16x8xbf16>, vector<8x128xbf16>, vector<16x128xf32> -> vector<16x128xf32>
        %37 = arith.addf %32, %36 : vector<16x128xf32>
        %c2_i32 = arith.constant 2 : i32
        %38 = arith.addi %arg8, %c2_i32 : i32
        %c0_30 = arith.constant 0 : index
        %c0_31 = arith.constant 0 : index
        %39 = arith.index_cast %38 : i32 to index
        %c0_32 = arith.constant 0 : index
        %c0_33 = arith.constant 0 : index
        %40 = vector.load %arg2[%c0_30, %c0_31, %39, %c0_32, %c0_33] : memref<1x1x20x20x8xbf16, #tpu.memory_space<vmem>>, vector<1x1x1x20x8xbf16>
        %41 = vector.shape_cast %40 : vector<1x1x1x20x8xbf16> to vector<20x8xbf16>
        %42 = vector.extract_strided_slice %41 {offsets = [0, 0], sizes = [16, 8], strides = [1, 1]} : vector<20x8xbf16> to vector<16x8xbf16>
        %c3 = arith.constant 3 : index
        %c0_34 = arith.constant 0 : index
        %c0_35 = arith.constant 0 : index
        %43 = vector.load %arg5[%c3, %c0_34, %c0_35] : memref<27x8x128xbf16, #tpu.memory_space<vmem>>, vector<1x8x128xbf16>
        %44 = vector.shape_cast %43 : vector<1x8x128xbf16> to vector<8x128xbf16>
        %cst_36 = arith.constant dense<0.000000e+00> : vector<16x128xf32>
        %45 = tpu.matmul %42, %44, %cst_36 {dimension_numbers = #tpu.dot_dimension_numbers<[1], [0], [0], [1], [0, 0, 1, 1], [], []>} : vector<16x8xbf16>, vector<8x128xbf16>, vector<16x128xf32> -> vector<16x128xf32>
        %46 = arith.addf %37, %45 : vector<16x128xf32>
        %47 = vector.extract_strided_slice %41 {offsets = [2, 0], sizes = [16, 8], strides = [1, 1]} : vector<20x8xbf16> to vector<16x8xbf16>
        %c4 = arith.constant 4 : index
        %c0_37 = arith.constant 0 : index
        %c0_38 = arith.constant 0 : index
        %48 = vector.load %arg5[%c4, %c0_37, %c0_38] : memref<27x8x128xbf16, #tpu.memory_space<vmem>>, vector<1x8x128xbf16>
        %49 = vector.shape_cast %48 : vector<1x8x128xbf16> to vector<8x128xbf16>
        %cst_39 = arith.constant dense<0.000000e+00> : vector<16x128xf32>
        %50 = tpu.matmul %47, %49, %cst_39 {dimension_numbers = #tpu.dot_dimension_numbers<[1], [0], [0], [1], [0, 0, 1, 1], [], []>} : vector<16x8xbf16>, vector<8x128xbf16>, vector<16x128xf32> -> vector<16x128xf32>
        %51 = arith.addf %46, %50 : vector<16x128xf32>
        %52 = vector.extract_strided_slice %41 {offsets = [4, 0], sizes = [16, 8], strides = [1, 1]} : vector<20x8xbf16> to vector<16x8xbf16>
        %c5 = arith.constant 5 : index
        %c0_40 = arith.constant 0 : index
        %c0_41 = arith.constant 0 : index
        %53 = vector.load %arg5[%c5, %c0_40, %c0_41] : memref<27x8x128xbf16, #tpu.memory_space<vmem>>, vector<1x8x128xbf16>
        %54 = vector.shape_cast %53 : vector<1x8x128xbf16> to vector<8x128xbf16>
        %cst_42 = arith.constant dense<0.000000e+00> : vector<16x128xf32>
        %55 = tpu.matmul %52, %54, %cst_42 {dimension_numbers = #tpu.dot_dimension_numbers<[1], [0], [0], [1], [0, 0, 1, 1], [], []>} : vector<16x8xbf16>, vector<8x128xbf16>, vector<16x128xf32> -> vector<16x128xf32>
        %56 = arith.addf %51, %55 : vector<16x128xf32>
        %c4_i32 = arith.constant 4 : i32
        %57 = arith.addi %arg8, %c4_i32 : i32
        %c0_43 = arith.constant 0 : index
        %c0_44 = arith.constant 0 : index
        %58 = arith.index_cast %57 : i32 to index
        %c0_45 = arith.constant 0 : index
        %c0_46 = arith.constant 0 : index
        %59 = vector.load %arg2[%c0_43, %c0_44, %58, %c0_45, %c0_46] : memref<1x1x20x20x8xbf16, #tpu.memory_space<vmem>>, vector<1x1x1x20x8xbf16>
        %60 = vector.shape_cast %59 : vector<1x1x1x20x8xbf16> to vector<20x8xbf16>
        %61 = vector.extract_strided_slice %60 {offsets = [0, 0], sizes = [16, 8], strides = [1, 1]} : vector<20x8xbf16> to vector<16x8xbf16>
        %c6 = arith.constant 6 : index
        %c0_47 = arith.constant 0 : index
        %c0_48 = arith.constant 0 : index
        %62 = vector.load %arg5[%c6, %c0_47, %c0_48] : memref<27x8x128xbf16, #tpu.memory_space<vmem>>, vector<1x8x128xbf16>
        %63 = vector.shape_cast %62 : vector<1x8x128xbf16> to vector<8x128xbf16>
        %cst_49 = arith.constant dense<0.000000e+00> : vector<16x128xf32>
        %64 = tpu.matmul %61, %63, %cst_49 {dimension_numbers = #tpu.dot_dimension_numbers<[1], [0], [0], [1], [0, 0, 1, 1], [], []>} : vector<16x8xbf16>, vector<8x128xbf16>, vector<16x128xf32> -> vector<16x128xf32>
        %65 = arith.addf %56, %64 : vector<16x128xf32>
        %66 = vector.extract_strided_slice %60 {offsets = [2, 0], sizes = [16, 8], strides = [1, 1]} : vector<20x8xbf16> to vector<16x8xbf16>
        %c7 = arith.constant 7 : index
        %c0_50 = arith.constant 0 : index
        %c0_51 = arith.constant 0 : index
        %67 = vector.load %arg5[%c7, %c0_50, %c0_51] : memref<27x8x128xbf16, #tpu.memory_space<vmem>>, vector<1x8x128xbf16>
        %68 = vector.shape_cast %67 : vector<1x8x128xbf16> to vector<8x128xbf16>
        %cst_52 = arith.constant dense<0.000000e+00> : vector<16x128xf32>
        %69 = tpu.matmul %66, %68, %cst_52 {dimension_numbers = #tpu.dot_dimension_numbers<[1], [0], [0], [1], [0, 0, 1, 1], [], []>} : vector<16x8xbf16>, vector<8x128xbf16>, vector<16x128xf32> -> vector<16x128xf32>
        %70 = arith.addf %65, %69 : vector<16x128xf32>
        %71 = vector.extract_strided_slice %60 {offsets = [4, 0], sizes = [16, 8], strides = [1, 1]} : vector<20x8xbf16> to vector<16x8xbf16>
        %c8 = arith.constant 8 : index
        %c0_53 = arith.constant 0 : index
        %c0_54 = arith.constant 0 : index
        %72 = vector.load %arg5[%c8, %c0_53, %c0_54] : memref<27x8x128xbf16, #tpu.memory_space<vmem>>, vector<1x8x128xbf16>
        %73 = vector.shape_cast %72 : vector<1x8x128xbf16> to vector<8x128xbf16>
        %cst_55 = arith.constant dense<0.000000e+00> : vector<16x128xf32>
        %74 = tpu.matmul %71, %73, %cst_55 {dimension_numbers = #tpu.dot_dimension_numbers<[1], [0], [0], [1], [0, 0, 1, 1], [], []>} : vector<16x8xbf16>, vector<8x128xbf16>, vector<16x128xf32> -> vector<16x128xf32>
        %75 = arith.addf %70, %74 : vector<16x128xf32>
        %c0_i32_56 = arith.constant 0 : i32
        %76 = arith.addi %arg8, %c0_i32_56 : i32
        %c0_57 = arith.constant 0 : index
        %c0_58 = arith.constant 0 : index
        %77 = arith.index_cast %76 : i32 to index
        %c0_59 = arith.constant 0 : index
        %c0_60 = arith.constant 0 : index
        %78 = vector.load %arg3[%c0_57, %c0_58, %77, %c0_59, %c0_60] : memref<1x1x20x20x8xbf16, #tpu.memory_space<vmem>>, vector<1x1x1x20x8xbf16>
        %79 = vector.shape_cast %78 : vector<1x1x1x20x8xbf16> to vector<20x8xbf16>
        %80 = vector.extract_strided_slice %79 {offsets = [0, 0], sizes = [16, 8], strides = [1, 1]} : vector<20x8xbf16> to vector<16x8xbf16>
        %c9 = arith.constant 9 : index
        %c0_61 = arith.constant 0 : index
        %c0_62 = arith.constant 0 : index
        %81 = vector.load %arg5[%c9, %c0_61, %c0_62] : memref<27x8x128xbf16, #tpu.memory_space<vmem>>, vector<1x8x128xbf16>
        %82 = vector.shape_cast %81 : vector<1x8x128xbf16> to vector<8x128xbf16>
        %cst_63 = arith.constant dense<0.000000e+00> : vector<16x128xf32>
        %83 = tpu.matmul %80, %82, %cst_63 {dimension_numbers = #tpu.dot_dimension_numbers<[1], [0], [0], [1], [0, 0, 1, 1], [], []>} : vector<16x8xbf16>, vector<8x128xbf16>, vector<16x128xf32> -> vector<16x128xf32>
        %84 = arith.addf %75, %83 : vector<16x128xf32>
        %85 = vector.extract_strided_slice %79 {offsets = [2, 0], sizes = [16, 8], strides = [1, 1]} : vector<20x8xbf16> to vector<16x8xbf16>
        %c10 = arith.constant 10 : index
        %c0_64 = arith.constant 0 : index
        %c0_65 = arith.constant 0 : index
        %86 = vector.load %arg5[%c10, %c0_64, %c0_65] : memref<27x8x128xbf16, #tpu.memory_space<vmem>>, vector<1x8x128xbf16>
        %87 = vector.shape_cast %86 : vector<1x8x128xbf16> to vector<8x128xbf16>
        %cst_66 = arith.constant dense<0.000000e+00> : vector<16x128xf32>
        %88 = tpu.matmul %85, %87, %cst_66 {dimension_numbers = #tpu.dot_dimension_numbers<[1], [0], [0], [1], [0, 0, 1, 1], [], []>} : vector<16x8xbf16>, vector<8x128xbf16>, vector<16x128xf32> -> vector<16x128xf32>
        %89 = arith.addf %84, %88 : vector<16x128xf32>
        %90 = vector.extract_strided_slice %79 {offsets = [4, 0], sizes = [16, 8], strides = [1, 1]} : vector<20x8xbf16> to vector<16x8xbf16>
        %c11 = arith.constant 11 : index
        %c0_67 = arith.constant 0 : index
        %c0_68 = arith.constant 0 : index
        %91 = vector.load %arg5[%c11, %c0_67, %c0_68] : memref<27x8x128xbf16, #tpu.memory_space<vmem>>, vector<1x8x128xbf16>
        %92 = vector.shape_cast %91 : vector<1x8x128xbf16> to vector<8x128xbf16>
        %cst_69 = arith.constant dense<0.000000e+00> : vector<16x128xf32>
        %93 = tpu.matmul %90, %92, %cst_69 {dimension_numbers = #tpu.dot_dimension_numbers<[1], [0], [0], [1], [0, 0, 1, 1], [], []>} : vector<16x8xbf16>, vector<8x128xbf16>, vector<16x128xf32> -> vector<16x128xf32>
        %94 = arith.addf %89, %93 : vector<16x128xf32>
        %c2_i32_70 = arith.constant 2 : i32
        %95 = arith.addi %arg8, %c2_i32_70 : i32
        %c0_71 = arith.constant 0 : index
        %c0_72 = arith.constant 0 : index
        %96 = arith.index_cast %95 : i32 to index
        %c0_73 = arith.constant 0 : index
        %c0_74 = arith.constant 0 : index
        %97 = vector.load %arg3[%c0_71, %c0_72, %96, %c0_73, %c0_74] : memref<1x1x20x20x8xbf16, #tpu.memory_space<vmem>>, vector<1x1x1x20x8xbf16>
        %98 = vector.shape_cast %97 : vector<1x1x1x20x8xbf16> to vector<20x8xbf16>
        %99 = vector.extract_strided_slice %98 {offsets = [0, 0], sizes = [16, 8], strides = [1, 1]} : vector<20x8xbf16> to vector<16x8xbf16>
        %c12 = arith.constant 12 : index
        %c0_75 = arith.constant 0 : index
        %c0_76 = arith.constant 0 : index
        %100 = vector.load %arg5[%c12, %c0_75, %c0_76] : memref<27x8x128xbf16, #tpu.memory_space<vmem>>, vector<1x8x128xbf16>
        %101 = vector.shape_cast %100 : vector<1x8x128xbf16> to vector<8x128xbf16>
        %cst_77 = arith.constant dense<0.000000e+00> : vector<16x128xf32>
        %102 = tpu.matmul %99, %101, %cst_77 {dimension_numbers = #tpu.dot_dimension_numbers<[1], [0], [0], [1], [0, 0, 1, 1], [], []>} : vector<16x8xbf16>, vector<8x128xbf16>, vector<16x128xf32> -> vector<16x128xf32>
        %103 = arith.addf %94, %102 : vector<16x128xf32>
        %104 = vector.extract_strided_slice %98 {offsets = [2, 0], sizes = [16, 8], strides = [1, 1]} : vector<20x8xbf16> to vector<16x8xbf16>
        %c13 = arith.constant 13 : index
        %c0_78 = arith.constant 0 : index
        %c0_79 = arith.constant 0 : index
        %105 = vector.load %arg5[%c13, %c0_78, %c0_79] : memref<27x8x128xbf16, #tpu.memory_space<vmem>>, vector<1x8x128xbf16>
        %106 = vector.shape_cast %105 : vector<1x8x128xbf16> to vector<8x128xbf16>
        %cst_80 = arith.constant dense<0.000000e+00> : vector<16x128xf32>
        %107 = tpu.matmul %104, %106, %cst_80 {dimension_numbers = #tpu.dot_dimension_numbers<[1], [0], [0], [1], [0, 0, 1, 1], [], []>} : vector<16x8xbf16>, vector<8x128xbf16>, vector<16x128xf32> -> vector<16x128xf32>
        %108 = arith.addf %103, %107 : vector<16x128xf32>
        %109 = vector.extract_strided_slice %98 {offsets = [4, 0], sizes = [16, 8], strides = [1, 1]} : vector<20x8xbf16> to vector<16x8xbf16>
        %c14 = arith.constant 14 : index
        %c0_81 = arith.constant 0 : index
        %c0_82 = arith.constant 0 : index
        %110 = vector.load %arg5[%c14, %c0_81, %c0_82] : memref<27x8x128xbf16, #tpu.memory_space<vmem>>, vector<1x8x128xbf16>
        %111 = vector.shape_cast %110 : vector<1x8x128xbf16> to vector<8x128xbf16>
        %cst_83 = arith.constant dense<0.000000e+00> : vector<16x128xf32>
        %112 = tpu.matmul %109, %111, %cst_83 {dimension_numbers = #tpu.dot_dimension_numbers<[1], [0], [0], [1], [0, 0, 1, 1], [], []>} : vector<16x8xbf16>, vector<8x128xbf16>, vector<16x128xf32> -> vector<16x128xf32>
        %113 = arith.addf %108, %112 : vector<16x128xf32>
        %c4_i32_84 = arith.constant 4 : i32
        %114 = arith.addi %arg8, %c4_i32_84 : i32
        %c0_85 = arith.constant 0 : index
        %c0_86 = arith.constant 0 : index
        %115 = arith.index_cast %114 : i32 to index
        %c0_87 = arith.constant 0 : index
        %c0_88 = arith.constant 0 : index
        %116 = vector.load %arg3[%c0_85, %c0_86, %115, %c0_87, %c0_88] : memref<1x1x20x20x8xbf16, #tpu.memory_space<vmem>>, vector<1x1x1x20x8xbf16>
        %117 = vector.shape_cast %116 : vector<1x1x1x20x8xbf16> to vector<20x8xbf16>
        %118 = vector.extract_strided_slice %117 {offsets = [0, 0], sizes = [16, 8], strides = [1, 1]} : vector<20x8xbf16> to vector<16x8xbf16>
        %c15 = arith.constant 15 : index
        %c0_89 = arith.constant 0 : index
        %c0_90 = arith.constant 0 : index
        %119 = vector.load %arg5[%c15, %c0_89, %c0_90] : memref<27x8x128xbf16, #tpu.memory_space<vmem>>, vector<1x8x128xbf16>
        %120 = vector.shape_cast %119 : vector<1x8x128xbf16> to vector<8x128xbf16>
        %cst_91 = arith.constant dense<0.000000e+00> : vector<16x128xf32>
        %121 = tpu.matmul %118, %120, %cst_91 {dimension_numbers = #tpu.dot_dimension_numbers<[1], [0], [0], [1], [0, 0, 1, 1], [], []>} : vector<16x8xbf16>, vector<8x128xbf16>, vector<16x128xf32> -> vector<16x128xf32>
        %122 = arith.addf %113, %121 : vector<16x128xf32>
        %123 = vector.extract_strided_slice %117 {offsets = [2, 0], sizes = [16, 8], strides = [1, 1]} : vector<20x8xbf16> to vector<16x8xbf16>
        %c16 = arith.constant 16 : index
        %c0_92 = arith.constant 0 : index
        %c0_93 = arith.constant 0 : index
        %124 = vector.load %arg5[%c16, %c0_92, %c0_93] : memref<27x8x128xbf16, #tpu.memory_space<vmem>>, vector<1x8x128xbf16>
        %125 = vector.shape_cast %124 : vector<1x8x128xbf16> to vector<8x128xbf16>
        %cst_94 = arith.constant dense<0.000000e+00> : vector<16x128xf32>
        %126 = tpu.matmul %123, %125, %cst_94 {dimension_numbers = #tpu.dot_dimension_numbers<[1], [0], [0], [1], [0, 0, 1, 1], [], []>} : vector<16x8xbf16>, vector<8x128xbf16>, vector<16x128xf32> -> vector<16x128xf32>
        %127 = arith.addf %122, %126 : vector<16x128xf32>
        %128 = vector.extract_strided_slice %117 {offsets = [4, 0], sizes = [16, 8], strides = [1, 1]} : vector<20x8xbf16> to vector<16x8xbf16>
        %c17 = arith.constant 17 : index
        %c0_95 = arith.constant 0 : index
        %c0_96 = arith.constant 0 : index
        %129 = vector.load %arg5[%c17, %c0_95, %c0_96] : memref<27x8x128xbf16, #tpu.memory_space<vmem>>, vector<1x8x128xbf16>
        %130 = vector.shape_cast %129 : vector<1x8x128xbf16> to vector<8x128xbf16>
        %cst_97 = arith.constant dense<0.000000e+00> : vector<16x128xf32>
        %131 = tpu.matmul %128, %130, %cst_97 {dimension_numbers = #tpu.dot_dimension_numbers<[1], [0], [0], [1], [0, 0, 1, 1], [], []>} : vector<16x8xbf16>, vector<8x128xbf16>, vector<16x128xf32> -> vector<16x128xf32>
        %132 = arith.addf %127, %131 : vector<16x128xf32>
        %c0_i32_98 = arith.constant 0 : i32
        %133 = arith.addi %arg8, %c0_i32_98 : i32
        %c0_99 = arith.constant 0 : index
        %c0_100 = arith.constant 0 : index
        %134 = arith.index_cast %133 : i32 to index
        %c0_101 = arith.constant 0 : index
        %c0_102 = arith.constant 0 : index
        %135 = vector.load %arg4[%c0_99, %c0_100, %134, %c0_101, %c0_102] : memref<1x1x20x20x8xbf16, #tpu.memory_space<vmem>>, vector<1x1x1x20x8xbf16>
        %136 = vector.shape_cast %135 : vector<1x1x1x20x8xbf16> to vector<20x8xbf16>
        %137 = vector.extract_strided_slice %136 {offsets = [0, 0], sizes = [16, 8], strides = [1, 1]} : vector<20x8xbf16> to vector<16x8xbf16>
        %c18 = arith.constant 18 : index
        %c0_103 = arith.constant 0 : index
        %c0_104 = arith.constant 0 : index
        %138 = vector.load %arg5[%c18, %c0_103, %c0_104] : memref<27x8x128xbf16, #tpu.memory_space<vmem>>, vector<1x8x128xbf16>
        %139 = vector.shape_cast %138 : vector<1x8x128xbf16> to vector<8x128xbf16>
        %cst_105 = arith.constant dense<0.000000e+00> : vector<16x128xf32>
        %140 = tpu.matmul %137, %139, %cst_105 {dimension_numbers = #tpu.dot_dimension_numbers<[1], [0], [0], [1], [0, 0, 1, 1], [], []>} : vector<16x8xbf16>, vector<8x128xbf16>, vector<16x128xf32> -> vector<16x128xf32>
        %141 = arith.addf %132, %140 : vector<16x128xf32>
        %142 = vector.extract_strided_slice %136 {offsets = [2, 0], sizes = [16, 8], strides = [1, 1]} : vector<20x8xbf16> to vector<16x8xbf16>
        %c19 = arith.constant 19 : index
        %c0_106 = arith.constant 0 : index
        %c0_107 = arith.constant 0 : index
        %143 = vector.load %arg5[%c19, %c0_106, %c0_107] : memref<27x8x128xbf16, #tpu.memory_space<vmem>>, vector<1x8x128xbf16>
        %144 = vector.shape_cast %143 : vector<1x8x128xbf16> to vector<8x128xbf16>
        %cst_108 = arith.constant dense<0.000000e+00> : vector<16x128xf32>
        %145 = tpu.matmul %142, %144, %cst_108 {dimension_numbers = #tpu.dot_dimension_numbers<[1], [0], [0], [1], [0, 0, 1, 1], [], []>} : vector<16x8xbf16>, vector<8x128xbf16>, vector<16x128xf32> -> vector<16x128xf32>
        %146 = arith.addf %141, %145 : vector<16x128xf32>
        %147 = vector.extract_strided_slice %136 {offsets = [4, 0], sizes = [16, 8], strides = [1, 1]} : vector<20x8xbf16> to vector<16x8xbf16>
        %c20 = arith.constant 20 : index
        %c0_109 = arith.constant 0 : index
        %c0_110 = arith.constant 0 : index
        %148 = vector.load %arg5[%c20, %c0_109, %c0_110] : memref<27x8x128xbf16, #tpu.memory_space<vmem>>, vector<1x8x128xbf16>
        %149 = vector.shape_cast %148 : vector<1x8x128xbf16> to vector<8x128xbf16>
        %cst_111 = arith.constant dense<0.000000e+00> : vector<16x128xf32>
        %150 = tpu.matmul %147, %149, %cst_111 {dimension_numbers = #tpu.dot_dimension_numbers<[1], [0], [0], [1], [0, 0, 1, 1], [], []>} : vector<16x8xbf16>, vector<8x128xbf16>, vector<16x128xf32> -> vector<16x128xf32>
        %151 = arith.addf %146, %150 : vector<16x128xf32>
        %c2_i32_112 = arith.constant 2 : i32
        %152 = arith.addi %arg8, %c2_i32_112 : i32
        %c0_113 = arith.constant 0 : index
        %c0_114 = arith.constant 0 : index
        %153 = arith.index_cast %152 : i32 to index
        %c0_115 = arith.constant 0 : index
        %c0_116 = arith.constant 0 : index
        %154 = vector.load %arg4[%c0_113, %c0_114, %153, %c0_115, %c0_116] : memref<1x1x20x20x8xbf16, #tpu.memory_space<vmem>>, vector<1x1x1x20x8xbf16>
        %155 = vector.shape_cast %154 : vector<1x1x1x20x8xbf16> to vector<20x8xbf16>
        %156 = vector.extract_strided_slice %155 {offsets = [0, 0], sizes = [16, 8], strides = [1, 1]} : vector<20x8xbf16> to vector<16x8xbf16>
        %c21 = arith.constant 21 : index
        %c0_117 = arith.constant 0 : index
        %c0_118 = arith.constant 0 : index
        %157 = vector.load %arg5[%c21, %c0_117, %c0_118] : memref<27x8x128xbf16, #tpu.memory_space<vmem>>, vector<1x8x128xbf16>
        %158 = vector.shape_cast %157 : vector<1x8x128xbf16> to vector<8x128xbf16>
        %cst_119 = arith.constant dense<0.000000e+00> : vector<16x128xf32>
        %159 = tpu.matmul %156, %158, %cst_119 {dimension_numbers = #tpu.dot_dimension_numbers<[1], [0], [0], [1], [0, 0, 1, 1], [], []>} : vector<16x8xbf16>, vector<8x128xbf16>, vector<16x128xf32> -> vector<16x128xf32>
        %160 = arith.addf %151, %159 : vector<16x128xf32>
        %161 = vector.extract_strided_slice %155 {offsets = [2, 0], sizes = [16, 8], strides = [1, 1]} : vector<20x8xbf16> to vector<16x8xbf16>
        %c22 = arith.constant 22 : index
        %c0_120 = arith.constant 0 : index
        %c0_121 = arith.constant 0 : index
        %162 = vector.load %arg5[%c22, %c0_120, %c0_121] : memref<27x8x128xbf16, #tpu.memory_space<vmem>>, vector<1x8x128xbf16>
        %163 = vector.shape_cast %162 : vector<1x8x128xbf16> to vector<8x128xbf16>
        %cst_122 = arith.constant dense<0.000000e+00> : vector<16x128xf32>
        %164 = tpu.matmul %161, %163, %cst_122 {dimension_numbers = #tpu.dot_dimension_numbers<[1], [0], [0], [1], [0, 0, 1, 1], [], []>} : vector<16x8xbf16>, vector<8x128xbf16>, vector<16x128xf32> -> vector<16x128xf32>
        %165 = arith.addf %160, %164 : vector<16x128xf32>
        %166 = vector.extract_strided_slice %155 {offsets = [4, 0], sizes = [16, 8], strides = [1, 1]} : vector<20x8xbf16> to vector<16x8xbf16>
        %c23 = arith.constant 23 : index
        %c0_123 = arith.constant 0 : index
        %c0_124 = arith.constant 0 : index
        %167 = vector.load %arg5[%c23, %c0_123, %c0_124] : memref<27x8x128xbf16, #tpu.memory_space<vmem>>, vector<1x8x128xbf16>
        %168 = vector.shape_cast %167 : vector<1x8x128xbf16> to vector<8x128xbf16>
        %cst_125 = arith.constant dense<0.000000e+00> : vector<16x128xf32>
        %169 = tpu.matmul %166, %168, %cst_125 {dimension_numbers = #tpu.dot_dimension_numbers<[1], [0], [0], [1], [0, 0, 1, 1], [], []>} : vector<16x8xbf16>, vector<8x128xbf16>, vector<16x128xf32> -> vector<16x128xf32>
        %170 = arith.addf %165, %169 : vector<16x128xf32>
        %c4_i32_126 = arith.constant 4 : i32
        %171 = arith.addi %arg8, %c4_i32_126 : i32
        %c0_127 = arith.constant 0 : index
        %c0_128 = arith.constant 0 : index
        %172 = arith.index_cast %171 : i32 to index
        %c0_129 = arith.constant 0 : index
        %c0_130 = arith.constant 0 : index
        %173 = vector.load %arg4[%c0_127, %c0_128, %172, %c0_129, %c0_130] : memref<1x1x20x20x8xbf16, #tpu.memory_space<vmem>>, vector<1x1x1x20x8xbf16>
        %174 = vector.shape_cast %173 : vector<1x1x1x20x8xbf16> to vector<20x8xbf16>
        %175 = vector.extract_strided_slice %174 {offsets = [0, 0], sizes = [16, 8], strides = [1, 1]} : vector<20x8xbf16> to vector<16x8xbf16>
        %c24 = arith.constant 24 : index
        %c0_131 = arith.constant 0 : index
        %c0_132 = arith.constant 0 : index
        %176 = vector.load %arg5[%c24, %c0_131, %c0_132] : memref<27x8x128xbf16, #tpu.memory_space<vmem>>, vector<1x8x128xbf16>
        %177 = vector.shape_cast %176 : vector<1x8x128xbf16> to vector<8x128xbf16>
        %cst_133 = arith.constant dense<0.000000e+00> : vector<16x128xf32>
        %178 = tpu.matmul %175, %177, %cst_133 {dimension_numbers = #tpu.dot_dimension_numbers<[1], [0], [0], [1], [0, 0, 1, 1], [], []>} : vector<16x8xbf16>, vector<8x128xbf16>, vector<16x128xf32> -> vector<16x128xf32>
        %179 = arith.addf %170, %178 : vector<16x128xf32>
        %180 = vector.extract_strided_slice %174 {offsets = [2, 0], sizes = [16, 8], strides = [1, 1]} : vector<20x8xbf16> to vector<16x8xbf16>
        %c25 = arith.constant 25 : index
        %c0_134 = arith.constant 0 : index
        %c0_135 = arith.constant 0 : index
        %181 = vector.load %arg5[%c25, %c0_134, %c0_135] : memref<27x8x128xbf16, #tpu.memory_space<vmem>>, vector<1x8x128xbf16>
        %182 = vector.shape_cast %181 : vector<1x8x128xbf16> to vector<8x128xbf16>
        %cst_136 = arith.constant dense<0.000000e+00> : vector<16x128xf32>
        %183 = tpu.matmul %180, %182, %cst_136 {dimension_numbers = #tpu.dot_dimension_numbers<[1], [0], [0], [1], [0, 0, 1, 1], [], []>} : vector<16x8xbf16>, vector<8x128xbf16>, vector<16x128xf32> -> vector<16x128xf32>
        %184 = arith.addf %179, %183 : vector<16x128xf32>
        %185 = vector.extract_strided_slice %174 {offsets = [4, 0], sizes = [16, 8], strides = [1, 1]} : vector<20x8xbf16> to vector<16x8xbf16>
        %c26 = arith.constant 26 : index
        %c0_137 = arith.constant 0 : index
        %c0_138 = arith.constant 0 : index
        %186 = vector.load %arg5[%c26, %c0_137, %c0_138] : memref<27x8x128xbf16, #tpu.memory_space<vmem>>, vector<1x8x128xbf16>
        %187 = vector.shape_cast %186 : vector<1x8x128xbf16> to vector<8x128xbf16>
        %cst_139 = arith.constant dense<0.000000e+00> : vector<16x128xf32>
        %188 = tpu.matmul %185, %187, %cst_139 {dimension_numbers = #tpu.dot_dimension_numbers<[1], [0], [0], [1], [0, 0, 1, 1], [], []>} : vector<16x8xbf16>, vector<8x128xbf16>, vector<16x128xf32> -> vector<16x128xf32>
        %189 = arith.addf %184, %188 : vector<16x128xf32>
        %190 = vector.extract_strided_slice %189 {offsets = [0, 0], sizes = [16, 8], strides = [1, 1]} : vector<16x128xf32> to vector<16x8xf32>
        %191 = arith.truncf %190 : vector<16x8xf32> to vector<16x8xbf16>
        %cst_140 = arith.constant 0.000000e+00 : bf16
        %192 = vector.broadcast %cst_140 : bf16 to vector<1x8xbf16>
        %193 = tpu.concatenate %192, %191, %192 in 0 : vector<1x8xbf16>, vector<16x8xbf16>, vector<1x8xbf16> -> vector<18x8xbf16>
        %c1_i32_141 = arith.constant 1 : i32
        %194 = arith.addi %arg8, %c1_i32_141 : i32
        %c0_142 = arith.constant 0 : index
        %c0_143 = arith.constant 0 : index
        %195 = arith.index_cast %194 : i32 to index
        %c0_144 = arith.constant 0 : index
        %c0_145 = arith.constant 0 : index
        %196 = vector.load %arg6[%c0_142, %c0_143, %195, %c0_144, %c0_145] : memref<1x1x18x18x8xbf16, #tpu.memory_space<vmem>>, vector<1x1x1x18x8xbf16>
        %197 = vector.shape_cast %196 : vector<1x1x1x18x8xbf16> to vector<18x8xbf16>
        %198 = vector.shape_cast %193 : vector<18x8xbf16> to vector<1x1x1x18x8xbf16>
        tpu.vector_store %arg6[%c0_142, %c0_143, %195, %c0_144, %c0_145], %198 {strides = array<i32>} : memref<1x1x18x18x8xbf16, #tpu.memory_space<vmem>>, vector<1x1x1x18x8xbf16>,
        %cst_146 = arith.constant dense<0.000000e+00> : vector<128xf32>
        %199 = vector.multi_reduction <add>, %189, %cst_146 [0] : vector<16x128xf32> to vector<128xf32>
        %200 = vector.shape_cast %199 : vector<128xf32> to vector<1x128xf32>
        %201 = arith.mulf %189, %189 : vector<16x128xf32>
        %cst_147 = arith.constant dense<0.000000e+00> : vector<128xf32>
        %202 = vector.multi_reduction <add>, %201, %cst_147 [0] : vector<16x128xf32> to vector<128xf32>
        %203 = vector.shape_cast %202 : vector<128xf32> to vector<1x128xf32>
        %204 = tpu.concatenate %200, %203 in 0 : vector<1x128xf32>, vector<1x128xf32> -> vector<2x128xf32>
        %205 = arith.addf %arg9, %204 : vector<2x128xf32>
        scf.yield %205 : vector<2x128xf32>
      }
      %c16_i32_9 = arith.constant 16 : i32
      %c0_10 = arith.constant 0 : index
      %c0_11 = arith.constant 0 : index
      %c0_12 = arith.constant 0 : index
      %c0_13 = arith.constant 0 : index
      %15 = vector.load %arg7[%c0_10, %c0_11, %c0_12, %c0_13] : memref<1x1x2x128xf32, #tpu.memory_space<vmem>>, vector<1x1x2x128xf32>
      %16 = vector.shape_cast %15 : vector<1x1x2x128xf32> to vector<2x128xf32>
      %17 = vector.shape_cast %14 : vector<2x128xf32> to vector<1x1x2x128xf32>
      tpu.vector_store %arg7[%c0_10, %c0_11, %c0_12, %c0_13], %17 {strides = array<i32>} : memref<1x1x2x128xf32, #tpu.memory_space<vmem>>, vector<1x1x2x128xf32>,
    } else {
    }
    %true = arith.constant true
    %9 = arith.xori %2, %true : i1
    %10 = arith.extui %9 : i1 to i32
    %c0_i32_4 = arith.constant 0 : i32
    %11 = arith.cmpi ne, %10, %c0_i32_4 : i32
    scf.if %11 {
      %cst_5 = arith.constant 0.000000e+00 : f32
      %12 = vector.broadcast %cst_5 : f32 to vector<2x128xf32>
      %c0_6 = arith.constant 0 : index
      %c0_7 = arith.constant 0 : index
      %c0_8 = arith.constant 0 : index
      %c0_9 = arith.constant 0 : index
      %13 = vector.load %arg7[%c0_6, %c0_7, %c0_8, %c0_9] : memref<1x1x2x128xf32, #tpu.memory_space<vmem>>, vector<1x1x2x128xf32>
      %14 = vector.shape_cast %13 : vector<1x1x2x128xf32> to vector<2x128xf32>
      %15 = vector.shape_cast %12 : vector<2x128xf32> to vector<1x1x2x128xf32>
      tpu.vector_store %arg7[%c0_6, %c0_7, %c0_8, %c0_9], %15 {strides = array<i32>} : memref<1x1x2x128xf32, #tpu.memory_space<vmem>>, vector<1x1x2x128xf32>,
    } else {
    }
    return
  }
  func.func @transform_0(%arg0: i32, %arg1: i32) -> (i32, i32, i32, i32, i32) {
    %c1_i32 = arith.constant 1 : i32
    %0 = arith.subi %arg1, %c1_i32 : i32
    %c0_i32 = arith.constant 0 : i32
    %c15_i32 = arith.constant 15 : i32
    %1 = arith.maxsi %c0_i32, %0 : i32
    %2 = arith.minsi %c15_i32, %1 : i32
    %c0_i32_0 = arith.constant 0 : i32
    %3 = arith.addi %2, %c0_i32_0 : i32
    %c0_i32_1 = arith.constant 0 : i32
    %c0_i32_2 = arith.constant 0 : i32
    %c0_i32_3 = arith.constant 0 : i32
    %c0_i32_4 = arith.constant 0 : i32
    return %arg0, %3, %c0_i32_1, %c0_i32_2, %c0_i32_3 : i32, i32, i32, i32, i32
  }
  func.func @transform_1(%arg0: i32, %arg1: i32) -> (i32, i32, i32, i32, i32) {
    %c1_i32 = arith.constant 1 : i32
    %0 = arith.subi %arg1, %c1_i32 : i32
    %c0_i32 = arith.constant 0 : i32
    %c15_i32 = arith.constant 15 : i32
    %1 = arith.maxsi %c0_i32, %0 : i32
    %2 = arith.minsi %c15_i32, %1 : i32
    %c2_i32 = arith.constant 2 : i32
    %3 = arith.addi %2, %c2_i32 : i32
    %c0_i32_0 = arith.constant 0 : i32
    %c0_i32_1 = arith.constant 0 : i32
    %c0_i32_2 = arith.constant 0 : i32
    %c0_i32_3 = arith.constant 0 : i32
    return %arg0, %3, %c0_i32_0, %c0_i32_1, %c0_i32_2 : i32, i32, i32, i32, i32
  }
  func.func @transform_2(%arg0: i32, %arg1: i32) -> (i32, i32, i32, i32, i32) {
    %c1_i32 = arith.constant 1 : i32
    %0 = arith.subi %arg1, %c1_i32 : i32
    %c0_i32 = arith.constant 0 : i32
    %c15_i32 = arith.constant 15 : i32
    %1 = arith.maxsi %c0_i32, %0 : i32
    %2 = arith.minsi %c15_i32, %1 : i32
    %c4_i32 = arith.constant 4 : i32
    %3 = arith.addi %2, %c4_i32 : i32
    %c0_i32_0 = arith.constant 0 : i32
    %c0_i32_1 = arith.constant 0 : i32
    %c0_i32_2 = arith.constant 0 : i32
    %c0_i32_3 = arith.constant 0 : i32
    return %arg0, %3, %c0_i32_0, %c0_i32_1, %c0_i32_2 : i32, i32, i32, i32, i32
  }
  func.func @transform_3(%arg0: i32, %arg1: i32) -> (i32, i32, i32) {
    %c0_i32 = arith.constant 0 : i32
    %c0_i32_0 = arith.constant 0 : i32
    %c0_i32_1 = arith.constant 0 : i32
    %c0_i32_2 = arith.constant 0 : i32
    return %c0_i32, %c0_i32_0, %c0_i32_1 : i32, i32, i32
  }
  func.func @transform_4(%arg0: i32, %arg1: i32) -> (i32, i32, i32, i32, i32) {
    %c0_i32 = arith.constant 0 : i32
    %c0_i32_0 = arith.constant 0 : i32
    %c0_i32_1 = arith.constant 0 : i32
    %c0_i32_2 = arith.constant 0 : i32
    return %arg0, %arg1, %c0_i32, %c0_i32_0, %c0_i32_1 : i32, i32, i32, i32, i32
  }
  func.func @transform_5(%arg0: i32, %arg1: i32) -> (i32, i32, i32, i32) {
    %c0_i32 = arith.constant 0 : i32
    %c0_i32_0 = arith.constant 0 : i32
    %c0_i32_1 = arith.constant 0 : i32
    return %arg0, %arg1, %c0_i32, %c0_i32_0 : i32, i32, i32, i32
  }
}

module attributes {stable_mosaic.version = 11 : i64} {
  func.func @_conv_plane_kernel(%arg0: i32, %arg1: i32, %arg2: memref<1x1x18x18x8xbf16, #tpu.memory_space<vmem>>, %arg3: memref<1x1x18x18x8xbf16, #tpu.memory_space<vmem>>, %arg4: memref<1x1x18x18x8xbf16, #tpu.memory_space<vmem>>, %arg5: memref<27x8x128xbf16, #tpu.memory_space<vmem>>, %arg6: memref<1x2x128xf32, #tpu.memory_space<vmem>>, %arg7: memref<1x1x16x16x8xbf16, #tpu.memory_space<vmem>>, %arg8: memref<1x1x2x128xf32, #tpu.memory_space<vmem>>) attributes {dimension_semantics = [#tpu.dimension_semantics<parallel>, #tpu.dimension_semantics<parallel>], iteration_bounds = array<i64: 2, 16>, scalar_prefetch = 0 : i64, scratch_operands = 0 : i64, tpu.core_type = #tpu.core_type<tc>, window_params = [{transform_indices = @transform_0, window_bounds = array<i64: 1, 1, 18, 18, 8>}, {transform_indices = @transform_1, window_bounds = array<i64: 1, 1, 18, 18, 8>}, {transform_indices = @transform_2, window_bounds = array<i64: 1, 1, 18, 18, 8>}, {pipeline_mode = #tpu.pipeline_mode<synchronous>, transform_indices = @transform_3, window_bounds = array<i64: 27, 8, 128>}, {transform_indices = @transform_4, window_bounds = array<i64: 1, 2, 128>}, {transform_indices = @transform_5, window_bounds = array<i64: 1, 1, 16, 16, 8>}, {transform_indices = @transform_6, window_bounds = array<i64: 1, 1, 2, 128>}]} {
    %c0 = arith.constant 0 : index
    %c0_0 = arith.constant 0 : index
    %c0_1 = arith.constant 0 : index
    %0 = vector.load %arg6[%c0, %c0_0, %c0_1] : memref<1x2x128xf32, #tpu.memory_space<vmem>>, vector<1x2x128xf32>
    %1 = vector.shape_cast %0 : vector<1x2x128xf32> to vector<2x128xf32>
    %2 = vector.extract_strided_slice %1 {offsets = [0, 0], sizes = [1, 8], strides = [1, 1]} : vector<2x128xf32> to vector<1x8xf32>
    %3 = vector.extract_strided_slice %1 {offsets = [1, 0], sizes = [1, 8], strides = [1, 1]} : vector<2x128xf32> to vector<1x8xf32>
    %4 = tpu.iota {dimensions = array<i32: 0>} : vector<18x1xi32>
    %c1_i32 = arith.constant 1 : i32
    %5 = vector.broadcast %c1_i32 : i32 to vector<18x1xi32>
    %6 = arith.cmpi sge, %4, %5 : vector<18x1xi32>
    %c16_i32 = arith.constant 16 : i32
    %7 = vector.broadcast %c16_i32 : i32 to vector<18x1xi32>
    %8 = arith.cmpi sle, %4, %7 : vector<18x1xi32>
    %9 = arith.andi %6, %8 : vector<18x1xi1>
    %cst = arith.constant 1.000000e+00 : f32
    %cst_2 = arith.constant 0.000000e+00 : f32
    %10 = vector.broadcast %cst : f32 to vector<18x1xf32>
    %11 = vector.broadcast %cst_2 : f32 to vector<18x1xf32>
    %12 = arith.select %9, %10, %11 : vector<18x1xi1>, vector<18x1xf32>
    %c0_i32 = arith.constant 0 : i32
    %13 = arith.addi %arg1, %c0_i32 : i32
    %c1_i32_3 = arith.constant 1 : i32
    %14 = arith.cmpi sge, %13, %c1_i32_3 : i32
    %c0_i32_4 = arith.constant 0 : i32
    %15 = arith.addi %arg1, %c0_i32_4 : i32
    %c16_i32_5 = arith.constant 16 : i32
    %16 = arith.cmpi sle, %15, %c16_i32_5 : i32
    %17 = arith.andi %14, %16 : i1
    %cst_6 = arith.constant 1.000000e+00 : f32
    %cst_7 = arith.constant 0.000000e+00 : f32
    %18 = arith.select %17, %cst_6, %cst_7 : f32
    %c1_i32_8 = arith.constant 1 : i32
    %19 = arith.addi %arg1, %c1_i32_8 : i32
    %c1_i32_9 = arith.constant 1 : i32
    %20 = arith.cmpi sge, %19, %c1_i32_9 : i32
    %c1_i32_10 = arith.constant 1 : i32
    %21 = arith.addi %arg1, %c1_i32_10 : i32
    %c16_i32_11 = arith.constant 16 : i32
    %22 = arith.cmpi sle, %21, %c16_i32_11 : i32
    %23 = arith.andi %20, %22 : i1
    %cst_12 = arith.constant 1.000000e+00 : f32
    %cst_13 = arith.constant 0.000000e+00 : f32
    %24 = arith.select %23, %cst_12, %cst_13 : f32
    %c2_i32 = arith.constant 2 : i32
    %25 = arith.addi %arg1, %c2_i32 : i32
    %c1_i32_14 = arith.constant 1 : i32
    %26 = arith.cmpi sge, %25, %c1_i32_14 : i32
    %c2_i32_15 = arith.constant 2 : i32
    %27 = arith.addi %arg1, %c2_i32_15 : i32
    %c16_i32_16 = arith.constant 16 : i32
    %28 = arith.cmpi sle, %27, %c16_i32_16 : i32
    %29 = arith.andi %26, %28 : i1
    %cst_17 = arith.constant 1.000000e+00 : f32
    %cst_18 = arith.constant 0.000000e+00 : f32
    %30 = arith.select %29, %cst_17, %cst_18 : f32
    %cst_19 = arith.constant 0.000000e+00 : f32
    %31 = vector.broadcast %cst_19 : f32 to vector<2x128xf32>
    %c0_i32_20 = arith.constant 0 : i32
    %c16_i32_21 = arith.constant 16 : i32
    %32 = arith.addi %c0_i32_20, %c16_i32_21 : i32
    %c1_i32_22 = arith.constant 1 : i32
    %33 = scf.for %arg9 = %c0_i32_20 to %32 step %c1_i32_22 iter_args(%arg10 = %31) -> (vector<2x128xf32>)  : i32 {
      %cst_28 = arith.constant 0.000000e+00 : f32
      %37 = vector.broadcast %cst_28 : f32 to vector<16x128xf32>
      %c0_i32_29 = arith.constant 0 : i32
      %38 = arith.addi %arg9, %c0_i32_29 : i32
      %c0_30 = arith.constant 0 : index
      %c0_31 = arith.constant 0 : index
      %39 = arith.index_cast %38 : i32 to index
      %c0_32 = arith.constant 0 : index
      %c0_33 = arith.constant 0 : index
      %40 = vector.load %arg2[%c0_30, %c0_31, %39, %c0_32, %c0_33] : memref<1x1x18x18x8xbf16, #tpu.memory_space<vmem>>, vector<1x1x1x18x8xbf16>
      %41 = vector.shape_cast %40 : vector<1x1x1x18x8xbf16> to vector<18x8xbf16>
      %42 = arith.extf %41 : vector<18x8xbf16> to vector<18x8xf32>
      %43 = vector.broadcast %2 : vector<1x8xf32> to vector<18x8xf32>
      %44 = arith.subf %42, %43 : vector<18x8xf32>
      %45 = vector.broadcast %3 : vector<1x8xf32> to vector<18x8xf32>
      %46 = arith.mulf %44, %45 : vector<18x8xf32>
      %cst_34 = arith.constant 0.000000e+00 : f32
      %47 = vector.broadcast %cst_34 : f32 to vector<18x8xf32>
      %48 = arith.maximumf %46, %47 : vector<18x8xf32>
      %c1_i32_35 = arith.constant 1 : i32
      %49 = arith.cmpi sge, %38, %c1_i32_35 : i32
      %c16_i32_36 = arith.constant 16 : i32
      %50 = arith.cmpi sle, %38, %c16_i32_36 : i32
      %51 = arith.andi %49, %50 : i1
      %cst_37 = arith.constant 1.000000e+00 : f32
      %cst_38 = arith.constant 0.000000e+00 : f32
      %52 = arith.select %51, %cst_37, %cst_38 : f32
      %53 = arith.mulf %18, %52 : f32
      %54 = vector.broadcast %53 : f32 to vector<18x1xf32>
      %55 = arith.mulf %12, %54 : vector<18x1xf32>
      %56 = vector.broadcast %55 : vector<18x1xf32> to vector<18x8xf32>
      %57 = arith.mulf %48, %56 : vector<18x8xf32>
      %58 = arith.truncf %57 : vector<18x8xf32> to vector<18x8xbf16>
      %59 = vector.extract_strided_slice %58 {offsets = [0, 0], sizes = [16, 8], strides = [1, 1]} : vector<18x8xbf16> to vector<16x8xbf16>
      %c0_39 = arith.constant 0 : index
      %c0_40 = arith.constant 0 : index
      %c0_41 = arith.constant 0 : index
      %60 = vector.load %arg5[%c0_39, %c0_40, %c0_41] : memref<27x8x128xbf16, #tpu.memory_space<vmem>>, vector<1x8x128xbf16>
      %61 = vector.shape_cast %60 : vector<1x8x128xbf16> to vector<8x128xbf16>
      %cst_42 = arith.constant dense<0.000000e+00> : vector<16x128xf32>
      %62 = tpu.matmul %59, %61, %cst_42 {dimension_numbers = #tpu.dot_dimension_numbers<[1], [0], [0], [1], [0, 0, 1, 1], [], []>} : vector<16x8xbf16>, vector<8x128xbf16>, vector<16x128xf32> -> vector<16x128xf32>
      %63 = arith.addf %37, %62 : vector<16x128xf32>
      %64 = vector.extract_strided_slice %58 {offsets = [1, 0], sizes = [16, 8], strides = [1, 1]} : vector<18x8xbf16> to vector<16x8xbf16>
      %c1 = arith.constant 1 : index
      %c0_43 = arith.constant 0 : index
      %c0_44 = arith.constant 0 : index
      %65 = vector.load %arg5[%c1, %c0_43, %c0_44] : memref<27x8x128xbf16, #tpu.memory_space<vmem>>, vector<1x8x128xbf16>
      %66 = vector.shape_cast %65 : vector<1x8x128xbf16> to vector<8x128xbf16>
      %cst_45 = arith.constant dense<0.000000e+00> : vector<16x128xf32>
      %67 = tpu.matmul %64, %66, %cst_45 {dimension_numbers = #tpu.dot_dimension_numbers<[1], [0], [0], [1], [0, 0, 1, 1], [], []>} : vector<16x8xbf16>, vector<8x128xbf16>, vector<16x128xf32> -> vector<16x128xf32>
      %68 = arith.addf %63, %67 : vector<16x128xf32>
      %69 = vector.extract_strided_slice %58 {offsets = [2, 0], sizes = [16, 8], strides = [1, 1]} : vector<18x8xbf16> to vector<16x8xbf16>
      %c2 = arith.constant 2 : index
      %c0_46 = arith.constant 0 : index
      %c0_47 = arith.constant 0 : index
      %70 = vector.load %arg5[%c2, %c0_46, %c0_47] : memref<27x8x128xbf16, #tpu.memory_space<vmem>>, vector<1x8x128xbf16>
      %71 = vector.shape_cast %70 : vector<1x8x128xbf16> to vector<8x128xbf16>
      %cst_48 = arith.constant dense<0.000000e+00> : vector<16x128xf32>
      %72 = tpu.matmul %69, %71, %cst_48 {dimension_numbers = #tpu.dot_dimension_numbers<[1], [0], [0], [1], [0, 0, 1, 1], [], []>} : vector<16x8xbf16>, vector<8x128xbf16>, vector<16x128xf32> -> vector<16x128xf32>
      %73 = arith.addf %68, %72 : vector<16x128xf32>
      %c1_i32_49 = arith.constant 1 : i32
      %74 = arith.addi %arg9, %c1_i32_49 : i32
      %c0_50 = arith.constant 0 : index
      %c0_51 = arith.constant 0 : index
      %75 = arith.index_cast %74 : i32 to index
      %c0_52 = arith.constant 0 : index
      %c0_53 = arith.constant 0 : index
      %76 = vector.load %arg2[%c0_50, %c0_51, %75, %c0_52, %c0_53] : memref<1x1x18x18x8xbf16, #tpu.memory_space<vmem>>, vector<1x1x1x18x8xbf16>
      %77 = vector.shape_cast %76 : vector<1x1x1x18x8xbf16> to vector<18x8xbf16>
      %78 = arith.extf %77 : vector<18x8xbf16> to vector<18x8xf32>
      %79 = vector.broadcast %2 : vector<1x8xf32> to vector<18x8xf32>
      %80 = arith.subf %78, %79 : vector<18x8xf32>
      %81 = vector.broadcast %3 : vector<1x8xf32> to vector<18x8xf32>
      %82 = arith.mulf %80, %81 : vector<18x8xf32>
      %cst_54 = arith.constant 0.000000e+00 : f32
      %83 = vector.broadcast %cst_54 : f32 to vector<18x8xf32>
      %84 = arith.maximumf %82, %83 : vector<18x8xf32>
      %c1_i32_55 = arith.constant 1 : i32
      %85 = arith.cmpi sge, %74, %c1_i32_55 : i32
      %c16_i32_56 = arith.constant 16 : i32
      %86 = arith.cmpi sle, %74, %c16_i32_56 : i32
      %87 = arith.andi %85, %86 : i1
      %cst_57 = arith.constant 1.000000e+00 : f32
      %cst_58 = arith.constant 0.000000e+00 : f32
      %88 = arith.select %87, %cst_57, %cst_58 : f32
      %89 = arith.mulf %18, %88 : f32
      %90 = vector.broadcast %89 : f32 to vector<18x1xf32>
      %91 = arith.mulf %12, %90 : vector<18x1xf32>
      %92 = vector.broadcast %91 : vector<18x1xf32> to vector<18x8xf32>
      %93 = arith.mulf %84, %92 : vector<18x8xf32>
      %94 = arith.truncf %93 : vector<18x8xf32> to vector<18x8xbf16>
      %95 = vector.extract_strided_slice %94 {offsets = [0, 0], sizes = [16, 8], strides = [1, 1]} : vector<18x8xbf16> to vector<16x8xbf16>
      %c3 = arith.constant 3 : index
      %c0_59 = arith.constant 0 : index
      %c0_60 = arith.constant 0 : index
      %96 = vector.load %arg5[%c3, %c0_59, %c0_60] : memref<27x8x128xbf16, #tpu.memory_space<vmem>>, vector<1x8x128xbf16>
      %97 = vector.shape_cast %96 : vector<1x8x128xbf16> to vector<8x128xbf16>
      %cst_61 = arith.constant dense<0.000000e+00> : vector<16x128xf32>
      %98 = tpu.matmul %95, %97, %cst_61 {dimension_numbers = #tpu.dot_dimension_numbers<[1], [0], [0], [1], [0, 0, 1, 1], [], []>} : vector<16x8xbf16>, vector<8x128xbf16>, vector<16x128xf32> -> vector<16x128xf32>
      %99 = arith.addf %73, %98 : vector<16x128xf32>
      %100 = vector.extract_strided_slice %94 {offsets = [1, 0], sizes = [16, 8], strides = [1, 1]} : vector<18x8xbf16> to vector<16x8xbf16>
      %c4 = arith.constant 4 : index
      %c0_62 = arith.constant 0 : index
      %c0_63 = arith.constant 0 : index
      %101 = vector.load %arg5[%c4, %c0_62, %c0_63] : memref<27x8x128xbf16, #tpu.memory_space<vmem>>, vector<1x8x128xbf16>
      %102 = vector.shape_cast %101 : vector<1x8x128xbf16> to vector<8x128xbf16>
      %cst_64 = arith.constant dense<0.000000e+00> : vector<16x128xf32>
      %103 = tpu.matmul %100, %102, %cst_64 {dimension_numbers = #tpu.dot_dimension_numbers<[1], [0], [0], [1], [0, 0, 1, 1], [], []>} : vector<16x8xbf16>, vector<8x128xbf16>, vector<16x128xf32> -> vector<16x128xf32>
      %104 = arith.addf %99, %103 : vector<16x128xf32>
      %105 = vector.extract_strided_slice %94 {offsets = [2, 0], sizes = [16, 8], strides = [1, 1]} : vector<18x8xbf16> to vector<16x8xbf16>
      %c5 = arith.constant 5 : index
      %c0_65 = arith.constant 0 : index
      %c0_66 = arith.constant 0 : index
      %106 = vector.load %arg5[%c5, %c0_65, %c0_66] : memref<27x8x128xbf16, #tpu.memory_space<vmem>>, vector<1x8x128xbf16>
      %107 = vector.shape_cast %106 : vector<1x8x128xbf16> to vector<8x128xbf16>
      %cst_67 = arith.constant dense<0.000000e+00> : vector<16x128xf32>
      %108 = tpu.matmul %105, %107, %cst_67 {dimension_numbers = #tpu.dot_dimension_numbers<[1], [0], [0], [1], [0, 0, 1, 1], [], []>} : vector<16x8xbf16>, vector<8x128xbf16>, vector<16x128xf32> -> vector<16x128xf32>
      %109 = arith.addf %104, %108 : vector<16x128xf32>
      %c2_i32_68 = arith.constant 2 : i32
      %110 = arith.addi %arg9, %c2_i32_68 : i32
      %c0_69 = arith.constant 0 : index
      %c0_70 = arith.constant 0 : index
      %111 = arith.index_cast %110 : i32 to index
      %c0_71 = arith.constant 0 : index
      %c0_72 = arith.constant 0 : index
      %112 = vector.load %arg2[%c0_69, %c0_70, %111, %c0_71, %c0_72] : memref<1x1x18x18x8xbf16, #tpu.memory_space<vmem>>, vector<1x1x1x18x8xbf16>
      %113 = vector.shape_cast %112 : vector<1x1x1x18x8xbf16> to vector<18x8xbf16>
      %114 = arith.extf %113 : vector<18x8xbf16> to vector<18x8xf32>
      %115 = vector.broadcast %2 : vector<1x8xf32> to vector<18x8xf32>
      %116 = arith.subf %114, %115 : vector<18x8xf32>
      %117 = vector.broadcast %3 : vector<1x8xf32> to vector<18x8xf32>
      %118 = arith.mulf %116, %117 : vector<18x8xf32>
      %cst_73 = arith.constant 0.000000e+00 : f32
      %119 = vector.broadcast %cst_73 : f32 to vector<18x8xf32>
      %120 = arith.maximumf %118, %119 : vector<18x8xf32>
      %c1_i32_74 = arith.constant 1 : i32
      %121 = arith.cmpi sge, %110, %c1_i32_74 : i32
      %c16_i32_75 = arith.constant 16 : i32
      %122 = arith.cmpi sle, %110, %c16_i32_75 : i32
      %123 = arith.andi %121, %122 : i1
      %cst_76 = arith.constant 1.000000e+00 : f32
      %cst_77 = arith.constant 0.000000e+00 : f32
      %124 = arith.select %123, %cst_76, %cst_77 : f32
      %125 = arith.mulf %18, %124 : f32
      %126 = vector.broadcast %125 : f32 to vector<18x1xf32>
      %127 = arith.mulf %12, %126 : vector<18x1xf32>
      %128 = vector.broadcast %127 : vector<18x1xf32> to vector<18x8xf32>
      %129 = arith.mulf %120, %128 : vector<18x8xf32>
      %130 = arith.truncf %129 : vector<18x8xf32> to vector<18x8xbf16>
      %131 = vector.extract_strided_slice %130 {offsets = [0, 0], sizes = [16, 8], strides = [1, 1]} : vector<18x8xbf16> to vector<16x8xbf16>
      %c6 = arith.constant 6 : index
      %c0_78 = arith.constant 0 : index
      %c0_79 = arith.constant 0 : index
      %132 = vector.load %arg5[%c6, %c0_78, %c0_79] : memref<27x8x128xbf16, #tpu.memory_space<vmem>>, vector<1x8x128xbf16>
      %133 = vector.shape_cast %132 : vector<1x8x128xbf16> to vector<8x128xbf16>
      %cst_80 = arith.constant dense<0.000000e+00> : vector<16x128xf32>
      %134 = tpu.matmul %131, %133, %cst_80 {dimension_numbers = #tpu.dot_dimension_numbers<[1], [0], [0], [1], [0, 0, 1, 1], [], []>} : vector<16x8xbf16>, vector<8x128xbf16>, vector<16x128xf32> -> vector<16x128xf32>
      %135 = arith.addf %109, %134 : vector<16x128xf32>
      %136 = vector.extract_strided_slice %130 {offsets = [1, 0], sizes = [16, 8], strides = [1, 1]} : vector<18x8xbf16> to vector<16x8xbf16>
      %c7 = arith.constant 7 : index
      %c0_81 = arith.constant 0 : index
      %c0_82 = arith.constant 0 : index
      %137 = vector.load %arg5[%c7, %c0_81, %c0_82] : memref<27x8x128xbf16, #tpu.memory_space<vmem>>, vector<1x8x128xbf16>
      %138 = vector.shape_cast %137 : vector<1x8x128xbf16> to vector<8x128xbf16>
      %cst_83 = arith.constant dense<0.000000e+00> : vector<16x128xf32>
      %139 = tpu.matmul %136, %138, %cst_83 {dimension_numbers = #tpu.dot_dimension_numbers<[1], [0], [0], [1], [0, 0, 1, 1], [], []>} : vector<16x8xbf16>, vector<8x128xbf16>, vector<16x128xf32> -> vector<16x128xf32>
      %140 = arith.addf %135, %139 : vector<16x128xf32>
      %141 = vector.extract_strided_slice %130 {offsets = [2, 0], sizes = [16, 8], strides = [1, 1]} : vector<18x8xbf16> to vector<16x8xbf16>
      %c8 = arith.constant 8 : index
      %c0_84 = arith.constant 0 : index
      %c0_85 = arith.constant 0 : index
      %142 = vector.load %arg5[%c8, %c0_84, %c0_85] : memref<27x8x128xbf16, #tpu.memory_space<vmem>>, vector<1x8x128xbf16>
      %143 = vector.shape_cast %142 : vector<1x8x128xbf16> to vector<8x128xbf16>
      %cst_86 = arith.constant dense<0.000000e+00> : vector<16x128xf32>
      %144 = tpu.matmul %141, %143, %cst_86 {dimension_numbers = #tpu.dot_dimension_numbers<[1], [0], [0], [1], [0, 0, 1, 1], [], []>} : vector<16x8xbf16>, vector<8x128xbf16>, vector<16x128xf32> -> vector<16x128xf32>
      %145 = arith.addf %140, %144 : vector<16x128xf32>
      %c0_i32_87 = arith.constant 0 : i32
      %146 = arith.addi %arg9, %c0_i32_87 : i32
      %c0_88 = arith.constant 0 : index
      %c0_89 = arith.constant 0 : index
      %147 = arith.index_cast %146 : i32 to index
      %c0_90 = arith.constant 0 : index
      %c0_91 = arith.constant 0 : index
      %148 = vector.load %arg3[%c0_88, %c0_89, %147, %c0_90, %c0_91] : memref<1x1x18x18x8xbf16, #tpu.memory_space<vmem>>, vector<1x1x1x18x8xbf16>
      %149 = vector.shape_cast %148 : vector<1x1x1x18x8xbf16> to vector<18x8xbf16>
      %150 = arith.extf %149 : vector<18x8xbf16> to vector<18x8xf32>
      %151 = vector.broadcast %2 : vector<1x8xf32> to vector<18x8xf32>
      %152 = arith.subf %150, %151 : vector<18x8xf32>
      %153 = vector.broadcast %3 : vector<1x8xf32> to vector<18x8xf32>
      %154 = arith.mulf %152, %153 : vector<18x8xf32>
      %cst_92 = arith.constant 0.000000e+00 : f32
      %155 = vector.broadcast %cst_92 : f32 to vector<18x8xf32>
      %156 = arith.maximumf %154, %155 : vector<18x8xf32>
      %c1_i32_93 = arith.constant 1 : i32
      %157 = arith.cmpi sge, %146, %c1_i32_93 : i32
      %c16_i32_94 = arith.constant 16 : i32
      %158 = arith.cmpi sle, %146, %c16_i32_94 : i32
      %159 = arith.andi %157, %158 : i1
      %cst_95 = arith.constant 1.000000e+00 : f32
      %cst_96 = arith.constant 0.000000e+00 : f32
      %160 = arith.select %159, %cst_95, %cst_96 : f32
      %161 = arith.mulf %24, %160 : f32
      %162 = vector.broadcast %161 : f32 to vector<18x1xf32>
      %163 = arith.mulf %12, %162 : vector<18x1xf32>
      %164 = vector.broadcast %163 : vector<18x1xf32> to vector<18x8xf32>
      %165 = arith.mulf %156, %164 : vector<18x8xf32>
      %166 = arith.truncf %165 : vector<18x8xf32> to vector<18x8xbf16>
      %167 = vector.extract_strided_slice %166 {offsets = [0, 0], sizes = [16, 8], strides = [1, 1]} : vector<18x8xbf16> to vector<16x8xbf16>
      %c9 = arith.constant 9 : index
      %c0_97 = arith.constant 0 : index
      %c0_98 = arith.constant 0 : index
      %168 = vector.load %arg5[%c9, %c0_97, %c0_98] : memref<27x8x128xbf16, #tpu.memory_space<vmem>>, vector<1x8x128xbf16>
      %169 = vector.shape_cast %168 : vector<1x8x128xbf16> to vector<8x128xbf16>
      %cst_99 = arith.constant dense<0.000000e+00> : vector<16x128xf32>
      %170 = tpu.matmul %167, %169, %cst_99 {dimension_numbers = #tpu.dot_dimension_numbers<[1], [0], [0], [1], [0, 0, 1, 1], [], []>} : vector<16x8xbf16>, vector<8x128xbf16>, vector<16x128xf32> -> vector<16x128xf32>
      %171 = arith.addf %145, %170 : vector<16x128xf32>
      %172 = vector.extract_strided_slice %166 {offsets = [1, 0], sizes = [16, 8], strides = [1, 1]} : vector<18x8xbf16> to vector<16x8xbf16>
      %c10 = arith.constant 10 : index
      %c0_100 = arith.constant 0 : index
      %c0_101 = arith.constant 0 : index
      %173 = vector.load %arg5[%c10, %c0_100, %c0_101] : memref<27x8x128xbf16, #tpu.memory_space<vmem>>, vector<1x8x128xbf16>
      %174 = vector.shape_cast %173 : vector<1x8x128xbf16> to vector<8x128xbf16>
      %cst_102 = arith.constant dense<0.000000e+00> : vector<16x128xf32>
      %175 = tpu.matmul %172, %174, %cst_102 {dimension_numbers = #tpu.dot_dimension_numbers<[1], [0], [0], [1], [0, 0, 1, 1], [], []>} : vector<16x8xbf16>, vector<8x128xbf16>, vector<16x128xf32> -> vector<16x128xf32>
      %176 = arith.addf %171, %175 : vector<16x128xf32>
      %177 = vector.extract_strided_slice %166 {offsets = [2, 0], sizes = [16, 8], strides = [1, 1]} : vector<18x8xbf16> to vector<16x8xbf16>
      %c11 = arith.constant 11 : index
      %c0_103 = arith.constant 0 : index
      %c0_104 = arith.constant 0 : index
      %178 = vector.load %arg5[%c11, %c0_103, %c0_104] : memref<27x8x128xbf16, #tpu.memory_space<vmem>>, vector<1x8x128xbf16>
      %179 = vector.shape_cast %178 : vector<1x8x128xbf16> to vector<8x128xbf16>
      %cst_105 = arith.constant dense<0.000000e+00> : vector<16x128xf32>
      %180 = tpu.matmul %177, %179, %cst_105 {dimension_numbers = #tpu.dot_dimension_numbers<[1], [0], [0], [1], [0, 0, 1, 1], [], []>} : vector<16x8xbf16>, vector<8x128xbf16>, vector<16x128xf32> -> vector<16x128xf32>
      %181 = arith.addf %176, %180 : vector<16x128xf32>
      %c1_i32_106 = arith.constant 1 : i32
      %182 = arith.addi %arg9, %c1_i32_106 : i32
      %c0_107 = arith.constant 0 : index
      %c0_108 = arith.constant 0 : index
      %183 = arith.index_cast %182 : i32 to index
      %c0_109 = arith.constant 0 : index
      %c0_110 = arith.constant 0 : index
      %184 = vector.load %arg3[%c0_107, %c0_108, %183, %c0_109, %c0_110] : memref<1x1x18x18x8xbf16, #tpu.memory_space<vmem>>, vector<1x1x1x18x8xbf16>
      %185 = vector.shape_cast %184 : vector<1x1x1x18x8xbf16> to vector<18x8xbf16>
      %186 = arith.extf %185 : vector<18x8xbf16> to vector<18x8xf32>
      %187 = vector.broadcast %2 : vector<1x8xf32> to vector<18x8xf32>
      %188 = arith.subf %186, %187 : vector<18x8xf32>
      %189 = vector.broadcast %3 : vector<1x8xf32> to vector<18x8xf32>
      %190 = arith.mulf %188, %189 : vector<18x8xf32>
      %cst_111 = arith.constant 0.000000e+00 : f32
      %191 = vector.broadcast %cst_111 : f32 to vector<18x8xf32>
      %192 = arith.maximumf %190, %191 : vector<18x8xf32>
      %c1_i32_112 = arith.constant 1 : i32
      %193 = arith.cmpi sge, %182, %c1_i32_112 : i32
      %c16_i32_113 = arith.constant 16 : i32
      %194 = arith.cmpi sle, %182, %c16_i32_113 : i32
      %195 = arith.andi %193, %194 : i1
      %cst_114 = arith.constant 1.000000e+00 : f32
      %cst_115 = arith.constant 0.000000e+00 : f32
      %196 = arith.select %195, %cst_114, %cst_115 : f32
      %197 = arith.mulf %24, %196 : f32
      %198 = vector.broadcast %197 : f32 to vector<18x1xf32>
      %199 = arith.mulf %12, %198 : vector<18x1xf32>
      %200 = vector.broadcast %199 : vector<18x1xf32> to vector<18x8xf32>
      %201 = arith.mulf %192, %200 : vector<18x8xf32>
      %202 = arith.truncf %201 : vector<18x8xf32> to vector<18x8xbf16>
      %203 = vector.extract_strided_slice %202 {offsets = [0, 0], sizes = [16, 8], strides = [1, 1]} : vector<18x8xbf16> to vector<16x8xbf16>
      %c12 = arith.constant 12 : index
      %c0_116 = arith.constant 0 : index
      %c0_117 = arith.constant 0 : index
      %204 = vector.load %arg5[%c12, %c0_116, %c0_117] : memref<27x8x128xbf16, #tpu.memory_space<vmem>>, vector<1x8x128xbf16>
      %205 = vector.shape_cast %204 : vector<1x8x128xbf16> to vector<8x128xbf16>
      %cst_118 = arith.constant dense<0.000000e+00> : vector<16x128xf32>
      %206 = tpu.matmul %203, %205, %cst_118 {dimension_numbers = #tpu.dot_dimension_numbers<[1], [0], [0], [1], [0, 0, 1, 1], [], []>} : vector<16x8xbf16>, vector<8x128xbf16>, vector<16x128xf32> -> vector<16x128xf32>
      %207 = arith.addf %181, %206 : vector<16x128xf32>
      %208 = vector.extract_strided_slice %202 {offsets = [1, 0], sizes = [16, 8], strides = [1, 1]} : vector<18x8xbf16> to vector<16x8xbf16>
      %c13 = arith.constant 13 : index
      %c0_119 = arith.constant 0 : index
      %c0_120 = arith.constant 0 : index
      %209 = vector.load %arg5[%c13, %c0_119, %c0_120] : memref<27x8x128xbf16, #tpu.memory_space<vmem>>, vector<1x8x128xbf16>
      %210 = vector.shape_cast %209 : vector<1x8x128xbf16> to vector<8x128xbf16>
      %cst_121 = arith.constant dense<0.000000e+00> : vector<16x128xf32>
      %211 = tpu.matmul %208, %210, %cst_121 {dimension_numbers = #tpu.dot_dimension_numbers<[1], [0], [0], [1], [0, 0, 1, 1], [], []>} : vector<16x8xbf16>, vector<8x128xbf16>, vector<16x128xf32> -> vector<16x128xf32>
      %212 = arith.addf %207, %211 : vector<16x128xf32>
      %213 = vector.extract_strided_slice %202 {offsets = [2, 0], sizes = [16, 8], strides = [1, 1]} : vector<18x8xbf16> to vector<16x8xbf16>
      %c14 = arith.constant 14 : index
      %c0_122 = arith.constant 0 : index
      %c0_123 = arith.constant 0 : index
      %214 = vector.load %arg5[%c14, %c0_122, %c0_123] : memref<27x8x128xbf16, #tpu.memory_space<vmem>>, vector<1x8x128xbf16>
      %215 = vector.shape_cast %214 : vector<1x8x128xbf16> to vector<8x128xbf16>
      %cst_124 = arith.constant dense<0.000000e+00> : vector<16x128xf32>
      %216 = tpu.matmul %213, %215, %cst_124 {dimension_numbers = #tpu.dot_dimension_numbers<[1], [0], [0], [1], [0, 0, 1, 1], [], []>} : vector<16x8xbf16>, vector<8x128xbf16>, vector<16x128xf32> -> vector<16x128xf32>
      %217 = arith.addf %212, %216 : vector<16x128xf32>
      %c2_i32_125 = arith.constant 2 : i32
      %218 = arith.addi %arg9, %c2_i32_125 : i32
      %c0_126 = arith.constant 0 : index
      %c0_127 = arith.constant 0 : index
      %219 = arith.index_cast %218 : i32 to index
      %c0_128 = arith.constant 0 : index
      %c0_129 = arith.constant 0 : index
      %220 = vector.load %arg3[%c0_126, %c0_127, %219, %c0_128, %c0_129] : memref<1x1x18x18x8xbf16, #tpu.memory_space<vmem>>, vector<1x1x1x18x8xbf16>
      %221 = vector.shape_cast %220 : vector<1x1x1x18x8xbf16> to vector<18x8xbf16>
      %222 = arith.extf %221 : vector<18x8xbf16> to vector<18x8xf32>
      %223 = vector.broadcast %2 : vector<1x8xf32> to vector<18x8xf32>
      %224 = arith.subf %222, %223 : vector<18x8xf32>
      %225 = vector.broadcast %3 : vector<1x8xf32> to vector<18x8xf32>
      %226 = arith.mulf %224, %225 : vector<18x8xf32>
      %cst_130 = arith.constant 0.000000e+00 : f32
      %227 = vector.broadcast %cst_130 : f32 to vector<18x8xf32>
      %228 = arith.maximumf %226, %227 : vector<18x8xf32>
      %c1_i32_131 = arith.constant 1 : i32
      %229 = arith.cmpi sge, %218, %c1_i32_131 : i32
      %c16_i32_132 = arith.constant 16 : i32
      %230 = arith.cmpi sle, %218, %c16_i32_132 : i32
      %231 = arith.andi %229, %230 : i1
      %cst_133 = arith.constant 1.000000e+00 : f32
      %cst_134 = arith.constant 0.000000e+00 : f32
      %232 = arith.select %231, %cst_133, %cst_134 : f32
      %233 = arith.mulf %24, %232 : f32
      %234 = vector.broadcast %233 : f32 to vector<18x1xf32>
      %235 = arith.mulf %12, %234 : vector<18x1xf32>
      %236 = vector.broadcast %235 : vector<18x1xf32> to vector<18x8xf32>
      %237 = arith.mulf %228, %236 : vector<18x8xf32>
      %238 = arith.truncf %237 : vector<18x8xf32> to vector<18x8xbf16>
      %239 = vector.extract_strided_slice %238 {offsets = [0, 0], sizes = [16, 8], strides = [1, 1]} : vector<18x8xbf16> to vector<16x8xbf16>
      %c15 = arith.constant 15 : index
      %c0_135 = arith.constant 0 : index
      %c0_136 = arith.constant 0 : index
      %240 = vector.load %arg5[%c15, %c0_135, %c0_136] : memref<27x8x128xbf16, #tpu.memory_space<vmem>>, vector<1x8x128xbf16>
      %241 = vector.shape_cast %240 : vector<1x8x128xbf16> to vector<8x128xbf16>
      %cst_137 = arith.constant dense<0.000000e+00> : vector<16x128xf32>
      %242 = tpu.matmul %239, %241, %cst_137 {dimension_numbers = #tpu.dot_dimension_numbers<[1], [0], [0], [1], [0, 0, 1, 1], [], []>} : vector<16x8xbf16>, vector<8x128xbf16>, vector<16x128xf32> -> vector<16x128xf32>
      %243 = arith.addf %217, %242 : vector<16x128xf32>
      %244 = vector.extract_strided_slice %238 {offsets = [1, 0], sizes = [16, 8], strides = [1, 1]} : vector<18x8xbf16> to vector<16x8xbf16>
      %c16 = arith.constant 16 : index
      %c0_138 = arith.constant 0 : index
      %c0_139 = arith.constant 0 : index
      %245 = vector.load %arg5[%c16, %c0_138, %c0_139] : memref<27x8x128xbf16, #tpu.memory_space<vmem>>, vector<1x8x128xbf16>
      %246 = vector.shape_cast %245 : vector<1x8x128xbf16> to vector<8x128xbf16>
      %cst_140 = arith.constant dense<0.000000e+00> : vector<16x128xf32>
      %247 = tpu.matmul %244, %246, %cst_140 {dimension_numbers = #tpu.dot_dimension_numbers<[1], [0], [0], [1], [0, 0, 1, 1], [], []>} : vector<16x8xbf16>, vector<8x128xbf16>, vector<16x128xf32> -> vector<16x128xf32>
      %248 = arith.addf %243, %247 : vector<16x128xf32>
      %249 = vector.extract_strided_slice %238 {offsets = [2, 0], sizes = [16, 8], strides = [1, 1]} : vector<18x8xbf16> to vector<16x8xbf16>
      %c17 = arith.constant 17 : index
      %c0_141 = arith.constant 0 : index
      %c0_142 = arith.constant 0 : index
      %250 = vector.load %arg5[%c17, %c0_141, %c0_142] : memref<27x8x128xbf16, #tpu.memory_space<vmem>>, vector<1x8x128xbf16>
      %251 = vector.shape_cast %250 : vector<1x8x128xbf16> to vector<8x128xbf16>
      %cst_143 = arith.constant dense<0.000000e+00> : vector<16x128xf32>
      %252 = tpu.matmul %249, %251, %cst_143 {dimension_numbers = #tpu.dot_dimension_numbers<[1], [0], [0], [1], [0, 0, 1, 1], [], []>} : vector<16x8xbf16>, vector<8x128xbf16>, vector<16x128xf32> -> vector<16x128xf32>
      %253 = arith.addf %248, %252 : vector<16x128xf32>
      %c0_i32_144 = arith.constant 0 : i32
      %254 = arith.addi %arg9, %c0_i32_144 : i32
      %c0_145 = arith.constant 0 : index
      %c0_146 = arith.constant 0 : index
      %255 = arith.index_cast %254 : i32 to index
      %c0_147 = arith.constant 0 : index
      %c0_148 = arith.constant 0 : index
      %256 = vector.load %arg4[%c0_145, %c0_146, %255, %c0_147, %c0_148] : memref<1x1x18x18x8xbf16, #tpu.memory_space<vmem>>, vector<1x1x1x18x8xbf16>
      %257 = vector.shape_cast %256 : vector<1x1x1x18x8xbf16> to vector<18x8xbf16>
      %258 = arith.extf %257 : vector<18x8xbf16> to vector<18x8xf32>
      %259 = vector.broadcast %2 : vector<1x8xf32> to vector<18x8xf32>
      %260 = arith.subf %258, %259 : vector<18x8xf32>
      %261 = vector.broadcast %3 : vector<1x8xf32> to vector<18x8xf32>
      %262 = arith.mulf %260, %261 : vector<18x8xf32>
      %cst_149 = arith.constant 0.000000e+00 : f32
      %263 = vector.broadcast %cst_149 : f32 to vector<18x8xf32>
      %264 = arith.maximumf %262, %263 : vector<18x8xf32>
      %c1_i32_150 = arith.constant 1 : i32
      %265 = arith.cmpi sge, %254, %c1_i32_150 : i32
      %c16_i32_151 = arith.constant 16 : i32
      %266 = arith.cmpi sle, %254, %c16_i32_151 : i32
      %267 = arith.andi %265, %266 : i1
      %cst_152 = arith.constant 1.000000e+00 : f32
      %cst_153 = arith.constant 0.000000e+00 : f32
      %268 = arith.select %267, %cst_152, %cst_153 : f32
      %269 = arith.mulf %30, %268 : f32
      %270 = vector.broadcast %269 : f32 to vector<18x1xf32>
      %271 = arith.mulf %12, %270 : vector<18x1xf32>
      %272 = vector.broadcast %271 : vector<18x1xf32> to vector<18x8xf32>
      %273 = arith.mulf %264, %272 : vector<18x8xf32>
      %274 = arith.truncf %273 : vector<18x8xf32> to vector<18x8xbf16>
      %275 = vector.extract_strided_slice %274 {offsets = [0, 0], sizes = [16, 8], strides = [1, 1]} : vector<18x8xbf16> to vector<16x8xbf16>
      %c18 = arith.constant 18 : index
      %c0_154 = arith.constant 0 : index
      %c0_155 = arith.constant 0 : index
      %276 = vector.load %arg5[%c18, %c0_154, %c0_155] : memref<27x8x128xbf16, #tpu.memory_space<vmem>>, vector<1x8x128xbf16>
      %277 = vector.shape_cast %276 : vector<1x8x128xbf16> to vector<8x128xbf16>
      %cst_156 = arith.constant dense<0.000000e+00> : vector<16x128xf32>
      %278 = tpu.matmul %275, %277, %cst_156 {dimension_numbers = #tpu.dot_dimension_numbers<[1], [0], [0], [1], [0, 0, 1, 1], [], []>} : vector<16x8xbf16>, vector<8x128xbf16>, vector<16x128xf32> -> vector<16x128xf32>
      %279 = arith.addf %253, %278 : vector<16x128xf32>
      %280 = vector.extract_strided_slice %274 {offsets = [1, 0], sizes = [16, 8], strides = [1, 1]} : vector<18x8xbf16> to vector<16x8xbf16>
      %c19 = arith.constant 19 : index
      %c0_157 = arith.constant 0 : index
      %c0_158 = arith.constant 0 : index
      %281 = vector.load %arg5[%c19, %c0_157, %c0_158] : memref<27x8x128xbf16, #tpu.memory_space<vmem>>, vector<1x8x128xbf16>
      %282 = vector.shape_cast %281 : vector<1x8x128xbf16> to vector<8x128xbf16>
      %cst_159 = arith.constant dense<0.000000e+00> : vector<16x128xf32>
      %283 = tpu.matmul %280, %282, %cst_159 {dimension_numbers = #tpu.dot_dimension_numbers<[1], [0], [0], [1], [0, 0, 1, 1], [], []>} : vector<16x8xbf16>, vector<8x128xbf16>, vector<16x128xf32> -> vector<16x128xf32>
      %284 = arith.addf %279, %283 : vector<16x128xf32>
      %285 = vector.extract_strided_slice %274 {offsets = [2, 0], sizes = [16, 8], strides = [1, 1]} : vector<18x8xbf16> to vector<16x8xbf16>
      %c20 = arith.constant 20 : index
      %c0_160 = arith.constant 0 : index
      %c0_161 = arith.constant 0 : index
      %286 = vector.load %arg5[%c20, %c0_160, %c0_161] : memref<27x8x128xbf16, #tpu.memory_space<vmem>>, vector<1x8x128xbf16>
      %287 = vector.shape_cast %286 : vector<1x8x128xbf16> to vector<8x128xbf16>
      %cst_162 = arith.constant dense<0.000000e+00> : vector<16x128xf32>
      %288 = tpu.matmul %285, %287, %cst_162 {dimension_numbers = #tpu.dot_dimension_numbers<[1], [0], [0], [1], [0, 0, 1, 1], [], []>} : vector<16x8xbf16>, vector<8x128xbf16>, vector<16x128xf32> -> vector<16x128xf32>
      %289 = arith.addf %284, %288 : vector<16x128xf32>
      %c1_i32_163 = arith.constant 1 : i32
      %290 = arith.addi %arg9, %c1_i32_163 : i32
      %c0_164 = arith.constant 0 : index
      %c0_165 = arith.constant 0 : index
      %291 = arith.index_cast %290 : i32 to index
      %c0_166 = arith.constant 0 : index
      %c0_167 = arith.constant 0 : index
      %292 = vector.load %arg4[%c0_164, %c0_165, %291, %c0_166, %c0_167] : memref<1x1x18x18x8xbf16, #tpu.memory_space<vmem>>, vector<1x1x1x18x8xbf16>
      %293 = vector.shape_cast %292 : vector<1x1x1x18x8xbf16> to vector<18x8xbf16>
      %294 = arith.extf %293 : vector<18x8xbf16> to vector<18x8xf32>
      %295 = vector.broadcast %2 : vector<1x8xf32> to vector<18x8xf32>
      %296 = arith.subf %294, %295 : vector<18x8xf32>
      %297 = vector.broadcast %3 : vector<1x8xf32> to vector<18x8xf32>
      %298 = arith.mulf %296, %297 : vector<18x8xf32>
      %cst_168 = arith.constant 0.000000e+00 : f32
      %299 = vector.broadcast %cst_168 : f32 to vector<18x8xf32>
      %300 = arith.maximumf %298, %299 : vector<18x8xf32>
      %c1_i32_169 = arith.constant 1 : i32
      %301 = arith.cmpi sge, %290, %c1_i32_169 : i32
      %c16_i32_170 = arith.constant 16 : i32
      %302 = arith.cmpi sle, %290, %c16_i32_170 : i32
      %303 = arith.andi %301, %302 : i1
      %cst_171 = arith.constant 1.000000e+00 : f32
      %cst_172 = arith.constant 0.000000e+00 : f32
      %304 = arith.select %303, %cst_171, %cst_172 : f32
      %305 = arith.mulf %30, %304 : f32
      %306 = vector.broadcast %305 : f32 to vector<18x1xf32>
      %307 = arith.mulf %12, %306 : vector<18x1xf32>
      %308 = vector.broadcast %307 : vector<18x1xf32> to vector<18x8xf32>
      %309 = arith.mulf %300, %308 : vector<18x8xf32>
      %310 = arith.truncf %309 : vector<18x8xf32> to vector<18x8xbf16>
      %311 = vector.extract_strided_slice %310 {offsets = [0, 0], sizes = [16, 8], strides = [1, 1]} : vector<18x8xbf16> to vector<16x8xbf16>
      %c21 = arith.constant 21 : index
      %c0_173 = arith.constant 0 : index
      %c0_174 = arith.constant 0 : index
      %312 = vector.load %arg5[%c21, %c0_173, %c0_174] : memref<27x8x128xbf16, #tpu.memory_space<vmem>>, vector<1x8x128xbf16>
      %313 = vector.shape_cast %312 : vector<1x8x128xbf16> to vector<8x128xbf16>
      %cst_175 = arith.constant dense<0.000000e+00> : vector<16x128xf32>
      %314 = tpu.matmul %311, %313, %cst_175 {dimension_numbers = #tpu.dot_dimension_numbers<[1], [0], [0], [1], [0, 0, 1, 1], [], []>} : vector<16x8xbf16>, vector<8x128xbf16>, vector<16x128xf32> -> vector<16x128xf32>
      %315 = arith.addf %289, %314 : vector<16x128xf32>
      %316 = vector.extract_strided_slice %310 {offsets = [1, 0], sizes = [16, 8], strides = [1, 1]} : vector<18x8xbf16> to vector<16x8xbf16>
      %c22 = arith.constant 22 : index
      %c0_176 = arith.constant 0 : index
      %c0_177 = arith.constant 0 : index
      %317 = vector.load %arg5[%c22, %c0_176, %c0_177] : memref<27x8x128xbf16, #tpu.memory_space<vmem>>, vector<1x8x128xbf16>
      %318 = vector.shape_cast %317 : vector<1x8x128xbf16> to vector<8x128xbf16>
      %cst_178 = arith.constant dense<0.000000e+00> : vector<16x128xf32>
      %319 = tpu.matmul %316, %318, %cst_178 {dimension_numbers = #tpu.dot_dimension_numbers<[1], [0], [0], [1], [0, 0, 1, 1], [], []>} : vector<16x8xbf16>, vector<8x128xbf16>, vector<16x128xf32> -> vector<16x128xf32>
      %320 = arith.addf %315, %319 : vector<16x128xf32>
      %321 = vector.extract_strided_slice %310 {offsets = [2, 0], sizes = [16, 8], strides = [1, 1]} : vector<18x8xbf16> to vector<16x8xbf16>
      %c23 = arith.constant 23 : index
      %c0_179 = arith.constant 0 : index
      %c0_180 = arith.constant 0 : index
      %322 = vector.load %arg5[%c23, %c0_179, %c0_180] : memref<27x8x128xbf16, #tpu.memory_space<vmem>>, vector<1x8x128xbf16>
      %323 = vector.shape_cast %322 : vector<1x8x128xbf16> to vector<8x128xbf16>
      %cst_181 = arith.constant dense<0.000000e+00> : vector<16x128xf32>
      %324 = tpu.matmul %321, %323, %cst_181 {dimension_numbers = #tpu.dot_dimension_numbers<[1], [0], [0], [1], [0, 0, 1, 1], [], []>} : vector<16x8xbf16>, vector<8x128xbf16>, vector<16x128xf32> -> vector<16x128xf32>
      %325 = arith.addf %320, %324 : vector<16x128xf32>
      %c2_i32_182 = arith.constant 2 : i32
      %326 = arith.addi %arg9, %c2_i32_182 : i32
      %c0_183 = arith.constant 0 : index
      %c0_184 = arith.constant 0 : index
      %327 = arith.index_cast %326 : i32 to index
      %c0_185 = arith.constant 0 : index
      %c0_186 = arith.constant 0 : index
      %328 = vector.load %arg4[%c0_183, %c0_184, %327, %c0_185, %c0_186] : memref<1x1x18x18x8xbf16, #tpu.memory_space<vmem>>, vector<1x1x1x18x8xbf16>
      %329 = vector.shape_cast %328 : vector<1x1x1x18x8xbf16> to vector<18x8xbf16>
      %330 = arith.extf %329 : vector<18x8xbf16> to vector<18x8xf32>
      %331 = vector.broadcast %2 : vector<1x8xf32> to vector<18x8xf32>
      %332 = arith.subf %330, %331 : vector<18x8xf32>
      %333 = vector.broadcast %3 : vector<1x8xf32> to vector<18x8xf32>
      %334 = arith.mulf %332, %333 : vector<18x8xf32>
      %cst_187 = arith.constant 0.000000e+00 : f32
      %335 = vector.broadcast %cst_187 : f32 to vector<18x8xf32>
      %336 = arith.maximumf %334, %335 : vector<18x8xf32>
      %c1_i32_188 = arith.constant 1 : i32
      %337 = arith.cmpi sge, %326, %c1_i32_188 : i32
      %c16_i32_189 = arith.constant 16 : i32
      %338 = arith.cmpi sle, %326, %c16_i32_189 : i32
      %339 = arith.andi %337, %338 : i1
      %cst_190 = arith.constant 1.000000e+00 : f32
      %cst_191 = arith.constant 0.000000e+00 : f32
      %340 = arith.select %339, %cst_190, %cst_191 : f32
      %341 = arith.mulf %30, %340 : f32
      %342 = vector.broadcast %341 : f32 to vector<18x1xf32>
      %343 = arith.mulf %12, %342 : vector<18x1xf32>
      %344 = vector.broadcast %343 : vector<18x1xf32> to vector<18x8xf32>
      %345 = arith.mulf %336, %344 : vector<18x8xf32>
      %346 = arith.truncf %345 : vector<18x8xf32> to vector<18x8xbf16>
      %347 = vector.extract_strided_slice %346 {offsets = [0, 0], sizes = [16, 8], strides = [1, 1]} : vector<18x8xbf16> to vector<16x8xbf16>
      %c24 = arith.constant 24 : index
      %c0_192 = arith.constant 0 : index
      %c0_193 = arith.constant 0 : index
      %348 = vector.load %arg5[%c24, %c0_192, %c0_193] : memref<27x8x128xbf16, #tpu.memory_space<vmem>>, vector<1x8x128xbf16>
      %349 = vector.shape_cast %348 : vector<1x8x128xbf16> to vector<8x128xbf16>
      %cst_194 = arith.constant dense<0.000000e+00> : vector<16x128xf32>
      %350 = tpu.matmul %347, %349, %cst_194 {dimension_numbers = #tpu.dot_dimension_numbers<[1], [0], [0], [1], [0, 0, 1, 1], [], []>} : vector<16x8xbf16>, vector<8x128xbf16>, vector<16x128xf32> -> vector<16x128xf32>
      %351 = arith.addf %325, %350 : vector<16x128xf32>
      %352 = vector.extract_strided_slice %346 {offsets = [1, 0], sizes = [16, 8], strides = [1, 1]} : vector<18x8xbf16> to vector<16x8xbf16>
      %c25 = arith.constant 25 : index
      %c0_195 = arith.constant 0 : index
      %c0_196 = arith.constant 0 : index
      %353 = vector.load %arg5[%c25, %c0_195, %c0_196] : memref<27x8x128xbf16, #tpu.memory_space<vmem>>, vector<1x8x128xbf16>
      %354 = vector.shape_cast %353 : vector<1x8x128xbf16> to vector<8x128xbf16>
      %cst_197 = arith.constant dense<0.000000e+00> : vector<16x128xf32>
      %355 = tpu.matmul %352, %354, %cst_197 {dimension_numbers = #tpu.dot_dimension_numbers<[1], [0], [0], [1], [0, 0, 1, 1], [], []>} : vector<16x8xbf16>, vector<8x128xbf16>, vector<16x128xf32> -> vector<16x128xf32>
      %356 = arith.addf %351, %355 : vector<16x128xf32>
      %357 = vector.extract_strided_slice %346 {offsets = [2, 0], sizes = [16, 8], strides = [1, 1]} : vector<18x8xbf16> to vector<16x8xbf16>
      %c26 = arith.constant 26 : index
      %c0_198 = arith.constant 0 : index
      %c0_199 = arith.constant 0 : index
      %358 = vector.load %arg5[%c26, %c0_198, %c0_199] : memref<27x8x128xbf16, #tpu.memory_space<vmem>>, vector<1x8x128xbf16>
      %359 = vector.shape_cast %358 : vector<1x8x128xbf16> to vector<8x128xbf16>
      %cst_200 = arith.constant dense<0.000000e+00> : vector<16x128xf32>
      %360 = tpu.matmul %357, %359, %cst_200 {dimension_numbers = #tpu.dot_dimension_numbers<[1], [0], [0], [1], [0, 0, 1, 1], [], []>} : vector<16x8xbf16>, vector<8x128xbf16>, vector<16x128xf32> -> vector<16x128xf32>
      %361 = arith.addf %356, %360 : vector<16x128xf32>
      %362 = vector.extract_strided_slice %361 {offsets = [0, 0], sizes = [16, 8], strides = [1, 1]} : vector<16x128xf32> to vector<16x8xf32>
      %363 = arith.truncf %362 : vector<16x8xf32> to vector<16x8xbf16>
      %c0_201 = arith.constant 0 : index
      %c0_202 = arith.constant 0 : index
      %364 = arith.index_cast %arg9 : i32 to index
      %c0_203 = arith.constant 0 : index
      %c0_204 = arith.constant 0 : index
      %365 = vector.load %arg7[%c0_201, %c0_202, %364, %c0_203, %c0_204] : memref<1x1x16x16x8xbf16, #tpu.memory_space<vmem>>, vector<1x1x1x16x8xbf16>
      %366 = vector.shape_cast %365 : vector<1x1x1x16x8xbf16> to vector<16x8xbf16>
      %367 = vector.shape_cast %363 : vector<16x8xbf16> to vector<1x1x1x16x8xbf16>
      tpu.vector_store %arg7[%c0_201, %c0_202, %364, %c0_203, %c0_204], %367 {strides = array<i32>} : memref<1x1x16x16x8xbf16, #tpu.memory_space<vmem>>, vector<1x1x1x16x8xbf16>,
      %cst_205 = arith.constant dense<0.000000e+00> : vector<128xf32>
      %368 = vector.multi_reduction <add>, %361, %cst_205 [0] : vector<16x128xf32> to vector<128xf32>
      %369 = vector.shape_cast %368 : vector<128xf32> to vector<1x128xf32>
      %370 = arith.mulf %361, %361 : vector<16x128xf32>
      %cst_206 = arith.constant dense<0.000000e+00> : vector<128xf32>
      %371 = vector.multi_reduction <add>, %370, %cst_206 [0] : vector<16x128xf32> to vector<128xf32>
      %372 = vector.shape_cast %371 : vector<128xf32> to vector<1x128xf32>
      %373 = tpu.concatenate %369, %372 in 0 : vector<1x128xf32>, vector<1x128xf32> -> vector<2x128xf32>
      %374 = arith.addf %arg10, %373 : vector<2x128xf32>
      scf.yield %374 : vector<2x128xf32>
    }
    %c16_i32_23 = arith.constant 16 : i32
    %c0_24 = arith.constant 0 : index
    %c0_25 = arith.constant 0 : index
    %c0_26 = arith.constant 0 : index
    %c0_27 = arith.constant 0 : index
    %34 = vector.load %arg8[%c0_24, %c0_25, %c0_26, %c0_27] : memref<1x1x2x128xf32, #tpu.memory_space<vmem>>, vector<1x1x2x128xf32>
    %35 = vector.shape_cast %34 : vector<1x1x2x128xf32> to vector<2x128xf32>
    %36 = vector.shape_cast %33 : vector<2x128xf32> to vector<1x1x2x128xf32>
    tpu.vector_store %arg8[%c0_24, %c0_25, %c0_26, %c0_27], %36 {strides = array<i32>} : memref<1x1x2x128xf32, #tpu.memory_space<vmem>>, vector<1x1x2x128xf32>,
    return
  }
  func.func @transform_0(%arg0: i32, %arg1: i32) -> (i32, i32, i32, i32, i32) {
    %c0_i32 = arith.constant 0 : i32
    %0 = arith.addi %arg1, %c0_i32 : i32
    %c0_i32_0 = arith.constant 0 : i32
    %c0_i32_1 = arith.constant 0 : i32
    %c0_i32_2 = arith.constant 0 : i32
    %c0_i32_3 = arith.constant 0 : i32
    return %arg0, %0, %c0_i32_0, %c0_i32_1, %c0_i32_2 : i32, i32, i32, i32, i32
  }
  func.func @transform_1(%arg0: i32, %arg1: i32) -> (i32, i32, i32, i32, i32) {
    %c1_i32 = arith.constant 1 : i32
    %0 = arith.addi %arg1, %c1_i32 : i32
    %c0_i32 = arith.constant 0 : i32
    %c0_i32_0 = arith.constant 0 : i32
    %c0_i32_1 = arith.constant 0 : i32
    %c0_i32_2 = arith.constant 0 : i32
    return %arg0, %0, %c0_i32, %c0_i32_0, %c0_i32_1 : i32, i32, i32, i32, i32
  }
  func.func @transform_2(%arg0: i32, %arg1: i32) -> (i32, i32, i32, i32, i32) {
    %c2_i32 = arith.constant 2 : i32
    %0 = arith.addi %arg1, %c2_i32 : i32
    %c0_i32 = arith.constant 0 : i32
    %c0_i32_0 = arith.constant 0 : i32
    %c0_i32_1 = arith.constant 0 : i32
    %c0_i32_2 = arith.constant 0 : i32
    return %arg0, %0, %c0_i32, %c0_i32_0, %c0_i32_1 : i32, i32, i32, i32, i32
  }
  func.func @transform_3(%arg0: i32, %arg1: i32) -> (i32, i32, i32) {
    %c0_i32 = arith.constant 0 : i32
    %c0_i32_0 = arith.constant 0 : i32
    %c0_i32_1 = arith.constant 0 : i32
    %c0_i32_2 = arith.constant 0 : i32
    return %c0_i32, %c0_i32_0, %c0_i32_1 : i32, i32, i32
  }
  func.func @transform_4(%arg0: i32, %arg1: i32) -> (i32, i32, i32) {
    %c0_i32 = arith.constant 0 : i32
    %c0_i32_0 = arith.constant 0 : i32
    %c0_i32_1 = arith.constant 0 : i32
    return %arg0, %c0_i32, %c0_i32_0 : i32, i32, i32
  }
  func.func @transform_5(%arg0: i32, %arg1: i32) -> (i32, i32, i32, i32, i32) {
    %c0_i32 = arith.constant 0 : i32
    %c0_i32_0 = arith.constant 0 : i32
    %c0_i32_1 = arith.constant 0 : i32
    %c0_i32_2 = arith.constant 0 : i32
    return %arg0, %arg1, %c0_i32, %c0_i32_0, %c0_i32_1 : i32, i32, i32, i32, i32
  }
  func.func @transform_6(%arg0: i32, %arg1: i32) -> (i32, i32, i32, i32) {
    %c0_i32 = arith.constant 0 : i32
    %c0_i32_0 = arith.constant 0 : i32
    %c0_i32_1 = arith.constant 0 : i32
    return %arg0, %arg1, %c0_i32, %c0_i32_0 : i32, i32, i32, i32
  }
}

module attributes {stable_mosaic.version = 11 : i64} {
  func.func @_norm_relu_kernel(%arg0: i32, %arg1: i32, %arg2: memref<1x1x16x16x8xbf16, #tpu.memory_space<vmem>>, %arg3: memref<1x2x128xf32, #tpu.memory_space<vmem>>, %arg4: memref<1x1x16x16x8xf32, #tpu.memory_space<vmem>>) attributes {dimension_semantics = [#tpu.dimension_semantics<parallel>, #tpu.dimension_semantics<parallel>], iteration_bounds = array<i64: 2, 16>, scalar_prefetch = 0 : i64, scratch_operands = 0 : i64, tpu.core_type = #tpu.core_type<tc>, window_params = [{transform_indices = @transform_0, window_bounds = array<i64: 1, 1, 16, 16, 8>}, {transform_indices = @transform_1, window_bounds = array<i64: 1, 2, 128>}, {transform_indices = @transform_2, window_bounds = array<i64: 1, 1, 16, 16, 8>}]} {
    %c0 = arith.constant 0 : index
    %c0_0 = arith.constant 0 : index
    %c0_1 = arith.constant 0 : index
    %0 = vector.load %arg3[%c0, %c0_0, %c0_1] : memref<1x2x128xf32, #tpu.memory_space<vmem>>, vector<1x2x128xf32>
    %1 = vector.shape_cast %0 : vector<1x2x128xf32> to vector<2x128xf32>
    %2 = vector.extract_strided_slice %1 {offsets = [0, 0], sizes = [1, 8], strides = [1, 1]} : vector<2x128xf32> to vector<1x8xf32>
    %3 = vector.extract_strided_slice %1 {offsets = [1, 0], sizes = [1, 8], strides = [1, 1]} : vector<2x128xf32> to vector<1x8xf32>
    %c0_2 = arith.constant 0 : index
    %c0_3 = arith.constant 0 : index
    %c0_4 = arith.constant 0 : index
    %c0_5 = arith.constant 0 : index
    %c0_6 = arith.constant 0 : index
    %4 = vector.load %arg2[%c0_2, %c0_3, %c0_4, %c0_5, %c0_6] : memref<1x1x16x16x8xbf16, #tpu.memory_space<vmem>>, vector<1x1x16x16x8xbf16>
    %5 = vector.shape_cast %4 : vector<1x1x16x16x8xbf16> to vector<16x16x8xbf16>
    %6 = arith.extf %5 : vector<16x16x8xbf16> to vector<16x16x8xf32>
    %7 = vector.shape_cast %2 : vector<1x8xf32> to vector<1x1x8xf32>
    %8 = vector.broadcast %7 : vector<1x1x8xf32> to vector<16x16x8xf32>
    %9 = arith.subf %6, %8 : vector<16x16x8xf32>
    %10 = vector.shape_cast %3 : vector<1x8xf32> to vector<1x1x8xf32>
    %11 = vector.broadcast %10 : vector<1x1x8xf32> to vector<16x16x8xf32>
    %12 = arith.mulf %9, %11 : vector<16x16x8xf32>
    %cst = arith.constant 0.000000e+00 : f32
    %13 = vector.broadcast %cst : f32 to vector<16x16x8xf32>
    %14 = arith.maximumf %12, %13 : vector<16x16x8xf32>
    %c0_7 = arith.constant 0 : index
    %c0_8 = arith.constant 0 : index
    %c0_9 = arith.constant 0 : index
    %c0_10 = arith.constant 0 : index
    %c0_11 = arith.constant 0 : index
    %15 = vector.load %arg4[%c0_7, %c0_8, %c0_9, %c0_10, %c0_11] : memref<1x1x16x16x8xf32, #tpu.memory_space<vmem>>, vector<1x1x16x16x8xf32>
    %16 = vector.shape_cast %15 : vector<1x1x16x16x8xf32> to vector<16x16x8xf32>
    %17 = vector.shape_cast %14 : vector<16x16x8xf32> to vector<1x1x16x16x8xf32>
    tpu.vector_store %arg4[%c0_7, %c0_8, %c0_9, %c0_10, %c0_11], %17 {strides = array<i32>} : memref<1x1x16x16x8xf32, #tpu.memory_space<vmem>>, vector<1x1x16x16x8xf32>,
    return
  }
  func.func @transform_0(%arg0: i32, %arg1: i32) -> (i32, i32, i32, i32, i32) {
    %c0_i32 = arith.constant 0 : i32
    %c0_i32_0 = arith.constant 0 : i32
    %c0_i32_1 = arith.constant 0 : i32
    %c0_i32_2 = arith.constant 0 : i32
    return %arg0, %arg1, %c0_i32, %c0_i32_0, %c0_i32_1 : i32, i32, i32, i32, i32
  }
  func.func @transform_1(%arg0: i32, %arg1: i32) -> (i32, i32, i32) {
    %c0_i32 = arith.constant 0 : i32
    %c0_i32_0 = arith.constant 0 : i32
    %c0_i32_1 = arith.constant 0 : i32
    return %arg0, %c0_i32, %c0_i32_0 : i32, i32, i32
  }
  func.func @transform_2(%arg0: i32, %arg1: i32) -> (i32, i32, i32, i32, i32) {
    %c0_i32 = arith.constant 0 : i32
    %c0_i32_0 = arith.constant 0 : i32
    %c0_i32_1 = arith.constant 0 : i32
    %c0_i32_2 = arith.constant 0 : i32
    return %arg0, %arg1, %c0_i32, %c0_i32_0, %c0_i32_1 : i32, i32, i32, i32, i32
  }
}

</mosaic_0001>

<bundles_post_ra>
// kernel: double_conv2_forward.5
= control target key start
LH: loop header
LB: loop body
LE: loop exit
PB: predicated region body
PF: predicated region fallthrough
CT: control target
= control target key end

     0   :  { %s688_s9 = smov 0   ;;  %s690_s10 = smov 0   ;;  %s898_s0 = inlined_call_operand.vmem [shape: bf16[2,16,16,16,8], index: 0, kind: input, shape index: {}]   ;;  %s899_s1 = inlined_call_operand.vmem [shape: f32[2,2,128], index: 1, kind: input, shape index: {}]   ;;  %s900_s2 = inlined_call_operand.vmem [shape: f32[2,16,16,16,8], index: 2, kind: output, shape index: {}]  }
   0x1   :  { %s692_s11 = smov 0   ;;  %s694_s12 = smov 0  }
   0x2   :  { %s696_s13 = smov 0  }
   0x3 LB: > { %s21_s14 = sadd.s32 1, %s663_s11  ;;  %s24_s15 = sadd.s32 1, %s667_s12  ;;  %s671_s13 = sphi %s696_s13, %s12_s13   ;;  %s667_s12 = sphi %s694_s12, %s904_s12   ;;  %s663_s11 = sphi %s692_s11, %s903_s11   ;;  %s659_s10 = sphi %s690_s10, %s902_s10   ;;  %s655_s9 = sphi %s688_s9, %s901_s9  }
   0x4   : > { %p22_p0 = scmp.ge.s32.totalorder %s21_s14, 16  ;;  %p504_p1 = scmp.ge.s32.totalorder %s671_s13, 1 }
   0x5   : > { %p141_p2 = scmp.lt.s32.totalorder %s671_s13, 33 }
   0x6   : > { %s906_s14 = smov (%p22_p0, %s21_s14), 0  ;;  %s908_s15 = smov (!%p22_p0, %s24_s15), %s667_s12 }
   0x7   : > { %p142_p3 = pnand %p504_p1, %p141_p2  ;;  %p26_p4 = scmp.ge.s32.totalorder %s908_s15, 2 }
   0x8   : > { %p175_p5 = scmp.lt.s32.totalorder (!%p142_p3), %s659_s10, 1  ;;  %p177_p6 = scmp.lt.s32.totalorder (!%p142_p3), %s655_s9, 15 }
   0x9   : > { %s910_s15 = smov (%p26_p4, %s908_s15), 0  ;;  %145 = sbr.rel (%p142_p3) target bundleno = 61 (0x3d), region = 28 }
   0xe   : > { %s912_s10 = smov (!%p175_p5, %s659_s10), 1  ;;  %s914_s9 = smov (!%p177_p6, %s655_s9), 15  ;;  %vm360_vm0 = vcmask 64512  }
   0xf   : > { %s506_s16 = sshll.u32 %s912_s10, 9  ;;  %s508_s17 = sshll.u32 %s912_s10, 1 }
  0x10   : > { %s505_s18 = sshll.u32 %s914_s9, 5  ;;  %s187_s21 = scalar_lea.vmem %s899_s1, %s508_s17 }
  0x11   : > { %s721_s22 = sadd.s32 %s506_s16, %s505_s18  ;;  %v197_v0 = vld [vmem:[%s187_s21] sm:$0x3] }
  0x12   : > { %s507_s23 = sshll.u32 %s721_s22, 2  ;;  %v729_v1 = vperm.slane %v197_v0, 0  ;;  %v732_v3 = vperm.slane %v197_v0, 1  ;;  %s511_s27 = sshll.u32 %s721_s22, 3 }
  0x13   : > { %s727_s26 = scalar_lea.vmem %s898_s0, %s507_s23  ;;  %s753_s30 = scalar_lea.vmem %s900_s2, %s511_s27 }
  0x14   : > { %v515_v2 = vld [vmem:[%s727_s26] sm:$0xff]   ;;  %v578_v4 = vld [vmem:[%s727_s26 + $0x8] sm:$0xff]   ;;  %v579_v5 = vld [vmem:[%s727_s26 + $0x10] sm:$0xff]  }
  0x15   : > { %v516_v6 = vunpack.c.l.bf16 %v515_v2  ;;  %v517_v7 = vunpack.c.h.bf16 %v515_v2  ;;  %v520_v8 = vunpack.c.l.bf16 %v578_v4  ;;  %v521_v9 = vunpack.c.h.bf16 %v578_v4  ;;  %v580_v10 = vld [vmem:[%s727_s26 + $0x18] sm:$0xff]   ;;  %v581_v31 = vld [vmem:[%s727_s26 + $0x20] sm:$0xff]   ;;  %v582_v32 = vld [vmem:[%s727_s26 + $0x28] sm:$0xff]  }
  0x16   : > { %v524_v11 = vunpack.c.l.bf16 %v579_v5  ;;  %v525_v12 = vunpack.c.h.bf16 %v579_v5  ;;  %v528_v13 = vunpack.c.l.bf16 %v580_v10  ;;  %v529_v14 = vunpack.c.h.bf16 %v580_v10  ;;  %v583_v37 = vld [vmem:[%s727_s26 + $0x30] sm:$0xff]   ;;  %v584_v38 = vld [vmem:[%s727_s26 + $0x38] sm:$0xff]   ;;  %v585_v5 = vld [vmem:[%s727_s26 + $0x40] sm:$0xff]  }
  0x17   : > { %v263_v15 = vsub.f32 %v516_v6, %v729_v1  ;;  %v264_v16 = vsub.f32 %v517_v7, %v729_v1  ;;  %v265_v17 = vsub.f32 %v520_v8, %v729_v1  ;;  %v266_v18 = vsub.f32 %v521_v9, %v729_v1  ;;  %v586_v6 = vld [vmem:[%s727_s26 + $0x48] sm:$0xff]   ;;  %v587_v7 = vld [vmem:[%s727_s26 + $0x50] sm:$0xff]  }
  0x18   : > { %v267_v19 = vsub.f32 %v524_v11, %v729_v1  ;;  %v268_v20 = vsub.f32 %v525_v12, %v729_v1  ;;  %v269_v21 = vsub.f32 %v528_v13, %v729_v1  ;;  %v270_v22 = vsub.f32 %v529_v14, %v729_v1  ;;  %v588_v12 = vld [vmem:[%s727_s26 + $0x58] sm:$0xff]  }
  0x19   : > { %v296_v23 = vmul.f32 %v732_v3, %v263_v15  ;;  %v297_v24 = vmul.f32 %v732_v3, %v264_v16  ;;  %v298_v25 = vmul.f32 %v732_v3, %v265_v17  ;;  %v299_v26 = vmul.f32 %v732_v3, %v266_v18 }
  0x1a   : > { %v300_v27 = vmul.f32 %v732_v3, %v267_v19  ;;  %v301_v28 = vmul.f32 %v732_v3, %v268_v20  ;;  %v302_v29 = vmul.f32 %v732_v3, %v269_v21  ;;  %v303_v30 = vmul.f32 %v732_v3, %v270_v22 }
  0x1b   : > { %v328_v33 = vmax.f32 %v296_v23, 0.0  ;;  %v329_v34 = vmax.f32 %v297_v24, 0.0  ;;  %v330_v35 = vmax.f32 %v298_v25, 0.0  ;;  %v331_v36 = vmax.f32 %v299_v26, 0.0 }
  0x1c   : > { %v332_v39 = vmax.f32 %v300_v27, 0.0  ;;  %v333_v40 = vmax.f32 %v301_v28, 0.0  ;;  %v334_v41 = vmax.f32 %v302_v29, 0.0  ;;  %v335_v42 = vmax.f32 %v303_v30, 0.0 }
  0x1d   : > { %361 = vst.msk [vmem:[%s753_s30] sm:$0xff] %vm360_vm0, %v328_v33  ;;  %v532_v43 = vunpack.c.l.bf16 %v581_v31  ;;  %v533_v44 = vunpack.c.h.bf16 %v581_v31  ;;  %v536_v45 = vunpack.c.l.bf16 %v582_v32  ;;  %v537_v46 = vunpack.c.h.bf16 %v582_v32 }
  0x1e   : > { %362 = vst.msk [vmem:[%s753_s30 + $0x8] sm:$0xff] %vm360_vm0, %v329_v34  ;;  %v540_v47 = vunpack.c.l.bf16 %v583_v37  ;;  %v541_v48 = vunpack.c.h.bf16 %v583_v37  ;;  %v544_v49 = vunpack.c.l.bf16 %v584_v38  ;;  %v545_v50 = vunpack.c.h.bf16 %v584_v38 }
  0x1f   : > { %363 = vst.msk [vmem:[%s753_s30 + $0x10] sm:$0xff] %vm360_vm0, %v330_v35  ;;  %v271_v51 = vsub.f32 %v532_v43, %v729_v1  ;;  %v272_v52 = vsub.f32 %v533_v44, %v729_v1  ;;  %v273_v53 = vsub.f32 %v536_v45, %v729_v1  ;;  %v274_v54 = vsub.f32 %v537_v46, %v729_v1  ;;  %v591_v43 = vld [vmem:[%s727_s26 + $0x70] sm:$0xff]  }
  0x20   : > { %364 = vst.msk [vmem:[%s753_s30 + $0x18] sm:$0xff] %vm360_vm0, %v331_v36  ;;  %v275_v55 = vsub.f32 %v540_v47, %v729_v1  ;;  %v276_v56 = vsub.f32 %v541_v48, %v729_v1  ;;  %v277_v57 = vsub.f32 %v544_v49, %v729_v1  ;;  %v278_v58 = vsub.f32 %v545_v50, %v729_v1  ;;  %v592_v48 = vld [vmem:[%s727_s26 + $0x78] sm:$0xff]  }
  0x21   : > { %365 = vst.msk [vmem:[%s753_s30 + $0x20] sm:$0xff] %vm360_vm0, %v332_v39  ;;  %v304_v59 = vmul.f32 %v732_v3, %v271_v51  ;;  %v305_v60 = vmul.f32 %v732_v3, %v272_v52  ;;  %v306_v61 = vmul.f32 %v732_v3, %v273_v53  ;;  %v307_v62 = vmul.f32 %v732_v3, %v274_v54 }
  0x22   : > { %366 = vst.msk [vmem:[%s753_s30 + $0x28] sm:$0xff] %vm360_vm0, %v333_v40  ;;  %v308_v63 = vmul.f32 %v732_v3, %v275_v55  ;;  %v309_v0 = vmul.f32 %v732_v3, %v276_v56  ;;  %v310_v2 = vmul.f32 %v732_v3, %v277_v57  ;;  %v311_v4 = vmul.f32 %v732_v3, %v278_v58 }
  0x23   : > { %367 = vst.msk [vmem:[%s753_s30 + $0x30] sm:$0xff] %vm360_vm0, %v334_v41  ;;  %v336_v8 = vmax.f32 %v304_v59, 0.0  ;;  %v337_v9 = vmax.f32 %v305_v60, 0.0  ;;  %v338_v10 = vmax.f32 %v306_v61, 0.0  ;;  %v339_v11 = vmax.f32 %v307_v62, 0.0  ;;  %v589_v41 = vld [vmem:[%s727_s26 + $0x60] sm:$0xff]  }
  0x24   : > { %368 = vst.msk [vmem:[%s753_s30 + $0x38] sm:$0xff] %vm360_vm0, %v335_v42  ;;  %v340_v13 = vmax.f32 %v308_v63, 0.0  ;;  %v341_v14 = vmax.f32 %v309_v0, 0.0  ;;  %v342_v15 = vmax.f32 %v310_v2, 0.0  ;;  %v343_v16 = vmax.f32 %v311_v4, 0.0  ;;  %v590_v42 = vld [vmem:[%s727_s26 + $0x68] sm:$0xff]  }
  0x25   : > { %369 = vst.msk [vmem:[%s753_s30 + $0x40] sm:$0xff] %vm360_vm0, %v336_v8  ;;  %v548_v17 = vunpack.c.l.bf16 %v585_v5  ;;  %v549_v18 = vunpack.c.h.bf16 %v585_v5  ;;  %v552_v19 = vunpack.c.l.bf16 %v586_v6  ;;  %v553_v20 = vunpack.c.h.bf16 %v586_v6 }
  0x26   : > { %370 = vst.msk [vmem:[%s753_s30 + $0x48] sm:$0xff] %vm360_vm0, %v337_v9  ;;  %v556_v21 = vunpack.c.l.bf16 %v587_v7  ;;  %v557_v22 = vunpack.c.h.bf16 %v587_v7  ;;  %v560_v23 = vunpack.c.l.bf16 %v588_v12  ;;  %v561_v24 = vunpack.c.h.bf16 %v588_v12 }
  0x27   : > { %371 = vst.msk [vmem:[%s753_s30 + $0x50] sm:$0xff] %vm360_vm0, %v338_v10  ;;  %v279_v25 = vsub.f32 %v548_v17, %v729_v1  ;;  %v280_v26 = vsub.f32 %v549_v18, %v729_v1  ;;  %v281_v27 = vsub.f32 %v552_v19, %v729_v1  ;;  %v282_v28 = vsub.f32 %v553_v20, %v729_v1 }
  0x28   : > { %372 = vst.msk [vmem:[%s753_s30 + $0x58] sm:$0xff] %vm360_vm0, %v339_v11  ;;  %v283_v29 = vsub.f32 %v556_v21, %v729_v1  ;;  %v284_v30 = vsub.f32 %v557_v22, %v729_v1  ;;  %v285_v31 = vsub.f32 %v560_v23, %v729_v1  ;;  %v286_v32 = vsub.f32 %v561_v24, %v729_v1 }
  0x29   : > { %373 = vst.msk [vmem:[%s753_s30 + $0x60] sm:$0xff] %vm360_vm0, %v340_v13  ;;  %v312_v33 = vmul.f32 %v732_v3, %v279_v25  ;;  %v313_v34 = vmul.f32 %v732_v3, %v280_v26  ;;  %v314_v35 = vmul.f32 %v732_v3, %v281_v27  ;;  %v315_v36 = vmul.f32 %v732_v3, %v282_v28 }
  0x2a   : > { %374 = vst.msk [vmem:[%s753_s30 + $0x68] sm:$0xff] %vm360_vm0, %v341_v14  ;;  %v316_v37 = vmul.f32 %v732_v3, %v283_v29  ;;  %v317_v38 = vmul.f32 %v732_v3, %v284_v30  ;;  %v318_v39 = vmul.f32 %v732_v3, %v285_v31  ;;  %v319_v40 = vmul.f32 %v732_v3, %v286_v32 }
  0x2b   : > { %375 = vst.msk [vmem:[%s753_s30 + $0x70] sm:$0xff] %vm360_vm0, %v342_v15  ;;  %v344_v44 = vmax.f32 %v312_v33, 0.0  ;;  %v345_v45 = vmax.f32 %v313_v34, 0.0  ;;  %v346_v46 = vmax.f32 %v314_v35, 0.0  ;;  %v347_v47 = vmax.f32 %v315_v36, 0.0 }
  0x2c   : > { %376 = vst.msk [vmem:[%s753_s30 + $0x78] sm:$0xff] %vm360_vm0, %v343_v16  ;;  %v348_v49 = vmax.f32 %v316_v37, 0.0  ;;  %v349_v50 = vmax.f32 %v317_v38, 0.0  ;;  %v350_v51 = vmax.f32 %v318_v39, 0.0  ;;  %v351_v52 = vmax.f32 %v319_v40, 0.0 }
  0x2d   : > { %377 = vst.msk [vmem:[%s753_s30 + $0x80] sm:$0xff] %vm360_vm0, %v344_v44  ;;  %v564_v53 = vunpack.c.l.bf16 %v589_v41  ;;  %v565_v54 = vunpack.c.h.bf16 %v589_v41  ;;  %v568_v55 = vunpack.c.l.bf16 %v590_v42  ;;  %v569_v56 = vunpack.c.h.bf16 %v590_v42 }
  0x2e   : > { %378 = vst.msk [vmem:[%s753_s30 + $0x88] sm:$0xff] %vm360_vm0, %v345_v45  ;;  %v572_v57 = vunpack.c.l.bf16 %v591_v43  ;;  %v573_v58 = vunpack.c.h.bf16 %v591_v43  ;;  %v576_v59 = vunpack.c.l.bf16 %v592_v48  ;;  %v577_v60 = vunpack.c.h.bf16 %v592_v48 }
  0x2f   : > { %379 = vst.msk [vmem:[%s753_s30 + $0x90] sm:$0xff] %vm360_vm0, %v346_v46  ;;  %v287_v61 = vsub.f32 %v564_v53, %v729_v1  ;;  %v288_v62 = vsub.f32 %v565_v54, %v729_v1  ;;  %v289_v63 = vsub.f32 %v568_v55, %v729_v1  ;;  %v290_v0 = vsub.f32 %v569_v56, %v729_v1 }
  0x30   : > { %380 = vst.msk [vmem:[%s753_s30 + $0x98] sm:$0xff] %vm360_vm0, %v347_v47  ;;  %v291_v2 = vsub.f32 %v572_v57, %v729_v1  ;;  %v292_v4 = vsub.f32 %v573_v58, %v729_v1  ;;  %v293_v5 = vsub.f32 %v576_v59, %v729_v1  ;;  %v294_v6 = vsub.f32 %v577_v60, %v729_v1 }
  0x31   : > { %381 = vst.msk [vmem:[%s753_s30 + $0xa0] sm:$0xff] %vm360_vm0, %v348_v49  ;;  %v320_v7 = vmul.f32 %v732_v3, %v287_v61  ;;  %v321_v8 = vmul.f32 %v732_v3, %v288_v62  ;;  %v322_v9 = vmul.f32 %v732_v3, %v289_v63  ;;  %v323_v10 = vmul.f32 %v732_v3, %v290_v0 }
  0x32   : > { %382 = vst.msk [vmem:[%s753_s30 + $0xa8] sm:$0xff] %vm360_vm0, %v349_v50  ;;  %v324_v11 = vmul.f32 %v732_v3, %v291_v2  ;;  %v325_v1 = vmul.f32 %v732_v3, %v292_v4  ;;  %v326_v15 = vmul.f32 %v732_v3, %v293_v5  ;;  %v327_v17 = vmul.f32 %v732_v3, %v294_v6 }
  0x33   : > { %383 = vst.msk [vmem:[%s753_s30 + $0xb0] sm:$0xff] %vm360_vm0, %v350_v51  ;;  %v352_v12 = vmax.f32 %v320_v7, 0.0  ;;  %v353_v13 = vmax.f32 %v321_v8, 0.0  ;;  %v354_v14 = vmax.f32 %v322_v9, 0.0  ;;  %v355_v16 = vmax.f32 %v323_v10, 0.0 }
  0x34   : > { %384 = vst.msk [vmem:[%s753_s30 + $0xb8] sm:$0xff] %vm360_vm0, %v351_v52  ;;  %v356_v18 = vmax.f32 %v324_v11, 0.0  ;;  %v357_v19 = vmax.f32 %v325_v1, 0.0  ;;  %v358_v20 = vmax.f32 %v326_v15, 0.0  ;;  %v359_v21 = vmax.f32 %v327_v17, 0.0 }
  0x35   : > { %385 = vst.msk [vmem:[%s753_s30 + $0xc0] sm:$0xff] %vm360_vm0, %v352_v12 }
  0x36   : > { %386 = vst.msk [vmem:[%s753_s30 + $0xc8] sm:$0xff] %vm360_vm0, %v353_v13 }
  0x37   : > { %387 = vst.msk [vmem:[%s753_s30 + $0xd0] sm:$0xff] %vm360_vm0, %v354_v14 }
  0x38   : > { %388 = vst.msk [vmem:[%s753_s30 + $0xd8] sm:$0xff] %vm360_vm0, %v355_v16 }
  0x39   : > { %389 = vst.msk [vmem:[%s753_s30 + $0xe0] sm:$0xff] %vm360_vm0, %v356_v18 }
  0x3a   : > { %390 = vst.msk [vmem:[%s753_s30 + $0xe8] sm:$0xff] %vm360_vm0, %v357_v19 }
  0x3b   : > { %391 = vst.msk [vmem:[%s753_s30 + $0xf0] sm:$0xff] %vm360_vm0, %v358_v20 }
  0x3c   : > { %392 = vst.msk [vmem:[%s753_s30 + $0xf8] sm:$0xff] %vm360_vm0, %v359_v21 }
  0x3d PF: > { %s12_s13 = sadd.s32 1, %s671_s13   ;;  %s901_s9 = smov %s663_s11 }
  0x3e   : > { %p9_p7 = scmp.ge.s32.totalorder %s12_s13, 34   ;;  %s902_s10 = smov %s667_s12 }
  0x3f   : > { %s903_s11 = smov %s906_s14  ;;  %s904_s12 = smov %s910_s15 }
  0x40   :  { %11 = sbr.rel (!%p9_p7) target bundleno = 3 (0x3), region = 61 }

// kernel: double_conv2_forward.3
= control target key start
LH: loop header
LB: loop body
LE: loop exit
PB: predicated region body
PF: predicated region fallthrough
CT: control target
= control target key end

     0   :  { %s2006_s18 = smov 0   ;;  %s2008_s19 = smov 0   ;;  %s2422_s0 = inlined_call_operand.vmem [shape: bf16[2,20,20,20,8], index: 0, kind: input, shape index: {}, may-alias: {0,1,2}]   ;;  %s2423_s1 = inlined_call_operand.vmem [shape: bf16[2,20,20,20,8], index: 1, kind: input, shape index: {}, may-alias: {0,1,2}]   ;;  %s2424_s2 = inlined_call_operand.vmem [shape: bf16[2,20,20,20,8], index: 2, kind: input, shape index: {}, may-alias: {0,1,2}]   ;;  %s2425_s3 = inlined_call_operand.vmem [shape: bf16[27,8,128], index: 3, kind: input, shape index: {}]   ;;  %s2426_s4 = inlined_call_operand.vmem [shape: bf16[2,18,18,18,8], index: 4, kind: output, shape index: {0}]   ;;  %s2427_s5 = inlined_call_operand.vmem [shape: f32[2,18,2,128], index: 5, kind: output, shape index: {1}]  }
   0x1   :  { %s2010_s20 = smov 0   ;;  %s2012_s21 = smov 0  }
   0x2   :  { %s2014_s22 = smov 0  }
   0x3 LB: > { %s25_s23 = sadd.s32 1, %s1956_s20  ;;  %s28_s24 = sadd.s32 1, %s1960_s21  ;;  %s1964_s22 = sphi %s2014_s22, %s16_s22   ;;  %s1960_s21 = sphi %s2012_s21, %s2437_s21   ;;  %s1956_s20 = sphi %s2010_s20, %s2436_s20   ;;  %s1952_s19 = sphi %s2008_s19, %s2435_s19   ;;  %s1948_s18 = sphi %s2006_s18, %s2434_s18  }
   0x4   : > { %p26_p0 = scmp.ge.s32.totalorder %s25_s23, 18  ;;  %p1684_p1 = scmp.ge.s32.totalorder %s1964_s22, 1 }
   0x5   : > { %p312_p2 = scmp.lt.s32.totalorder %s1964_s22, 37 }
   0x6   : > { %s2439_s23 = smov (%p26_p0, %s25_s23), 0  ;;  %s2441_s24 = smov (!%p26_p0, %s28_s24), %s1960_s21 }
   0x7   : > { %2428 = sst [smem:[#allocation2_spill]] %s2439_s23  ;;  %p313_p3 = pnand %p1684_p1, %p312_p2 }
   0x8   : > { %p30_p4 = scmp.ge.s32.totalorder %s2441_s24, 2  ;;  %s1685_s25 = sadd.s32 (!%p313_p3), 4294967295, %s1948_s18 }
   0x9   : > { %316 = sbr.rel (%p313_p3) target bundleno = 360 (0x168), region = 36  ;;  %p396_p5 = scmp.lt.s32.totalorder (!%p313_p3), %s1952_s19, 1 }
   0xa   : > { %s2443_s24 = smov (%p30_p4, %s2441_s24), 0  ;;  %p392_p6 = scmp.gt.s32.totalorder (!%p313_p3), %s1685_s25, 0 }
   0xb   : > { %2429 = sst [smem:[#allocation3_spill]] %s2443_s24  ;;  %p1686_p7 = scmp.lt.s32.totalorder (!%p313_p3), %s1685_s25, 15 }
   0xc   : > { %p454_p8 = scmp.lt.s32.totalorder (!%p313_p3), %s1948_s18, 17  ;;  %p470_p12 = scmp.ge.s32.totalorder (!%p313_p3), %s1948_s18, 1 }
   0xd   : > { %p471_p13 = scmp.le.s32.totalorder (!%p313_p3), %s1948_s18, 16 }
   0xe   : > { %s2445_s19 = smov (!%p396_p5, %s1952_s19), 1  ;;  %s2447_s25 = smov (!%p392_p6, %s1685_s25), 0  ;;  %vm474_vm0 = vcmask 60416   ;;  %v1974_v0 = vmov 0   ;;  %vm477_vm1 = vcmask 57344  }
   0xf   : > { %s2042_s26 = smul.u32 1200, %s2445_s19  ;;  %s2449_s25 = smov (!%p1686_p7, %s2447_s25), 15 }
  0x10   : > { %s455_s27 = scalar_select %p454_p8, %s1948_s18, 17 }
  0x11   : > { %p398_p9 = scmp.lt.s32.totalorder %s2449_s25, 19  ;;  %s415_s28 = sadd.s32 2, %s2449_s25 }
  0x12   : > { %p418_p10 = scmp.lt.s32.totalorder %s415_s28, 19  ;;  %s436_s29 = sadd.s32 4, %s2449_s25 }
  0x13   : > { %s2451_s25 = smov (!%p398_p9, %s2449_s25), 19  ;;  %p439_p11 = scmp.lt.s32.totalorder %s436_s29, 19 }
  0x14   : > { %s2453_s28 = smov (!%p418_p10, %s415_s28), 19  ;;  %s1853_s30 = smul.u32 60, %s2451_s25 }
  0x15   : > { %s1855_s6 = smul.u32 60, %s2453_s28  ;;  %s2455_s29 = smov (!%p439_p11, %s436_s29), 19 }
  0x16   : > { %s402_s7 = sadd.s32 %s2042_s26, %s1853_s30  ;;  %s1857_s8 = smul.u32 54, %s455_s27 }
  0x17   : > { %s1691_s9 = sshll.u32 %s402_s7, 2  ;;  %s422_s10 = sadd.s32 %s1855_s6, %s2042_s26 }
  0x18   : > { %s2052_s13 = scalar_lea.vmem %s2422_s0, %s1691_s9  ;;  %s1698_s14 = sshll.u32 %s422_s10, 2 }
  0x19   : > { %s2057_s17 = scalar_lea.vmem %s2423_s1, %s1698_s14  ;;  %s1858_s25 = smul.u32 972, %s2445_s19 }
  0x1a   : > { %s1859_s30 = smul.u32 18, %s2445_s19  ;;  %p2088_p0 = pnand %p471_p13, %p470_p12 }
  0x1b   : > { %s458_s28 = sadd.s32 %s1858_s25, %s1857_s8  ;;  %s1856_s7 = smul.u32 60, %s2455_s29 }
  0x1c   : > { %s1706_s6 = sshll.u32 %s458_s28, 2  ;;  %s466_s10 = sadd.s32 %s1859_s30, %s455_s27 }
  0x1d   : > { %s2064_s9 = scalar_lea.vmem %s2426_s4, %s1706_s6  ;;  %s443_s8 = sadd.s32 %s1856_s7, %s2042_s26 }
  0x1e   : > { %s1707_s19 = sshll.u32 %s466_s10, 1  ;;  %475 = vst.msk [vmem:[%s2064_s9] sm:$0xf] %vm474_vm0, %v1974_v0  ;;  %s1705_s23 = sshll.u32 %s443_s8, 2 }
  0x1f   : > { %s2072_s11 = scalar_lea.vmem %s2427_s5, %s1707_s19  ;;  %476 = vst.msk [vmem:[%s2064_s9 + $0x4] sm:$0xf] %vm474_vm0, %v1974_v0  ;;  %s2079_s12 = scalar_lea.vmem %s2424_s2, %s1705_s23 }
  0x20   : > { %479 = vst.msk [vmem:[%s2064_s9 + $0xc] sm:$0xf] %vm474_vm0, %v1974_v0  ;;  %s2196_s18 = smov (!%p2088_p0), 0  }
  0x21   : > { %480 = vst.msk [vmem:[%s2064_s9 + $0x10] sm:$0xf] %vm474_vm0, %v1974_v0 }
  0x22   : > { %482 = vst.msk [vmem:[%s2064_s9 + $0x18] sm:$0xf] %vm474_vm0, %v1974_v0 }
  0x23   : > { %483 = vst.msk [vmem:[%s2064_s9 + $0x1c] sm:$0xf] %vm474_vm0, %v1974_v0 }
  0x24   : > { %485 = vst.msk [vmem:[%s2064_s9 + $0x24] sm:$0xf] %vm474_vm0, %v1974_v0 }
  0x25   : > { %486 = vst.msk [vmem:[%s2064_s9 + $0x28] sm:$0xf] %vm474_vm0, %v1974_v0 }
  0x26   : > { %488 = vst.msk [vmem:[%s2064_s9 + $0x30] sm:$0xf] %vm474_vm0, %v1974_v0 }
  0x27   : > { %489 = vst.msk [vmem:[%s2064_s9 + $0x34] sm:$0xf] %vm474_vm0, %v1974_v0 }
  0x28   : > { %491 = vst.msk [vmem:[%s2064_s9 + $0x3c] sm:$0xf] %vm474_vm0, %v1974_v0 }
  0x29   : > { %492 = vst.msk [vmem:[%s2064_s9 + $0x40] sm:$0xf] %vm474_vm0, %v1974_v0 }
  0x2a   : > { %494 = vst.msk [vmem:[%s2064_s9 + $0x48] sm:$0xf] %vm474_vm0, %v1974_v0 }
  0x2b   : > { %495 = vst.msk [vmem:[%s2064_s9 + $0x4c] sm:$0xf] %vm474_vm0, %v1974_v0 }
  0x2c   : > { %497 = vst.msk [vmem:[%s2064_s9 + $0x54] sm:$0xf] %vm474_vm0, %v1974_v0 }
  0x2d   : > { %498 = vst.msk [vmem:[%s2064_s9 + $0x58] sm:$0xf] %vm474_vm0, %v1974_v0 }
  0x2e   : > { %500 = vst.msk [vmem:[%s2064_s9 + $0x60] sm:$0xf] %vm474_vm0, %v1974_v0 }
  0x2f   : > { %501 = vst.msk [vmem:[%s2064_s9 + $0x64] sm:$0xf] %vm474_vm0, %v1974_v0 }
  0x30   : > { %503 = vst.msk [vmem:[%s2064_s9 + $0x6c] sm:$0xf] %vm474_vm0, %v1974_v0 }
  0x31   : > { %504 = vst.msk [vmem:[%s2064_s9 + $0x70] sm:$0xf] %vm474_vm0, %v1974_v0 }
  0x32   : > { %506 = vst.msk [vmem:[%s2064_s9 + $0x78] sm:$0xf] %vm474_vm0, %v1974_v0 }
  0x33   : > { %507 = vst.msk [vmem:[%s2064_s9 + $0x7c] sm:$0xf] %vm474_vm0, %v1974_v0 }
  0x34   : > { %509 = vst.msk [vmem:[%s2064_s9 + $0x84] sm:$0xf] %vm474_vm0, %v1974_v0 }
  0x35   : > { %510 = vst.msk [vmem:[%s2064_s9 + $0x88] sm:$0xf] %vm474_vm0, %v1974_v0 }
  0x36   : > { %512 = vst.msk [vmem:[%s2064_s9 + $0x90] sm:$0xf] %vm474_vm0, %v1974_v0 }
  0x37   : > { %513 = vst.msk [vmem:[%s2064_s9 + $0x94] sm:$0xf] %vm474_vm0, %v1974_v0 }
  0x38   : > { %515 = vst.msk [vmem:[%s2064_s9 + $0x9c] sm:$0xf] %vm474_vm0, %v1974_v0 }
  0x39   : > { %516 = vst.msk [vmem:[%s2064_s9 + $0xa0] sm:$0xf] %vm474_vm0, %v1974_v0 }
  0x3a   : > { %518 = vst.msk [vmem:[%s2064_s9 + $0xa8] sm:$0xf] %vm474_vm0, %v1974_v0 }
  0x3b   : > { %519 = vst.msk [vmem:[%s2064_s9 + $0xac] sm:$0xf] %vm474_vm0, %v1974_v0 }
  0x3c   : > { %521 = vst.msk [vmem:[%s2064_s9 + $0xb4] sm:$0xf] %vm474_vm0, %v1974_v0 }
  0x3d   : > { %522 = vst.msk [vmem:[%s2064_s9 + $0xb8] sm:$0xf] %vm474_vm0, %v1974_v0 }
  0x3e   : > { %524 = vst.msk [vmem:[%s2064_s9 + $0xc0] sm:$0xf] %vm474_vm0, %v1974_v0 }
  0x3f   : > { %525 = vst.msk [vmem:[%s2064_s9 + $0xc4] sm:$0xf] %vm474_vm0, %v1974_v0 }
  0x40   : > { %527 = vst.msk [vmem:[%s2064_s9 + $0xcc] sm:$0xf] %vm474_vm0, %v1974_v0 }
  0x41   : > { %528 = vst.msk [vmem:[%s2064_s9 + $0xd0] sm:$0xf] %vm474_vm0, %v1974_v0 }
  0x42   : > { %478 = vst.msk [vmem:[%s2064_s9 + $0x8] sm:$0x1] %vm477_vm1, %v1974_v0 }
  0x43   : > { %481 = vst.msk [vmem:[%s2064_s9 + $0x14] sm:$0x1] %vm477_vm1, %v1974_v0 }
  0x44   : > { %484 = vst.msk [vmem:[%s2064_s9 + $0x20] sm:$0x1] %vm477_vm1, %v1974_v0 }
  0x45   : > { %487 = vst.msk [vmem:[%s2064_s9 + $0x2c] sm:$0x1] %vm477_vm1, %v1974_v0 }
  0x46   : > { %490 = vst.msk [vmem:[%s2064_s9 + $0x38] sm:$0x1] %vm477_vm1, %v1974_v0 }
  0x47   : > { %493 = vst.msk [vmem:[%s2064_s9 + $0x44] sm:$0x1] %vm477_vm1, %v1974_v0 }
  0x48   : > { %496 = vst.msk [vmem:[%s2064_s9 + $0x50] sm:$0x1] %vm477_vm1, %v1974_v0 }
  0x49   : > { %499 = vst.msk [vmem:[%s2064_s9 + $0x5c] sm:$0x1] %vm477_vm1, %v1974_v0 }
  0x4a   : > { %502 = vst.msk [vmem:[%s2064_s9 + $0x68] sm:$0x1] %vm477_vm1, %v1974_v0 }
  0x4b   : > { %505 = vst.msk [vmem:[%s2064_s9 + $0x74] sm:$0x1] %vm477_vm1, %v1974_v0 }
  0x4c   : > { %508 = vst.msk [vmem:[%s2064_s9 + $0x80] sm:$0x1] %vm477_vm1, %v1974_v0 }
  0x4d   : > { %511 = vst.msk [vmem:[%s2064_s9 + $0x8c] sm:$0x1] %vm477_vm1, %v1974_v0 }
  0x4e   : > { %514 = vst.msk [vmem:[%s2064_s9 + $0x98] sm:$0x1] %vm477_vm1, %v1974_v0 }
  0x4f   : > { %517 = vst.msk [vmem:[%s2064_s9 + $0xa4] sm:$0x1] %vm477_vm1, %v1974_v0  ;;  %531 = sbr.rel (%p2088_p0) target bundleno = 355 (0x163), region = 40 }
  0x50   : > { %520 = vst.msk [vmem:[%s2064_s9 + $0xb0] sm:$0x1] %vm477_vm1, %v1974_v0 }
  0x51   : > { %523 = vst.msk [vmem:[%s2064_s9 + $0xbc] sm:$0x1] %vm477_vm1, %v1974_v0 }
  0x52   : > { %526 = vst.msk [vmem:[%s2064_s9 + $0xc8] sm:$0x1] %vm477_vm1, %v1974_v0 }
  0x53   : > { %529 = vst.msk [vmem:[%s2064_s9 + $0xd4] sm:$0x1] %vm477_vm1, %v1974_v0 }
  0x54   : > { %v2194_v1 = vmov 0.0  }
  0x55 LB: >> { %v545_v2 = vld [vmem:[%s2425_s3] sm:$0xf]  ;;  %vm564_vm2 = vcmask 1043456   ;;  %v1709_v3 = vld [vmem:[%s2425_s3 + $0x4] sm:$0xf]  ;;  %s2219_s8 = smul.u32 12, %s1972_s18  ;;  %s1972_s18 = sphi %s2196_s18, %s537_s18   ;;  %v1968_v1 = vphi %v2194_v1, %v2431_v1  }
  0x56   : >> { %v586_v4 = vsel %vm564_vm2, %v545_v2, 0  ;;  %v566_v5 = vsel %vm564_vm2, %v1709_v3, 0  ;;  %v1716_v6 = vld [vmem:[%s2425_s3 + $0x8] sm:$0xf]  ;;  %v1721_v7 = vld [vmem:[%s2425_s3 + $0xc] sm:$0xf] }
  0x57   : >> { %595 = vmatpush.bf16.msra.mxu1 %v586_v4  ;;  %575 = vmatpush.bf16.msra.mxu0 %v566_v5  ;;  %v612_v8 = vsel %vm564_vm2, %v1716_v6, 0  ;;  %v648_v9 = vsel %vm564_vm2, %v1721_v7, 0  ;;  %v1734_v10 = vld [vmem:[%s2425_s3 + $0x18] sm:$0xf]  ;;  %v1727_v11 = vld [vmem:[%s2425_s3 + $0x10] sm:$0xf]  ;;  %s2234_s15 = scalar_lea.vmem %s2052_s13, %s2219_s8  ;;  %s2327_s16 = scalar_lea.vmem %s2079_s12, %s2219_s8 }
  0x58   : >> { %621 = vmatpush.bf16.msra.mxu2 %v612_v8  ;;  %657 = vmatpush.bf16.msra.mxu3 %v648_v9  ;;  %v1729_v12 = vld [vmem:[%s2425_s3 + $0x14] sm:$0xf]  ;;  %vm560_vm3 = vcmask 64512   ;;  %v741_v13 = vsel %vm564_vm2, %v1734_v10, 0  ;;  %v678_v14 = vsel %vm564_vm2, %v1727_v11, 0  ;;  %v1842_v17 = vld [vmem:[%s2234_s15] sm:$0xff] }
  0x59   : >> { %v705_v15 = vsel %vm564_vm2, %v1729_v12, 0  ;;  %v1740_v16 = vld [vmem:[%s2425_s3 + $0x1c] sm:$0xf]  ;;  %v544_v18 = vld [vmem:[%s2234_s15 + $0x8] sm:$0x3]  ;;  %v557_v23 = vrot.slane %v1842_v17, 1 }
  0x5a   : >> { %v1843_v19 = vld [vmem:[%s2234_s15 + $0x18] sm:$0xff]  ;;  %v771_v20 = vsel %vm564_vm2, %v1740_v16, 0  ;;  %v553_v21 = vunpack.c.l.b16 %v544_v18  ;;  %v1720_v22 = vld [vmem:[%s2234_s15 + $0x20] sm:$0x3]  ;;  %1715 = vmatmul.msk.bf16.vlgmr.msra.gmra.mxu1 %vm560_vm3, %v1842_v17  ;;  %v1751_v24 = vld [vmem:[%s2425_s3 + $0x28] sm:$0xf] }
  0x5b   : >> { %687 = vmatpush.bf16.msrb.mxu0 %v678_v14  ;;  %714 = vmatpush.bf16.msrb.mxu1 %v705_v15  ;;  %v1733_v25 = vld [vmem:[%s2234_s15 + $0x38] sm:$0x3]  ;;  %v605_v27 = vrot.slane %v1842_v17, 2  ;;  %v669_v28 = vunpack.c.l.b16 %v1720_v22  ;;  %v1742_v30 = vld [vmem:[%s2425_s3 + $0x20] sm:$0xf]  ;;  %vm556_vm4 = vcmask 1046528  }
  0x5c   : >> { %750 = vmatpush.bf16.msrb.mxu2 %v741_v13  ;;  %780 = vmatpush.bf16.msrb.mxu3 %v771_v20  ;;  %v555_v26 = vpack.c.b16 %v553_v21, %v553_v21  ;;  %v762_v29 = vunpack.c.l.b16 %v1733_v25  ;;  %v1745_v31 = vld [vmem:[%s2425_s3 + $0x24] sm:$0xf]  ;;  %vm604_vm5 = vcmask 1045504   ;;  %v1753_v33 = vld [vmem:[%s2425_s3 + $0x2c] sm:$0xf]  ;;  %v862_v37 = vsel %vm564_vm2, %v1751_v24, 0 }
  0x5d   : >> { %1726 = vmatmul.msk.bf16.vlgmr.msra.gmra.mxu3 %vm560_vm3, %v1843_v19  ;;  %v832_v32 = vsel %vm564_vm2, %v1745_v31, 0  ;;  %v889_v36 = vsel %vm564_vm2, %v1753_v33, 0  ;;  %v798_v38 = vsel %vm564_vm2, %v1742_v30, 0  ;;  %v670_v41 = vpack.c.b16 %v669_v28, %v669_v28  ;;  %v1844_v42 = vld [vmem:[%s2234_s15 + $0x30] sm:$0xff]  ;;  %v1771_v49 = vld [vmem:[%s2425_s3 + $0x3c] sm:$0xf]  ;;  %s2281_s15 = scalar_lea.vmem %s2057_s17, %s2219_s8 }
  0x5e   : >> { %v558_v34 = vrot.slane %v555_v26, 1  ;;  %v606_v35 = vrot.slane %v555_v26, 2  ;;  %v763_v43 = vpack.c.b16 %v762_v29, %v762_v29  ;;  %v698_v44 = vrot.slane %v1843_v19, 2  ;;  %v1764_v48 = vld [vmem:[%s2425_s3 + $0x34] sm:$0xf]  ;;  %v1846_v63 = vld [vmem:[%s2281_s15] sm:$0xff] }
  0x5f   : >> { %841 = vmatpush.bf16.msra.mxu1 %v832_v32  ;;  %v699_v45 = vrot.slane %v670_v41, 2  ;;  %v764_v46 = vrot.slane %v1844_v42, 1  ;;  %v953_v52 = vsel %vm564_vm2, %v1764_v48, 0  ;;  %v1014_v53 = vsel %vm564_vm2, %v1771_v49, 0  ;;  %v820_v56 = vld [vmem:[%s2281_s15 + $0x8] sm:$0x3] }
  0x60   : >> { %898 = vmatpush.bf16.msra.mxu3 %v889_v36  ;;  %v559_v39 = vsel %vm556_vm4, %v557_v23, %v558_v34  ;;  %v607_v40 = vsel %vm604_vm5, %v605_v27, %v606_v35  ;;  %v765_v47 = vrot.slane %v763_v43, 1  ;;  %v671_v54 = vrot.slane %v1843_v19, 1  ;;  %v1766_v57 = vld [vmem:[%s2425_s3 + $0x38] sm:$0xf]  ;;  %v1758_v58 = vld [vmem:[%s2425_s3 + $0x30] sm:$0xf] }
  0x61   : >> { %1714 = vmatmul.msk.bf16.vlgmr.msra.gmra.mxu0 %vm560_vm3, %v559_v39  ;;  %1717 = vmatmul.msk.bf16.vlgmr.msra.gmra.mxu2 %vm560_vm3, %v607_v40  ;;  %v700_v50 = vsel %vm604_vm5, %v698_v44, %v699_v45  ;;  %v672_v55 = vrot.slane %v670_v41, 1  ;;  %v853_v60 = vunpack.c.l.b16 %v820_v56  ;;  %v980_v61 = vsel %vm564_vm2, %v1766_v57, 0  ;;  %v1779_v4 = vld [vmem:[%s2425_s3 + $0x44] sm:$0xf]  ;;  %v1788_v5 = vld [vmem:[%s2425_s3 + $0x4c] sm:$0xf] }
  0x62   : >> { %871 = vmatpush.bf16.msra.mxu2 %v862_v37  ;;  %807 = vmatpush.bf16.msra.mxu0 %v798_v38  ;;  %v766_v51 = vsel %vm556_vm4, %v764_v46, %v765_v47  ;;  %v923_v62 = vsel %vm564_vm2, %v1758_v58, 0  ;;  %v882_v2 = vrot.slane %v1846_v63, 2  ;;  %v1757_v7 = vld [vmem:[%s2281_s15 + $0x20] sm:$0x3]  ;;  %v1071_v8 = vsel %vm564_vm2, %v1779_v4, 0  ;;  %v1847_v21 = vld [vmem:[%s2281_s15 + $0x18] sm:$0xff] }
  0x63   : >> { %v673_v59 = vsel %vm556_vm4, %v671_v54, %v672_v55  ;;  %v854_v0 = vpack.c.b16 %v853_v60, %v853_v60  ;;  %v1135_v9 = vsel %vm564_vm2, %v1788_v5, 0  ;;  %v791_v10 = vrot.slane %v1844_v42, 2  ;;  %v1782_v15 = vld [vmem:[%s2425_s3 + $0x48] sm:$0xf]  ;;  %v1777_v16 = vld [vmem:[%s2425_s3 + $0x40] sm:$0xf] }
  0x64   : >> { %v792_v11 = vrot.slane %v763_v43, 2  ;;  %v855_v12 = vrot.slane %v1846_v63, 1  ;;  %v944_v14 = vunpack.c.l.b16 %v1757_v7  ;;  %v1105_v19 = vsel %vm564_vm2, %v1782_v15, 0  ;;  %v1795_v25 = vld [vmem:[%s2425_s3 + $0x54] sm:$0xf]  ;;  %v1850_v43 = vld [vmem:[%s2327_s16] sm:$0xff] }
  0x65   : >> { %v883_v3 = vrot.slane %v854_v0, 2  ;;  %v856_v13 = vrot.slane %v854_v0, 1  ;;  %v1044_v20 = vsel %vm564_vm2, %v1777_v16, 0  ;;  %v946_v23 = vrot.slane %v1847_v21, 1  ;;  %v1803_v26 = vld [vmem:[%s2425_s3 + $0x5c] sm:$0xf] }
  0x66   : >> { %v793_v17 = vsel %vm604_vm5, %v791_v10, %v792_v11  ;;  %v945_v22 = vpack.c.b16 %v944_v14, %v944_v14  ;;  %v1848_v27 = vld [vmem:[%s2281_s15 + $0x30] sm:$0xff]  ;;  %v1770_v29 = vld [vmem:[%s2281_s15 + $0x38] sm:$0x3]  ;;  %v1093_v30 = vld [vmem:[%s2327_s16 + $0x8] sm:$0x3]  ;;  %v1196_v31 = vsel %vm564_vm2, %v1795_v25, 0 }
  0x67   : >> { %v884_v6 = vsel %vm604_vm5, %v882_v2, %v883_v3  ;;  %v857_v18 = vsel %vm556_vm4, %v855_v12, %v856_v13  ;;  %v1253_v32 = vsel %vm564_vm2, %v1803_v26, 0  ;;  %v973_v33 = vrot.slane %v1847_v21, 2  ;;  %v1801_v36 = vld [vmem:[%s2425_s3 + $0x58] sm:$0xf]  ;;  %v1790_v38 = vld [vmem:[%s2425_s3 + $0x50] sm:$0xf] }
  0x68   : >> { %v947_v24 = vrot.slane %v945_v22, 1  ;;  %v974_v34 = vrot.slane %v945_v22, 2  ;;  %v1035_v35 = vunpack.c.l.b16 %v1770_v29  ;;  %v1126_v37 = vunpack.c.l.b16 %v1093_v30  ;;  %v1814_v49 = vld [vmem:[%s2425_s3 + $0x64] sm:$0xf]  ;;  %v1794_v55 = vld [vmem:[%s2327_s16 + $0x20] sm:$0x3] }
  0x69   : >> { %v1226_v40 = vsel %vm564_vm2, %v1801_v36, 0  ;;  %v1162_v41 = vsel %vm564_vm2, %v1790_v38, 0  ;;  %v1064_v45 = vrot.slane %v1848_v27, 2  ;;  %v1128_v47 = vrot.slane %v1850_v43, 1  ;;  %v1816_v56 = vld [vmem:[%s2425_s3 + $0x68] sm:$0xf] }
  0x6a   : >> { %1730 = vmatmul.msk.bf16.vlgmr.msrb.gmra.mxu1 %vm560_vm3, %v700_v50  ;;  %v948_v28 = vsel %vm556_vm4, %v946_v23, %v947_v24  ;;  %v975_v39 = vsel %vm604_vm5, %v973_v33, %v974_v34  ;;  %v1127_v44 = vpack.c.b16 %v1126_v37, %v1126_v37  ;;  %v1808_v57 = vld [vmem:[%s2425_s3 + $0x60] sm:$0xf]  ;;  %v1344_v60 = vsel %vm564_vm2, %v1816_v56, 0  ;;  %v1807_v4 = vld [vmem:[%s2327_s16 + $0x38] sm:$0x3]  ;;  %v1852_v12 = vld [vmem:[%s2327_s16 + $0x30] sm:$0xff] }
  0x6b   : >> { %962 = vmatpush.bf16.msrb.mxu1 %v953_v52  ;;  %v1317_v52 = vsel %vm564_vm2, %v1814_v49, 0  ;;  %v1155_v5 = vrot.slane %v1850_v43, 2  ;;  %v1310_v14 = vrot.slane %v1852_v12, 1  ;;  %vm1378_vm6 = vcmask 1040384   ;;  %s537_s18 = sadd.s32 1, %s1972_s18  }
  0x6c   : >> { %v1129_v48 = vrot.slane %v1127_v44, 1  ;;  %vm1379_vm7 = vsmask.f32 256  ;;  %p534_p1 = scmp.ge.s32.totalorder %s537_s18, 16  }
  0x6d   : >> { %1741 = vmatmul.msk.bf16.vlgmr.msrb.gmra.mxu3 %vm560_vm3, %v766_v51  ;;  %vm1380_vm8 = vmand %vm1378_vm6, %vm1379_vm7 }
  0x6e   : >> { %1023 = vmatpush.bf16.msrb.mxu3 %v1014_v53  ;;  %v1130_v51 = vsel %vm556_vm4, %v1128_v47, %v1129_v48  ;;  %v1037_v53 = vrot.slane %v1848_v27, 1 }
  0x71   : >> { %1728 = vmatmul.msk.bf16.vlgmr.msrb.gmra.mxu0 %vm560_vm3, %v673_v59  ;;  %1739 = vmatmul.msk.bf16.vlgmr.msrb.gmra.mxu2 %vm560_vm3, %v1844_v42  ;;  %v1036_v42 = vpack.c.b16 %v1035_v35, %v1035_v35  ;;  %v1217_v59 = vunpack.c.l.b16 %v1794_v55 }
  0x72   : >> { %989 = vmatpush.bf16.msrb.mxu2 %v980_v61  ;;  %932 = vmatpush.bf16.msrb.mxu0 %v923_v62  ;;  %v1287_v61 = vsel %vm564_vm2, %v1808_v57, 0  ;;  %v1851_v62 = vld [vmem:[%s2327_s16 + $0x18] sm:$0xff]  ;;  %s1564_s16 = scalar_lea.vmem %s2064_s9, %s2219_s8 }
  0x73   : >> { %v1065_v46 = vrot.slane %v1036_v42, 2  ;;  %v1038_v54 = vrot.slane %v1036_v42, 1  ;;  %v1246_v0 = vrot.slane %v1851_v62, 2  ;;  %v1219_v7 = vrot.slane %v1851_v62, 1 }
  0x75   : >> { %v1066_v50 = vsel %vm604_vm5, %v1064_v45, %v1065_v46  ;;  %v1039_v58 = vsel %vm556_vm4, %v1037_v53, %v1038_v54 }
  0x7a   : >> { %1750 = vmatmul.msk.bf16.vlgmr.msra.gmra.mxu1 %vm560_vm3, %v1846_v63  ;;  %v1218_v63 = vpack.c.b16 %v1217_v59, %v1217_v59 }
  0x7b   : >> { %1080 = vmatpush.bf16.msra.mxu1 %v1071_v8 }
  0x7c   : >> { %v1247_v2 = vrot.slane %v1218_v63, 2  ;;  %v1220_v8 = vrot.slane %v1218_v63, 1 }
  0x7d   : >> { %1754 = vmatmul.msk.bf16.vlgmr.msra.gmra.mxu3 %vm560_vm3, %v884_v6  ;;  %v1156_v6 = vrot.slane %v1127_v44, 2 }
  0x7e   : >> { %1144 = vmatpush.bf16.msra.mxu3 %v1135_v9  ;;  %v1248_v3 = vsel %vm604_vm5, %v1246_v0, %v1247_v2  ;;  %v1308_v9 = vunpack.c.l.b16 %v1807_v4  ;;  %v1221_v11 = vsel %vm556_vm4, %v1219_v7, %v1220_v8 }
  0x7f   : >> { %v1157_v10 = vsel %vm604_vm5, %v1155_v5, %v1156_v6 }
  0x80   : >> { %v1309_v13 = vpack.c.b16 %v1308_v9, %v1308_v9 }
  0x81   : >> { %1743 = vmatmul.msk.bf16.vlgmr.msra.gmra.mxu0 %vm560_vm3, %v793_v17  ;;  %1752 = vmatmul.msk.bf16.vlgmr.msra.gmra.mxu2 %vm560_vm3, %v857_v18  ;;  %v1337_v17 = vrot.slane %v1852_v12, 2 }
  0x82   : >> { %1114 = vmatpush.bf16.msra.mxu2 %v1105_v19  ;;  %1053 = vmatpush.bf16.msra.mxu0 %v1044_v20  ;;  %v1311_v15 = vrot.slane %v1309_v13, 1  ;;  %v1338_v18 = vrot.slane %v1309_v13, 2 }
  0x84   : >> { %v1312_v16 = vsel %vm556_vm4, %v1310_v14, %v1311_v15  ;;  %v1339_v19 = vsel %vm604_vm5, %v1337_v17, %v1338_v18 }
  0x8a   : >> { %1765 = vmatmul.msk.bf16.vlgmr.msrb.gmra.mxu1 %vm560_vm3, %v948_v28 }
  0x8b   : >> { %1205 = vmatpush.bf16.msrb.mxu1 %v1196_v31 }
  0x8d   : >> { %1776 = vmatmul.msk.bf16.vlgmr.msrb.gmra.mxu3 %vm560_vm3, %v1848_v27 }
  0x8e   : >> { %1262 = vmatpush.bf16.msrb.mxu3 %v1253_v32 }
  0x91   : >> { %1763 = vmatmul.msk.bf16.vlgmr.msrb.gmra.mxu0 %vm560_vm3, %v1847_v21  ;;  %1767 = vmatmul.msk.bf16.vlgmr.msrb.gmra.mxu2 %vm560_vm3, %v975_v39 }
  0x92   : >> { %1235 = vmatpush.bf16.msrb.mxu2 %v1226_v40  ;;  %1171 = vmatpush.bf16.msrb.mxu0 %v1162_v41 }
  0x9a   : >> { %1780 = vmatmul.msk.bf16.vlgmr.msra.gmra.mxu1 %vm560_vm3, %v1066_v50 }
  0x9b   : >> { %1326 = vmatpush.bf16.msra.mxu1 %v1317_v52 }
  0x9d   : >> { %1789 = vmatmul.msk.bf16.vlgmr.msra.gmra.mxu3 %vm560_vm3, %v1130_v51 }
  0xa1   : >> { %1778 = vmatmul.msk.bf16.vlgmr.msra.gmra.mxu0 %vm560_vm3, %v1039_v58  ;;  %1787 = vmatmul.msk.bf16.vlgmr.msra.gmra.mxu2 %vm560_vm3, %v1850_v43 }
  0xa2   : >> { %1353 = vmatpush.bf16.msra.mxu2 %v1344_v60  ;;  %1296 = vmatpush.bf16.msra.mxu0 %v1287_v61 }
  0xaa   : >> { %1800 = vmatmul.msk.bf16.vlgmr.msrb.gmra.mxu1 %vm560_vm3, %v1851_v62 }
  0xad   : >> { %1804 = vmatmul.msk.bf16.vlgmr.msrb.gmra.mxu3 %vm560_vm3, %v1248_v3 }
  0xb1   : >> { %1791 = vmatmul.msk.bf16.vlgmr.msrb.gmra.mxu0 %vm560_vm3, %v1157_v10  ;;  %1802 = vmatmul.msk.bf16.vlgmr.msrb.gmra.mxu2 %vm560_vm3, %v1221_v11 }
  0xba   : >> { %1815 = vmatmul.msk.bf16.vlgmr.msra.gmra.mxu1 %vm560_vm3, %v1312_v16 }
  0xc1   : >> { %1813 = vmatmul.msk.bf16.vlgmr.msra.gmra.mxu0 %vm560_vm3, %v1852_v12  ;;  %1817 = vmatmul.msk.bf16.vlgmr.msra.gmra.mxu2 %vm560_vm3, %v1339_v19 }
  0xd7   : >> { %v597_v20 = vpop.f32.mrf.mxu1 }
  0xde   : >> { %v577_v21 = vpop.f32.mrf.mxu0 }
  0xdf   : >> { %v599_v23 = vpop.f32.mrf.mxu1  ;;  %v598_v39 = vadd.f32 %v597_v20, %v577_v21 }
  0xe0   : >> { %v659_v22 = vpop.f32.mrf.mxu3 }
  0xe4   : >> { %v623_v24 = vpop.f32.mrf.mxu2 }
  0xe5   : >> { %v628_v41 = vadd.f32 %v623_v24, %v598_v39 }
  0xe6   : >> { %v579_v25 = vpop.f32.mrf.mxu0 }
  0xe7   : >> { %v716_v27 = vpop.f32.mrf.mxu1  ;;  %v600_v42 = vadd.f32 %v599_v23, %v579_v25  ;;  %v664_v44 = vadd.f32 %v659_v22, %v628_v41 }
  0xe8   : >> { %v661_v26 = vpop.f32.mrf.mxu3 }
  0xec   : >> { %v625_v28 = vpop.f32.mrf.mxu2 }
  0xed   : >> { %v629_v45 = vadd.f32 %v625_v28, %v600_v42 }
  0xee   : >> { %v689_v29 = vpop.f32.mrf.mxu0 }
  0xef   : >> { %v718_v31 = vpop.f32.mrf.mxu1  ;;  %v694_v48 = vadd.f32 %v689_v29, %v664_v44  ;;  %v665_v50 = vadd.f32 %v661_v26, %v629_v45 }
  0xf0   : >> { %v782_v30 = vpop.f32.mrf.mxu3 }
  0xf1   : >> { %v721_v51 = vadd.f32 %v716_v27, %v694_v48 }
  0xf4   : >> { %v752_v32 = vpop.f32.mrf.mxu2 }
  0xf5   : >> { %v757_v54 = vadd.f32 %v752_v32, %v721_v51 }
  0xf6   : >> { %v691_v33 = vpop.f32.mrf.mxu0 }
  0xf7   : >> { %v843_v35 = vpop.f32.mrf.mxu1  ;;  %v695_v52 = vadd.f32 %v691_v33, %v665_v50  ;;  %v787_v59 = vadd.f32 %v782_v30, %v757_v54 }
  0xf8   : >> { %v784_v34 = vpop.f32.mrf.mxu3 }
  0xf9   : >> { %v722_v56 = vadd.f32 %v718_v31, %v695_v52 }
  0xfc   : >> { %v754_v36 = vpop.f32.mrf.mxu2 }
  0xfd   : >> { %v758_v60 = vadd.f32 %v754_v36, %v722_v56 }
  0xfe   : >> { %v809_v37 = vpop.f32.mrf.mxu0 }
  0xff   : >> { %v845_v40 = vpop.f32.mrf.mxu1  ;;  %v814_v61 = vadd.f32 %v809_v37, %v787_v59  ;;  %v788_v63 = vadd.f32 %v784_v34, %v758_v60 }
 0x100   : >> { %v900_v38 = vpop.f32.mrf.mxu3 }
 0x101   : >> { %v848_v2 = vadd.f32 %v843_v35, %v814_v61 }
 0x104   : >> { %v873_v43 = vpop.f32.mrf.mxu2 }
 0x105   : >> { %v878_v5 = vadd.f32 %v873_v43, %v848_v2 }
 0x106   : >> { %v811_v46 = vpop.f32.mrf.mxu0 }
 0x107   : >> { %v964_v49 = vpop.f32.mrf.mxu1  ;;  %v815_v3 = vadd.f32 %v811_v46, %v788_v63  ;;  %v905_v9 = vadd.f32 %v900_v38, %v878_v5 }
 0x108   : >> { %v902_v47 = vpop.f32.mrf.mxu3 }
 0x109   : >> { %v849_v7 = vadd.f32 %v845_v40, %v815_v3 }
 0x10c   : >> { %v875_v53 = vpop.f32.mrf.mxu2 }
 0x10d   : >> { %v879_v10 = vadd.f32 %v875_v53, %v849_v7 }
 0x10e   : >> { %v934_v55 = vpop.f32.mrf.mxu0 }
 0x10f   : >> { %v966_v57 = vpop.f32.mrf.mxu1  ;;  %v939_v12 = vadd.f32 %v934_v55, %v905_v9  ;;  %v906_v13 = vadd.f32 %v902_v47, %v879_v10 }
 0x110   : >> { %v1025_v58 = vpop.f32.mrf.mxu3 }
 0x111   : >> { %v969_v15 = vadd.f32 %v964_v49, %v939_v12 }
 0x114   : >> { %v991_v62 = vpop.f32.mrf.mxu2 }
 0x115   : >> { %v996_v19 = vadd.f32 %v991_v62, %v969_v15 }
 0x116   : >> { %v936_v0 = vpop.f32.mrf.mxu0 }
 0x117   : >> { %v1082_v4 = vpop.f32.mrf.mxu1  ;;  %v940_v16 = vadd.f32 %v936_v0, %v906_v13  ;;  %v1030_v22 = vadd.f32 %v1025_v58, %v996_v19 }
 0x118   : >> { %v1027_v6 = vpop.f32.mrf.mxu3 }
 0x119   : >> { %v970_v21 = vadd.f32 %v966_v57, %v940_v16 }
 0x11c   : >> { %v993_v8 = vpop.f32.mrf.mxu2 }
 0x11d   : >> { %v997_v23 = vadd.f32 %v993_v8, %v970_v21 }
 0x11e   : >> { %v1055_v11 = vpop.f32.mrf.mxu0 }
 0x11f   : >> { %v1084_v14 = vpop.f32.mrf.mxu1  ;;  %v1060_v24 = vadd.f32 %v1055_v11, %v1030_v22  ;;  %v1031_v27 = vadd.f32 %v1027_v6, %v997_v23 }
 0x120   : >> { %v1146_v18 = vpop.f32.mrf.mxu3 }
 0x121   : >> { %v1087_v30 = vadd.f32 %v1082_v4, %v1060_v24 }
 0x124   : >> { %v1116_v17 = vpop.f32.mrf.mxu2 }
 0x125   : >> { %v1121_v32 = vadd.f32 %v1116_v17, %v1087_v30 }
 0x126   : >> { %v1057_v20 = vpop.f32.mrf.mxu0 }
 0x127   : >> { %v1207_v25 = vpop.f32.mrf.mxu1  ;;  %v1061_v31 = vadd.f32 %v1057_v20, %v1031_v27  ;;  %v1151_v35 = vadd.f32 %v1146_v18, %v1121_v32 }
 0x128   : >> { %v1148_v28 = vpop.f32.mrf.mxu3 }
 0x129   : >> { %v1088_v33 = vadd.f32 %v1084_v14, %v1061_v31 }
 0x12c   : >> { %v1118_v26 = vpop.f32.mrf.mxu2 }
 0x12d   : >> { %v1122_v36 = vadd.f32 %v1118_v26, %v1088_v33 }
 0x12e   : >> { %v1173_v29 = vpop.f32.mrf.mxu0 }
 0x12f   : >> { %v1209_v37 = vpop.f32.mrf.mxu1  ;;  %v1178_v39 = vadd.f32 %v1173_v29, %v1151_v35  ;;  %v1152_v41 = vadd.f32 %v1148_v28, %v1122_v36 }
 0x130   : >> { %v1264_v40 = vpop.f32.mrf.mxu3 }
 0x131   : >> { %v1212_v42 = vadd.f32 %v1207_v25, %v1178_v39 }
 0x134   : >> { %v1237_v34 = vpop.f32.mrf.mxu2 }
 0x135   : >> { %v1242_v45 = vadd.f32 %v1237_v34, %v1212_v42 }
 0x136   : >> { %v1175_v38 = vpop.f32.mrf.mxu0 }
 0x137   : >> { %v1179_v43 = vadd.f32 %v1175_v38, %v1152_v41  ;;  %v1328_v48 = vpop.f32.mrf.mxu1  ;;  %v1269_v49 = vadd.f32 %v1264_v40, %v1242_v45 }
 0x138   : >> { %v1266_v51 = vpop.f32.mrf.mxu3 }
 0x139   : >> { %v1213_v47 = vadd.f32 %v1209_v37, %v1179_v43 }
 0x13c   : >> { %v1239_v44 = vpop.f32.mrf.mxu2 }
 0x13d   : >> { %v1243_v50 = vadd.f32 %v1239_v44, %v1213_v47 }
 0x13e   : >> { %v1298_v46 = vpop.f32.mrf.mxu0 }
 0x13f   : >> { %v1303_v52 = vadd.f32 %v1298_v46, %v1269_v49  ;;  %v1270_v54 = vadd.f32 %v1266_v51, %v1243_v50  ;;  %v1330_v59 = vpop.f32.mrf.mxu1 }
 0x141   : >> { %v1333_v56 = vadd.f32 %v1328_v48, %v1303_v52 }
 0x144   : >> { %v1355_v53 = vpop.f32.mrf.mxu2 }
 0x145   : >> { %v1360_v58 = vadd.f32 %v1355_v53, %v1333_v56 }
 0x146   : >> { %v1300_v55 = vpop.f32.mrf.mxu0 }
 0x147   : >> { %v1304_v57 = vadd.f32 %v1300_v55, %v1270_v54  ;;  %v1362_v62 = vpack.c.bf16 %v1360_v58, %v1360_v58  ;;  %v1408_v0 = vmul.f32 %v1360_v58, %v1360_v58 }
 0x149   : >> { %v1334_v60 = vadd.f32 %v1330_v59, %v1304_v57  ;;  %v1366_v5 = vunpack.c.l.b16 %v1362_v62 }
 0x14c   : >> { %v1357_v61 = vpop.f32.mrf.mxu2 }
 0x14d   : >> { %v1361_v63 = vadd.f32 %v1357_v61, %v1334_v60 }
 0x14f   : >> { %v1363_v2 = vpack.c.bf16 %v1361_v63, %v1361_v63  ;;  %v1401_v3 = vadd.f32 %v1361_v63, %v1360_v58  ;;  %v1409_v4 = vmul.f32 %v1361_v63, %v1361_v63 }
 0x151   : >> { %v1367_v6 = vunpack.c.l.b16 %v1363_v2  ;;  %v1402_v7 = vrot.slane %v1401_v3, 4  ;;  %v1410_v8 = vadd.f32 %v1409_v4, %v1408_v0 }
 0x153   : >> { %v1368_v9 = vpack.c.b16 %v1367_v6, %v1366_v5  ;;  %v1403_v10 = vadd.f32 %v1402_v7, %v1401_v3  ;;  %v1411_v11 = vrot.slane %v1410_v8, 4 }
 0x155   : >> { %v1370_v12 = vshrl.u32 %v1368_v9, 16  ;;  %v1404_v13 = vrot.slane %v1403_v10, 2  ;;  %v1412_v14 = vadd.f32 %v1411_v11, %v1410_v8  ;;  %v1373_v16 = vshll.u32 %v1368_v9, 16 }
 0x157   : >> { %v1372_v15 = vrot.slane %v1370_v12, 7  ;;  %v1405_v17 = vadd.f32 %v1404_v13, %v1403_v10  ;;  %v1413_v18 = vrot.slane %v1412_v14, 2 }
 0x159   : >> { %v1375_v19 = vor.u32 %v1373_v16, %v1372_v15  ;;  %v1382_v20 = vsel %vm1380_vm8, %v1372_v15, 0  ;;  %v1406_v21 = vrot.slane %v1405_v17, 1  ;;  %v1414_v22 = vadd.f32 %v1413_v18, %v1412_v14 }
 0x15a   : >> { %v1388_v23 = vunpack.c.l.b16 %v1382_v20 }
 0x15b   : >> { %v1381_v24 = vsel %vm1380_vm8, 0, %v1375_v19  ;;  %v1415_v25 = vrot.slane %v1414_v22, 1  ;;  %v1407_v29 = vadd.f32 %v1406_v21, %v1405_v17 }
 0x15c   : >> { %v1386_v26 = vunpack.c.l.b16 %v1381_v24  ;;  %v1387_v27 = vunpack.c.h.b16 %v1381_v24  ;;  %v1391_v28 = vpack.c.b16 %v1388_v23, %v1388_v23 }
 0x15d   : >> { %v1416_v30 = vadd.f32 %v1415_v25, %v1414_v22 }
 0x15e   : >> { %v1389_v31 = vpack.c.b16 %v1386_v26, %v1386_v26  ;;  %v1390_v32 = vpack.c.b16 %v1387_v27, %v1387_v27  ;;  %1820 = vst.msk [vmem:[%s1564_s16 + $0x14] sm:$0x1] %vm477_vm1, %v1391_v28  ;;  %536 = sbr.rel (!%p534_p1) target bundleno = 85 (0x55), region = 135 }
 0x15f   : >> { %v1418_v33 = vsel %vm1378_vm6, %v1407_v29, %v1416_v30 }
 0x160   : >> { %1818 = vst.msk [vmem:[%s1564_s16 + $0xc] sm:$0xf] %vm474_vm0, %v1389_v31  ;;  %v1419_v34 = vadd.f32 %v1968_v1, %v1418_v33  }
 0x161   : >> { %1819 = vst.msk [vmem:[%s1564_s16 + $0x10] sm:$0xf] %vm474_vm0, %v1390_v32 }
 0x162   : >> { %v2431_v1 = vmov %v1419_v34  ;;  %1420 = vst [vmem:[%s2072_s11] sm:$0x3] (%p534_p1), %v1419_v34 }
 0x163 PF: > { %1423 = sbr.rel (!%p2088_p0) target bundleno = 360 (0x168), region = 51  ;;  %v1975_v35 = vmov (%p2088_p0), 0.0  }
 0x164   : > { %1424 = vst [vmem:[%s2072_s11] sm:$0x3] (%p2088_p0), %v1975_v35 }
 0x168 PF: > { %s16_s22 = sadd.s32 1, %s1964_s22   ;;  %s2432_s8 = sld [smem:[#allocation2_spill]] }
 0x169   : > { %p13_p2 = scmp.ge.s32.totalorder %s16_s22, 38   ;;  %s2433_s28 = sld [smem:[#allocation3_spill]] }
 0x16a   : > { %s2434_s18 = smov %s1956_s20  ;;  %s2435_s19 = smov %s1960_s21 }
 0x16b   :  { %15 = sbr.rel (!%p13_p2) target bundleno = 3 (0x3), region = 146 }
 0x16e   : > { %s2436_s20 = smov %s2432_s8 }
 0x16f   : > { %s2437_s21 = smov %s2433_s28 }

// kernel: double_conv2_forward.4
= control target key start
LH: loop header
LB: loop body
LE: loop exit
PB: predicated region body
PF: predicated region fallthrough
CT: control target
= control target key end

     0   :  { %s2109_s21 = smov 0   ;;  %s2111_s22 = smov 0   ;;  %s2624_s0 = inlined_call_operand.vmem [shape: bf16[2,18,18,18,8], index: 0, kind: input, shape index: {}, may-alias: {0,1,2}]   ;;  %s2625_s1 = inlined_call_operand.vmem [shape: bf16[2,18,18,18,8], index: 1, kind: input, shape index: {}, may-alias: {0,1,2}]   ;;  %s2626_s2 = inlined_call_operand.vmem [shape: bf16[2,18,18,18,8], index: 2, kind: input, shape index: {}, may-alias: {0,1,2}]   ;;  %s2627_s3 = inlined_call_operand.vmem [shape: bf16[27,8,128], index: 3, kind: input, shape index: {}]   ;;  %s2628_s4 = inlined_call_operand.vmem [shape: f32[2,2,128], index: 4, kind: input, shape index: {}]   ;;  %s2629_s5 = inlined_call_operand.vmem [shape: bf16[2,16,16,16,8], index: 5, kind: output, shape index: {0}]   ;;  %s2630_s6 = inlined_call_operand.vmem [shape: f32[2,16,2,128], index: 6, kind: output, shape index: {1}]  }
   0x1   :  { %2632 = sst [smem:[#allocation5_spill]] %s2624_s0  ;;  %s2113_s23 = smov 0  }
   0x2   :  { %2633 = sst [smem:[#allocation6_spill]] %s2625_s1  ;;  %s2115_s24 = smov 0  }
   0x3   :  { %2634 = sst [smem:[#allocation7_spill]] %s2628_s4  ;;  %s2117_s25 = smov 0  }
   0x4 LB: > { %2635 = sst [smem:[#allocation2_spill]] %s2059_s24  ;;  %s26_s26 = sadd.s32 1, %s2055_s23  ;;  %s2063_s25 = sphi %s2117_s25, %s17_s25   ;;  %s2059_s24 = sphi %s2115_s24, %s2649_s24   ;;  %s2055_s23 = sphi %s2113_s23, %s2651_s23   ;;  %s2051_s22 = sphi %s2111_s22, %s2647_s22   ;;  %s2047_s21 = sphi %s2109_s21, %s2650_s21  }
   0x5   : > { %s29_s27 = sadd.s32 1, %s2059_s24  ;;  %p27_p0 = scmp.ge.s32.totalorder %s26_s26, 16 }
   0x6   : > { %p1831_p1 = scmp.ge.s32.totalorder %s2063_s25, 1  ;;  %p286_p2 = scmp.lt.s32.totalorder %s2063_s25, 33 }
   0x7   : > { %s2653_s26 = smov (%p27_p0, %s26_s26), 0  ;;  %s2655_s27 = smov (!%p27_p0, %s29_s27), %s2059_s24 }
   0x8   : > { %2636 = sst [smem:[#allocation3_spill]] %s2653_s26  ;;  %p287_p3 = pnand %p1831_p1, %p286_p2 }
   0x9   : > { %p31_p4 = scmp.ge.s32.totalorder %s2655_s27, 2  ;;  %p356_p5 = scmp.lt.s32.totalorder (!%p287_p3), %s2051_s22, 1 }
   0xa   : > { %290 = sbr.rel (%p287_p3) target bundleno = 325 (0x145), region = 40  ;;  %p358_p6 = scmp.lt.s32.totalorder (!%p287_p3), %s2047_s21, 17 }
   0xb   : > { %s2657_s27 = smov (%p31_p4, %s2655_s27), 0  ;;  %s2143_s28 = sadd.s32 (!%p287_p3), 1, %s2047_s21 }
   0xc   : > { %2637 = sst [smem:[#allocation4_spill]] %s2657_s27  ;;  %s2146_s29 = sadd.s32 (!%p287_p3), 2, %s2047_s21 }
   0xd   : > { %p368_p7 = scmp.lt.s32.totalorder (!%p287_p3), %s2143_s28, 17  ;;  %p379_p8 = scmp.lt.s32.totalorder (!%p287_p3), %s2146_s29, 17 }
   0xe   : > { %s2638_s0 = sld [smem:[#allocation5_spill]] (!%p287_p3)  ;;  %p393_p9 = scmp.lt.s32.totalorder (!%p287_p3), %s2047_s21, 15 }
   0xf   : > { %v410_v0 = vlaneseq  ;;  %s2659_s22 = smov (!%p356_p5, %s2051_s22), 1  ;;  %v2073_v3 = vmov 0.0   ;;  %s2639_s4 = sld [smem:[#allocation7_spill]]  ;;  %v2216_v7 = vmov 0.0  }
  0x10   : > { %s359_s30 = scalar_select %p358_p6, %s2047_s21, 17 }
  0x11   : > { %v411_v1 = vshrl.u32 %v410_v0, 7  ;;  %s2152_s7 = smul.u32 972, %s2659_s22  ;;  %s1835_s11 = sshll.u32 %s2659_s22, 1 }
  0x12   : > { %s1956_s8 = smul.u32 54, %s359_s30  ;;  %s2640_s1 = sld [smem:[#allocation6_spill]] }
  0x13   : > { %v413_v2 = vadd.s32 16, %v411_v1  ;;  %vm414_vm0 = vcmp.ge.s32.totalorder %v411_v1, 1  ;;  %s369_s9 = scalar_select %p368_p7, %s2143_s28, 17 }
  0x14   : > { %v2156_v4 = vsel %vm414_vm0, 1.0, %v2073_v3  ;;  %s362_s10 = sadd.s32 %s2152_s7, %s1956_s8  ;;  %s1837_s8 = sshll.u32 %s2659_s22, 9 }
  0x15   : > { %vm419_vm1 = vcmp.le.s32.totalorder %v413_v2, 16  ;;  %s1832_s12 = sshll.u32 %s362_s10, 2  ;;  %s1958_s13 = smul.u32 54, %s369_s9 }
  0x16   : > { %v2161_v5 = vsel %vm419_vm1, 1.0, %v2073_v3  ;;  %s2166_s16 = scalar_lea.vmem %s2638_s0, %s1832_s12  ;;  %s390_s19 = scalar_lea.vmem %s2639_s4, %s1835_s11 }
  0x17   : > { %s372_s20 = sadd.s32 %s1958_s13, %s2152_s7  ;;  %v2173_v6 = vld [vmem:[%s390_s19] sm:$0x3]  ;;  %s1839_s10 = sshll.u32 %s2659_s22, 4 }
  0x18   : > { %s1833_s30 = sshll.u32 %s372_s20, 2  ;;  %p426_p10 = scmp.ge.s32.totalorder %s2047_s21, 1 }
  0x19   : > { %s2179_s9 = scalar_lea.vmem %s2640_s1, %s1833_s30  ;;  %p427_p11 = scmp.le.s32.totalorder %s2047_s21, 16 }
  0x1a   : > { %s380_s12 = scalar_select %p379_p8, %s2146_s29, 17 }
  0x1b   : > { %s394_s14 = scalar_select %p393_p9, %s2047_s21, 15 }
  0x1c   : > { %s1959_s11 = smul.u32 54, %s380_s12  ;;  %p432_p12 = scmp.ge.s32.totalorder %s2143_s28, 1 }
  0x1d   : > { %s1836_s13 = sshll.u32 %s394_s14, 5  ;;  %s405_s15 = sadd.s32 %s1839_s10, %s394_s14 }
  0x1e   : > { %s383_s17 = sadd.s32 %s1959_s11, %s2152_s7  ;;  %s397_s18 = sadd.s32 %s1837_s8, %s1836_s13 }
  0x1f   : > { %s1834_s19 = sshll.u32 %s383_s17, 2  ;;  %s1838_s26 = sshll.u32 %s397_s18, 2 }
  0x20   : > { %s2191_s22 = scalar_lea.vmem %s2626_s2, %s1834_s19  ;;  %s2196_s1 = scalar_lea.vmem %s2629_s5, %s1838_s26 }
  0x21   : > { %s1840_s12 = sshll.u32 %s405_s15, 1  ;;  %p428_p13 = pnand %p427_p11, %p426_p10 }
  0x22   : > { %s2202_s10 = scalar_lea.vmem %s2630_s6, %s1840_s12  ;;  %p433_p0 = scmp.le.s32.totalorder %s2143_s28, 16 }
  0x23   : > { %p438_p1 = scmp.ge.s32.totalorder %s2146_s29, 1  ;;  %p439_p2 = scmp.le.s32.totalorder %s2146_s29, 16 }
  0x24   : > { %s2210_s7 = scalar_select %p428_p13, 0.0, 1.0 }
  0x25   : > { %p434_p3 = pnand %p433_p0, %p432_p12  ;;  %p440_p4 = pnand %p439_p2, %p438_p1 }
  0x26   : > { %s2218_s14 = smov 0  }
  0x27   : > { %s2212_s0 = scalar_select %p434_p3, 0.0, 1.0 }
  0x28   : > { %s2214_s8 = scalar_select %p440_p4, 0.0, 1.0 }
  0x29 LB: >> { %v486_v8 = vld [vmem:[%s2627_s3] sm:$0xf]  ;;  %vm514_vm2 = vcmask 1043456   ;;  %v1849_v9 = vld [vmem:[%s2627_s3 + $0x8] sm:$0xf]  ;;  %s2238_s13 = smul.u32 12, %s2071_s14  ;;  %s2071_s14 = sphi %s2218_s14, %s2646_s14   ;;  %v2067_v7 = vphi %v2216_v7, %v2645_v7  }
  0x2a   : >> { %v535_v10 = vsel %vm514_vm2, %v486_v8, 0  ;;  %v561_v11 = vsel %vm514_vm2, %v1849_v9, 0  ;;  %v1855_v12 = vld [vmem:[%s2627_s3 + $0xc] sm:$0xf]  ;;  %p470_p5 = scmp.ge.s32.totalorder %s2071_s14, 1  ;;  %p471_p6 = scmp.le.s32.totalorder %s2071_s14, 16 }
  0x2b   : >> { %544 = vmatpush.bf16.msra.mxu1 %v535_v10  ;;  %570 = vmatpush.bf16.msra.mxu2 %v561_v11  ;;  %v625_v13 = vsel %vm514_vm2, %v1855_v12, 0  ;;  %v1846_v14 = vld [vmem:[%s2627_s3 + $0x4] sm:$0xf]  ;;  %s2248_s18 = sadd.s32 1, %s2071_s14   ;;  %v1865_v16 = vld [vmem:[%s2627_s3 + $0x18] sm:$0xf]  ;;  %s2255_s27 = scalar_lea.vmem %s2166_s16, %s2238_s13 }
  0x2c   : >> { %634 = vmatpush.bf16.msra.mxu3 %v625_v13  ;;  %v516_v15 = vsel %vm514_vm2, %v1846_v14, 0  ;;  %v2258_v17 = vperm.slane %v2173_v6, 0  ;;  %v2261_v18 = vperm.slane %v2173_v6, 1  ;;  %p598_p7 = scmp.ge.s32.totalorder %s2248_s18, 1  ;;  %v754_v19 = vsel %vm514_vm2, %v1865_v16, 0  ;;  %v1930_v21 = vld [vmem:[%s2255_s27] sm:$0xff]   ;;  %p2273_p8 = pnand %p471_p6, %p470_p5 }
  0x2d   : >> { %525 = vmatpush.bf16.msra.mxu0 %v516_v15  ;;  %v1857_v20 = vld [vmem:[%s2627_s3 + $0x10] sm:$0xf]  ;;  %v455_v22 = vld [vmem:[%s2255_s27 + $0x8] sm:$0x1]  ;;  %p599_p9 = scmp.le.s32.totalorder %s2248_s18, 16  ;;  %v1931_v25 = vunpack.c.l.bf16 %v1930_v21  ;;  %v1932_v26 = vunpack.c.h.bf16 %v1930_v21  ;;  %v1953_v36 = vld [vmem:[%s2255_s27 + $0x18] sm:$0xff]  }
  0x2e   : >> { %v1851_v23 = vld [vmem:[%s2255_s27 + $0xc] sm:$0xff]   ;;  %v663_v24 = vsel %vm514_vm2, %v1857_v20, 0  ;;  %v458_v27 = vunpack.c.l.bf16 %v455_v22  ;;  %v1859_v29 = vld [vmem:[%s2627_s3 + $0x14] sm:$0xf]  ;;  %v1867_v30 = vld [vmem:[%s2627_s3 + $0x1c] sm:$0xf]  ;;  %v1935_v43 = vunpack.c.l.bf16 %v1953_v36  ;;  %v1936_v44 = vunpack.c.h.bf16 %v1953_v36 }
  0x2f   : >> { %763 = vmatpush.bf16.msrb.mxu2 %v754_v19  ;;  %v586_v28 = vunpack.c.l.bf16 %v1851_v23  ;;  %v1853_v31 = vld [vmem:[%s2255_s27 + $0x14] sm:$0x1]  ;;  %s2290_s29 = scalar_select %p2273_p8, 0.0, 1.0  ;;  %v587_v32 = vunpack.c.h.bf16 %v1851_v23  ;;  %v690_v33 = vsel %vm514_vm2, %v1859_v29, 0  ;;  %v792_v34 = vsel %vm514_vm2, %v1867_v30, 0 }
  0x30   : >> { %v588_v35 = vunpack.c.l.bf16 %v1853_v31  ;;  %v460_v37 = vsub.f32 %v1931_v25, %v2258_v17  ;;  %v461_v38 = vsub.f32 %v1932_v26, %v2258_v17  ;;  %v462_v39 = vsub.f32 %v458_v27, %v2258_v17  ;;  %p2303_p10 = pnand %p599_p9, %p598_p7  ;;  %699 = vmatpush.bf16.msrb.mxu1 %v690_v33  ;;  %s708_s15 = sadd.s32 2, %s2071_s14  ;;  %801 = vmatpush.bf16.msrb.mxu3 %v792_v34  ;;  %v1874_v19 = vld [vmem:[%s2627_s3 + $0x28] sm:$0xf]  ;;  %v1863_v20 = vld [vmem:[%s2255_s27 + $0x20] sm:$0x1] }
  0x31   : >> { %672 = vmatpush.bf16.msrb.mxu0 %v663_v24  ;;  %v589_v40 = vsub.f32 %v586_v28, %v2258_v17  ;;  %s475_s17 = smul.f32 %s2290_s29, %s2210_s7  ;;  %v590_v41 = vsub.f32 %v587_v32, %v2258_v17  ;;  %p2312_p11 = scmp.ge.s32.totalorder %s708_s15, 1  ;;  %vm510_vm3 = vcmask 64512   ;;  %v718_v52 = vsub.f32 %v1935_v43, %v2258_v17 }
  0x32   : >> { %v591_v42 = vsub.f32 %v588_v35, %v2258_v17  ;;  %v464_v45 = vmul.f32 %v2261_v18, %v460_v37  ;;  %v465_v46 = vmul.f32 %v2261_v18, %v461_v38  ;;  %v466_v47 = vmul.f32 %v2261_v18, %v462_v39  ;;  %s2322_s26 = scalar_select %p2303_p10, 0.0, 1.0 }
  0x33   : >> { %v592_v48 = vmul.f32 %v589_v40, %v2261_v18  ;;  %v476_v49 = vstv %s475_s17  ;;  %v593_v50 = vmul.f32 %v590_v41, %v2261_v18  ;;  %p2327_p12 = scmp.le.s32.totalorder %s708_s15, 16  ;;  %vm553_vm4 = vcmask 1046528   ;;  %s2358_s27 = scalar_lea.vmem %s2179_s9, %s2238_s13 }
  0x34   : >> { %v594_v51 = vmul.f32 %v591_v42, %v2261_v18  ;;  %v467_v53 = vmax.f32 %v464_v45, 0.0  ;;  %v468_v54 = vmax.f32 %v465_v46, 0.0  ;;  %v477_v55 = vmul.f32 %v476_v49, %v2156_v4  ;;  %s603_s30 = smul.f32 %s2322_s26, %s2210_s7  ;;  %s2457_s17 = scalar_lea.vmem %s2191_s22, %s2238_s13 }
  0x35   : >> { %v469_v56 = vmax.f32 %v466_v47, 0.0  ;;  %v479_v57 = vmul.f32 %v476_v49, %v2161_v5  ;;  %v595_v58 = vmax.f32 %v592_v48, 0.0  ;;  %v596_v59 = vmax.f32 %v593_v50, 0.0  ;;  %p729_p13 = pnand %p2327_p12, %p2312_p11  ;;  %s976_s20 = smul.f32 %s2322_s26, %s2212_s0 }
  0x36   : >> { %v597_v60 = vmax.f32 %v594_v51, 0.0  ;;  %v480_v61 = vmul.f32 %v477_v55, %v467_v53  ;;  %v481_v62 = vmul.f32 %v476_v49, %v468_v54  ;;  %v604_v63 = vstv %s603_s30  ;;  %s854_s30 = smul.f32 %s2290_s29, %s2212_s0  ;;  %p445_p0 = scmp.ge.s32.totalorder %s2248_s18, 16  }
  0x37   : >> { %v719_v0 = vsub.f32 %v1936_v44, %v2258_v17  ;;  %v482_v1 = vmul.f32 %v479_v57, %v469_v56  ;;  %v605_v2 = vmul.f32 %v604_v63, %v2156_v4  ;;  %v609_v3 = vmul.f32 %v604_v63, %v596_v59  ;;  %s2342_s12 = scalar_select %p729_p13, 0.0, 1.0  ;;  %v1872_v57 = vld [vmem:[%s2627_s3 + $0x24] sm:$0xf] }
  0x38   : >> { %v607_v8 = vmul.f32 %v604_v63, %v2161_v5  ;;  %v483_v9 = vpack.c.bf16 %v480_v61, %v480_v61  ;;  %v484_v10 = vpack.c.bf16 %v481_v62, %v481_v62  ;;  %v721_v11 = vmul.f32 %v718_v52, %v2261_v18  ;;  %v1869_v52 = vld [vmem:[%s2627_s3 + $0x20] sm:$0xf]  ;;  %v1876_v62 = vld [vmem:[%s2627_s3 + $0x2c] sm:$0xf]  ;;  %s1220_s13 = smul.f32 %s2290_s29, %s2214_s8 }
  0x39   : >> { %v722_v12 = vmul.f32 %v719_v0, %v2261_v18  ;;  %v485_v13 = vpack.c.bf16 %v482_v1, %v482_v1  ;;  %v608_v14 = vmul.f32 %v605_v2, %v595_v58  ;;  %v612_v15 = vpack.c.bf16 %v609_v3, %v609_v3  ;;  %s732_s4 = smul.f32 %s2342_s12, %s2210_s7  ;;  %v1938_v63 = vld [vmem:[%s2358_s27] sm:$0xff]  }
  0x3a   : >> { %v610_v16 = vmul.f32 %v607_v8, %v597_v60  ;;  %v492_v21 = vunpack.c.l.b16 %v483_v9  ;;  %v493_v22 = vunpack.c.l.b16 %v484_v10  ;;  %v724_v23 = vmax.f32 %v721_v11, 0.0  ;;  %v841_v8 = vld [vmem:[%s2358_s27 + $0x8] sm:$0x1]  ;;  %s1342_s21 = smul.f32 %s2322_s26, %s2214_s8 }
  0x3b   : >> { %v725_v24 = vmax.f32 %v722_v12, 0.0  ;;  %v494_v25 = vunpack.c.l.b16 %v485_v13  ;;  %v611_v26 = vpack.c.bf16 %v608_v14, %v608_v14  ;;  %v619_v27 = vunpack.c.l.b16 %v612_v15  ;;  %s1464_s15 = smul.f32 %s2342_s12, %s2214_s8 }
  0x3c   : >> { %v613_v28 = vpack.c.bf16 %v610_v16, %v610_v16  ;;  %v495_v29 = vpack.c.b16 %v493_v22, %v492_v21  ;;  %v733_v30 = vstv %s732_s4  ;;  %v914_v31 = vsel %vm514_vm2, %v1874_v19, 0 }
  0x3d   : >> { %v717_v32 = vunpack.c.l.bf16 %v1863_v20  ;;  %v496_v33 = vpack.c.b16 %v494_v25, %v494_v25  ;;  %v618_v34 = vunpack.c.l.b16 %v611_v26  ;;  %v734_v36 = vmul.f32 %v733_v30, %v2156_v4 }
  0x3e   : >> { %v646_v35 = vunpack.c.l.b16 %v613_v28  ;;  %1848 = vmatmul.msk.bf16.vlgmr.msra.gmra.mxu1 %vm510_vm3, %v495_v29  ;;  %v554_v37 = vrot.slane %v495_v29, 1  ;;  %v499_v38 = vshrl.u32 %v495_v29, 16  ;;  %v501_v39 = vshll.u32 %v495_v29, 16 }
  0x3f   : >> { %v738_v40 = vmul.f32 %v733_v30, %v725_v24  ;;  %v555_v41 = vrot.slane %v496_v33, 1  ;;  %v620_v42 = vpack.c.b16 %v619_v27, %v618_v34  ;;  %v506_v43 = vshll.u32 %v496_v33, 16 }
  0x40   : >> { %v647_v44 = vpack.c.b16 %v646_v35, %v646_v35  ;;  %v503_v45 = vrot.slane %v501_v39, 1  ;;  %v737_v46 = vmul.f32 %v734_v36, %v724_v23  ;;  %v720_v48 = vsub.f32 %v717_v32, %v2258_v17  ;;  %v1883_v35 = vld [vmem:[%s2627_s3 + $0x34] sm:$0xf] }
  0x41   : >> { %v741_v47 = vpack.c.bf16 %v738_v40, %v738_v40  ;;  %v556_v49 = vsel %vm553_vm4, %v554_v37, %v555_v41  ;;  %1856 = vmatmul.msk.bf16.vlgmr.msra.gmra.mxu3 %vm510_vm3, %v620_v42  ;;  %vm497_vm5 = vsmask.f32 7424  ;;  %v508_v50 = vrot.slane %v506_v43, 1  ;;  %v1878_v40 = vld [vmem:[%s2358_s27 + $0xc] sm:$0xff]   ;;  %v1880_v41 = vld [vmem:[%s2358_s27 + $0x14] sm:$0x1] }
  0x42   : >> { %v683_v51 = vrot.slane %v620_v42, 1  ;;  %1850 = vmatmul.msk.bf16.vlgmr.msra.gmra.mxu2 %vm510_vm3, %v556_v49  ;;  %v504_v53 = vor.u32 %v503_v45, %v499_v38  ;;  %v684_v54 = vrot.slane %v647_v44, 1  ;;  %v740_v55 = vpack.c.bf16 %v737_v46, %v737_v46  ;;  %v1881_v46 = vld [vmem:[%s2627_s3 + $0x30] sm:$0xf] }
  0x43   : >> { %v748_v56 = vunpack.c.l.b16 %v741_v47  ;;  %923 = vmatpush.bf16.msra.mxu2 %v914_v31  ;;  %v648_v58 = vshrl.u32 %v620_v42, 16  ;;  %v650_v59 = vshll.u32 %v620_v42, 16  ;;  %v655_v60 = vshll.u32 %v647_v44, 16 }
  0x44   : >> { %v723_v61 = vmul.f32 %v720_v48, %v2261_v18  ;;  %v509_v0 = vsel %vm497_vm5, %v504_v53, %v508_v50  ;;  %v747_v1 = vunpack.c.l.b16 %v740_v55  ;;  %v736_v2 = vmul.f32 %v733_v30, %v2161_v5  ;;  %v1885_v30 = vld [vmem:[%s2627_s3 + $0x38] sm:$0xf]  ;;  %v1890_v53 = vld [vmem:[%s2627_s3 + $0x3c] sm:$0xf] }
  0x45   : >> { %v819_v3 = vsel %vm514_vm2, %v1869_v52, 0  ;;  %1847 = vmatmul.msk.bf16.vlgmr.msra.gmra.mxu0 %vm510_vm3, %v509_v0  ;;  %v652_v9 = vrot.slane %v650_v59, 1  ;;  %v657_v10 = vrot.slane %v655_v60, 1  ;;  %v876_v12 = vsel %vm514_vm2, %v1872_v57, 0 }
  0x46   : >> { %v726_v11 = vmax.f32 %v723_v61, 0.0  ;;  %v2382_v13 = vpack.c.b16 %v748_v56, %v747_v1  ;;  %828 = vmatpush.bf16.msra.mxu0 %v819_v3  ;;  %885 = vmatpush.bf16.msra.mxu1 %v876_v12  ;;  %v941_v14 = vsel %vm514_vm2, %v1876_v62, 0  ;;  %v1939_v15 = vunpack.c.l.bf16 %v1938_v63 }
  0x47   : >> { %v1940_v16 = vunpack.c.h.bf16 %v1938_v63  ;;  %v653_v19 = vor.u32 %v652_v9, %v648_v58  ;;  %950 = vmatpush.bf16.msra.mxu3 %v941_v14  ;;  %v855_v21 = vstv %s854_s30  ;;  %v844_v22 = vunpack.c.l.bf16 %v841_v8  ;;  %s1098_s30 = smul.f32 %s2342_s12, %s2212_s0 }
  0x48   : >> { %v739_v20 = vmul.f32 %v736_v2, %v726_v11  ;;  %v779_v23 = vshll.u32 %v2382_v13, 16  ;;  %v845_v24 = vsub.f32 %v1939_v15, %v2258_v17  ;;  %v685_v26 = vsel %vm553_vm4, %v683_v51, %v684_v54 }
  0x49   : >> { %v846_v25 = vsub.f32 %v1940_v16, %v2258_v17  ;;  %v777_v28 = vshrl.u32 %v2382_v13, 16  ;;  %v847_v29 = vsub.f32 %v844_v22, %v2258_v17  ;;  %v856_v34 = vmul.f32 %v855_v21, %v2156_v4 }
  0x4a   : >> { %v742_v27 = vpack.c.bf16 %v739_v20, %v739_v20  ;;  %v781_v31 = vrot.slane %v779_v23, 1  ;;  %v848_v32 = vmul.f32 %v845_v24, %v2261_v18  ;;  %v658_v36 = vsel %vm497_vm5, %v653_v19, %v657_v10 }
  0x4b   : >> { %v849_v33 = vmul.f32 %v846_v25, %v2261_v18  ;;  %v850_v38 = vmul.f32 %v847_v29, %v2261_v18  ;;  %v858_v39 = vmul.f32 %v855_v21, %v2161_v5  ;;  %v1063_v44 = vsel %vm514_vm2, %v1885_v30, 0 }
  0x4c   : >> { %v775_v37 = vunpack.c.l.b16 %v742_v27  ;;  %v851_v42 = vmax.f32 %v848_v32, 0.0  ;;  %v812_v45 = vrot.slane %v2382_v13, 1  ;;  %v782_v48 = vor.u32 %v781_v31, %v777_v28  ;;  %v1954_v27 = vld [vmem:[%s2358_s27 + $0x18] sm:$0xff]  }
  0x4d   : >> { %v852_v43 = vmax.f32 %v849_v33, 0.0  ;;  %v853_v49 = vmax.f32 %v850_v38, 0.0  ;;  %v1036_v50 = vsel %vm514_vm2, %v1883_v35, 0  ;;  %v964_v54 = vunpack.c.l.bf16 %v1878_v40  ;;  %v1897_v38 = vld [vmem:[%s2627_s3 + $0x48] sm:$0xf] }
  0x4e   : >> { %v2410_v47 = vpack.c.b16 %v775_v37, %v775_v37  ;;  %1860 = vmatmul.msk.bf16.vlgmr.msrb.gmra.mxu1 %vm510_vm3, %v685_v26  ;;  %v859_v51 = vmul.f32 %v856_v34, %v851_v42  ;;  %v965_v55 = vunpack.c.h.bf16 %v1878_v40  ;;  %v998_v58 = vsel %vm514_vm2, %v1881_v46, 0 }
  0x4f   : >> { %v860_v52 = vmul.f32 %v855_v21, %v852_v43  ;;  %v861_v57 = vmul.f32 %v858_v39, %v853_v49  ;;  %1045 = vmatpush.bf16.msrb.mxu1 %v1036_v50  ;;  %v966_v59 = vunpack.c.l.bf16 %v1880_v41  ;;  %v967_v62 = vsub.f32 %v964_v54, %v2258_v17  ;;  %v1892_v50 = vld [vmem:[%s2627_s3 + $0x40] sm:$0xf] }
  0x50   : >> { %v784_v56 = vshll.u32 %v2410_v47, 16  ;;  %v862_v60 = vpack.c.bf16 %v859_v51, %v859_v51  ;;  %v968_v63 = vsub.f32 %v965_v55, %v2258_v17  ;;  %v1120_v2 = vsel %vm514_vm2, %v1890_v53, 0  ;;  %v1894_v51 = vld [vmem:[%s2627_s3 + $0x44] sm:$0xf]  ;;  %v1889_v54 = vld [vmem:[%s2358_s27 + $0x20] sm:$0x1] }
  0x51   : >> { %v863_v61 = vpack.c.bf16 %v860_v52, %v860_v52  ;;  %v864_v1 = vpack.c.bf16 %v861_v57, %v861_v57  ;;  %v969_v3 = vsub.f32 %v966_v59, %v2258_v17  ;;  %v970_v10 = vmul.f32 %v967_v62, %v2261_v18  ;;  %v1899_v59 = vld [vmem:[%s2627_s3 + $0x4c] sm:$0xf]  ;;  %s1928_s27 = sshll.u32 %s2071_s14, 3  ;;  %s2646_s14 = smov %s2248_s18 }
  0x52   : >> { %v786_v0 = vrot.slane %v784_v56, 1  ;;  %1866 = vmatmul.msk.bf16.vlgmr.msrb.gmra.mxu2 %vm510_vm3, %v2382_v13  ;;  %v869_v8 = vunpack.c.l.b16 %v862_v60  ;;  %v971_v11 = vmul.f32 %v968_v63, %v2261_v18  ;;  %v977_v16 = vstv %s976_s20 }
  0x53   : >> { %v870_v9 = vunpack.c.l.b16 %v863_v61  ;;  %v897_v14 = vunpack.c.l.b16 %v864_v1  ;;  %1072 = vmatpush.bf16.msrb.mxu2 %v1063_v44  ;;  %v972_v15 = vmul.f32 %v969_v3, %v2261_v18  ;;  %v973_v20 = vmax.f32 %v970_v10, 0.0 }
  0x54   : >> { %v787_v12 = vsel %vm497_vm5, %v782_v48, %v786_v0  ;;  %v974_v21 = vmax.f32 %v971_v11, 0.0  ;;  %v978_v22 = vmul.f32 %v977_v16, %v2156_v4  ;;  %v813_v24 = vrot.slane %v2410_v47, 1 }
  0x55   : >> { %1868 = vmatmul.msk.bf16.vlgmr.msrb.gmra.mxu3 %vm510_vm3, %v787_v12  ;;  %v871_v19 = vpack.c.b16 %v870_v9, %v869_v8  ;;  %1858 = vmatmul.msk.bf16.vlgmr.msrb.gmra.mxu0 %vm510_vm3, %v658_v36  ;;  %v898_v23 = vpack.c.b16 %v897_v14, %v897_v14  ;;  %v975_v25 = vmax.f32 %v972_v15, 0.0  ;;  %v980_v26 = vmul.f32 %v977_v16, %v2161_v5  ;;  %v1946_v8 = vld [vmem:[%s2457_s17] sm:$0xff]  }
  0x56   : >> { %1129 = vmatpush.bf16.msrb.mxu3 %v1120_v2  ;;  %1007 = vmatpush.bf16.msrb.mxu0 %v998_v58  ;;  %v981_v31 = vmul.f32 %v978_v22, %v973_v20  ;;  %v982_v34 = vmul.f32 %v977_v16, %v974_v21  ;;  %v1943_v39 = vunpack.c.l.bf16 %v1954_v27  ;;  %v1944_v40 = vunpack.c.h.bf16 %v1954_v27 }
  0x57   : >> { %v899_v28 = vshrl.u32 %v871_v19, 16  ;;  %v901_v29 = vshll.u32 %v871_v19, 16  ;;  %v934_v30 = vrot.slane %v871_v19, 1  ;;  %v906_v32 = vshll.u32 %v898_v23, 16 }
  0x58   : >> { %v935_v33 = vrot.slane %v898_v23, 1  ;;  %v983_v35 = vmul.f32 %v980_v26, %v975_v25  ;;  %v984_v37 = vpack.c.bf16 %v981_v31, %v981_v31  ;;  %v814_v42 = vsel %vm553_vm4, %v812_v45, %v813_v24 }
  0x59   : >> { %v903_v36 = vrot.slane %v901_v29, 1  ;;  %v908_v41 = vrot.slane %v906_v32, 1  ;;  %v985_v43 = vpack.c.bf16 %v982_v34, %v982_v34  ;;  %v1089_v48 = vsub.f32 %v1943_v39, %v2258_v17  ;;  %v1207_v32 = vld [vmem:[%s2457_s17 + $0x8] sm:$0x1] }
  0x5a   : >> { %v986_v44 = vpack.c.bf16 %v983_v35, %v983_v35  ;;  %v991_v47 = vunpack.c.l.b16 %v984_v37  ;;  %v1090_v49 = vsub.f32 %v1944_v40, %v2258_v17  ;;  %v1242_v45 = vsel %vm514_vm2, %v1897_v38, 0  ;;  %v1908_v40 = vld [vmem:[%s2627_s3 + $0x58] sm:$0xf] }
  0x5b   : >> { %v904_v46 = vor.u32 %v903_v36, %v899_v28  ;;  %v992_v52 = vunpack.c.l.b16 %v985_v43  ;;  %v1099_v53 = vstv %s1098_s30  ;;  %v936_v55 = vsel %vm553_vm4, %v934_v30, %v935_v33  ;;  %s1573_s30 = scalar_lea.vmem %s2196_s1, %s1928_s27 }
  0x5c   : >> { %v1019_v13 = vunpack.c.l.b16 %v986_v44  ;;  %v1092_v56 = vmul.f32 %v1089_v48, %v2261_v18  ;;  %v1093_v57 = vmul.f32 %v1090_v49, %v2261_v18  ;;  %v1100_v58 = vmul.f32 %v1099_v53, %v2156_v4  ;;  %v1903_v48 = vld [vmem:[%s2457_s17 + $0xc] sm:$0xff]  }
  0x5d   : >> { %v2466_v60 = vpack.c.b16 %v992_v52, %v991_v47  ;;  %v1158_v62 = vsel %vm514_vm2, %v1892_v50, 0  ;;  %v1185_v63 = vsel %vm514_vm2, %v1894_v51, 0  ;;  %v909_v0 = vsel %vm497_vm5, %v904_v46, %v908_v41 }
  0x5e   : >> { %v1020_v61 = vpack.c.b16 %v1019_v13, %v1019_v13  ;;  %1873 = vmatmul.msk.bf16.vlgmr.msra.gmra.mxu1 %vm510_vm3, %v871_v19  ;;  %v1095_v1 = vmax.f32 %v1092_v56, 0.0  ;;  %v1096_v2 = vmax.f32 %v1093_v57, 0.0  ;;  %v1088_v3 = vunpack.c.l.bf16 %v1889_v54 }
  0x5f   : >> { %v1023_v9 = vshll.u32 %v2466_v60, 16  ;;  %1194 = vmatpush.bf16.msra.mxu1 %v1185_v63  ;;  %v1280_v11 = vsel %vm514_vm2, %v1899_v59, 0  ;;  %v1102_v12 = vmul.f32 %v1099_v53, %v2161_v5  ;;  %v1021_v14 = vshrl.u32 %v2466_v60, 16 }
  0x60   : >> { %v1028_v10 = vshll.u32 %v1020_v61, 16  ;;  %v1103_v15 = vmul.f32 %v1100_v58, %v1095_v1  ;;  %v1104_v16 = vmul.f32 %v1099_v53, %v1096_v2  ;;  %v1091_v19 = vsub.f32 %v1088_v3, %v2258_v17 }
  0x61   : >> { %v1025_v20 = vrot.slane %v1023_v9, 1  ;;  %v1056_v21 = vrot.slane %v2466_v60, 1  ;;  %v1947_v22 = vunpack.c.l.bf16 %v1946_v8  ;;  %v1948_v23 = vunpack.c.h.bf16 %v1946_v8  ;;  %v1905_v9 = vld [vmem:[%s2457_s17 + $0x14] sm:$0x1] }
  0x62   : >> { %1875 = vmatmul.msk.bf16.vlgmr.msra.gmra.mxu2 %vm510_vm3, %v909_v0  ;;  %v1057_v24 = vrot.slane %v1020_v61, 1  ;;  %v1106_v25 = vpack.c.bf16 %v1103_v15, %v1103_v15  ;;  %v1107_v26 = vpack.c.bf16 %v1104_v16, %v1104_v16  ;;  %v1094_v27 = vmul.f32 %v1091_v19, %v2261_v18  ;;  %v1910_v15 = vld [vmem:[%s2627_s3 + $0x5c] sm:$0xf] }
  0x63   : >> { %v1030_v28 = vrot.slane %v1028_v10, 1  ;;  %1251 = vmatpush.bf16.msra.mxu2 %v1242_v45  ;;  %v1211_v29 = vsub.f32 %v1947_v22, %v2258_v17  ;;  %v1212_v30 = vsub.f32 %v1948_v23, %v2258_v17  ;;  %v1221_v31 = vstv %s1220_s13 }
  0x64   : >> { %v1026_v33 = vor.u32 %v1025_v20, %v1021_v14  ;;  %v1113_v34 = vunpack.c.l.b16 %v1106_v25  ;;  %v1114_v35 = vunpack.c.l.b16 %v1107_v26  ;;  %v1097_v36 = vmax.f32 %v1094_v27, 0.0 }
  0x65   : >> { %1877 = vmatmul.msk.bf16.vlgmr.msra.gmra.mxu3 %vm510_vm3, %v936_v55  ;;  %1870 = vmatmul.msk.bf16.vlgmr.msra.gmra.mxu0 %vm510_vm3, %v814_v42  ;;  %v1214_v37 = vmul.f32 %v1211_v29, %v2261_v18  ;;  %v1215_v38 = vmul.f32 %v1212_v30, %v2261_v18  ;;  %v1222_v39 = vmul.f32 %v1221_v31, %v2156_v4  ;;  %v1210_v43 = vunpack.c.l.bf16 %v1207_v32  ;;  %v1901_v42 = vld [vmem:[%s2627_s3 + $0x50] sm:$0xf]  ;;  %v1906_v55 = vld [vmem:[%s2627_s3 + $0x54] sm:$0xf] }
  0x66   : >> { %1289 = vmatpush.bf16.msra.mxu3 %v1280_v11  ;;  %1167 = vmatpush.bf16.msra.mxu0 %v1158_v62  ;;  %v1105_v41 = vmul.f32 %v1102_v12, %v1097_v36  ;;  %v1058_v44 = vsel %vm553_vm4, %v1056_v21, %v1057_v24  ;;  %v1031_v49 = vsel %vm497_vm5, %v1026_v33, %v1030_v28  ;;  %v1402_v52 = vsel %vm514_vm2, %v1908_v40, 0 }
  0x67   : >> { %v1217_v46 = vmax.f32 %v1214_v37, 0.0  ;;  %v1218_v47 = vmax.f32 %v1215_v38, 0.0  ;;  %v2502_v50 = vpack.c.b16 %v1114_v35, %v1113_v34  ;;  %v1213_v53 = vsub.f32 %v1210_v43, %v2258_v17  ;;  %v1955_v34 = vld [vmem:[%s2457_s17 + $0x18] sm:$0xff]  }
  0x68   : >> { %v1108_v51 = vpack.c.bf16 %v1105_v41, %v1105_v41  ;;  %v1224_v54 = vmul.f32 %v1221_v31, %v2161_v5  ;;  %v1307_v57 = vsel %vm514_vm2, %v1901_v42, 0  ;;  %v1330_v58 = vunpack.c.l.bf16 %v1903_v48 }
  0x69   : >> { %v1225_v13 = vmul.f32 %v1222_v39, %v1217_v46  ;;  %v1226_v45 = vmul.f32 %v1221_v31, %v1218_v47  ;;  %v1331_v59 = vunpack.c.h.bf16 %v1903_v48  ;;  %v1216_v63 = vmul.f32 %v1213_v53, %v2261_v18  ;;  %v1914_v39 = vld [vmem:[%s2457_s17 + $0x20] sm:$0x1] }
  0x6a   : >> { %v1141_v56 = vunpack.c.l.b16 %v1108_v51  ;;  %v1343_v0 = vstv %s1342_s21  ;;  %v1145_v1 = vshll.u32 %v2502_v50, 16  ;;  %v1364_v2 = vsel %vm514_vm2, %v1906_v55, 0 }
  0x6b   : >> { %v1228_v61 = vpack.c.bf16 %v1225_v13, %v1225_v13  ;;  %v1229_v62 = vpack.c.bf16 %v1226_v45, %v1226_v45  ;;  %v1333_v3 = vsub.f32 %v1330_v58, %v2258_v17  ;;  %v1334_v8 = vsub.f32 %v1331_v59, %v2258_v17 }
  0x6c   : >> { %v2517_v10 = vpack.c.b16 %v1141_v56, %v1141_v56  ;;  %v1219_v14 = vmax.f32 %v1216_v63, 0.0  ;;  %v1178_v16 = vrot.slane %v2502_v50, 1  ;;  %v1344_v21 = vmul.f32 %v1343_v0, %v2156_v4 }
  0x6d   : >> { %v1235_v11 = vunpack.c.l.b16 %v1228_v61  ;;  %v1236_v12 = vunpack.c.l.b16 %v1229_v62  ;;  %v1336_v19 = vmul.f32 %v1333_v3, %v2261_v18  ;;  %v1337_v20 = vmul.f32 %v1334_v8, %v2261_v18  ;;  %v1917_v61 = vld [vmem:[%s2627_s3 + $0x64] sm:$0xf] }
  0x6e   : >> { %1884 = vmatmul.msk.bf16.vlgmr.msrb.gmra.mxu1 %vm510_vm3, %v1031_v49  ;;  %v1143_v23 = vshrl.u32 %v2502_v50, 16  ;;  %v1227_v24 = vmul.f32 %v1224_v54, %v1219_v14  ;;  %v1332_v25 = vunpack.c.l.bf16 %v1905_v9  ;;  %v2530_v26 = vrot.slane %v1145_v1, 1 }
  0x6f   : >> { %v2527_v22 = vpack.c.b16 %v1236_v12, %v1235_v11  ;;  %1373 = vmatpush.bf16.msrb.mxu1 %v1364_v2  ;;  %v1429_v27 = vsel %vm514_vm2, %v1910_v15, 0  ;;  %v1339_v28 = vmax.f32 %v1336_v19, 0.0  ;;  %v1340_v29 = vmax.f32 %v1337_v20, 0.0 }
  0x70   : >> { %v1179_v30 = vrot.slane %v2517_v10, 1  ;;  %v1230_v31 = vpack.c.bf16 %v1227_v24, %v1227_v24  ;;  %v1335_v33 = vsub.f32 %v1332_v25, %v2258_v17  ;;  %v1150_v35 = vshll.u32 %v2517_v10, 16 }
  0x71   : >> { %v1267_v32 = vshll.u32 %v2527_v22, 16  ;;  %v1265_v36 = vshrl.u32 %v2527_v22, 16  ;;  %v1347_v37 = vmul.f32 %v1344_v21, %v1339_v28  ;;  %v1348_v38 = vmul.f32 %v1343_v0, %v1340_v29 }
  0x72   : >> { %1886 = vmatmul.msk.bf16.vlgmr.msrb.gmra.mxu2 %vm510_vm3, %v1058_v44  ;;  %v1263_v40 = vunpack.c.l.b16 %v1230_v31  ;;  %v1338_v43 = vmul.f32 %v1335_v33, %v2261_v18  ;;  %v1346_v46 = vmul.f32 %v1343_v0, %v2161_v5  ;;  %v1951_v42 = vunpack.c.l.bf16 %v1955_v34 }
  0x73   : >> { %1411 = vmatpush.bf16.msrb.mxu2 %v1402_v52  ;;  %v1269_v41 = vrot.slane %v1267_v32, 1  ;;  %v1350_v44 = vpack.c.bf16 %v1347_v37, %v1347_v37  ;;  %v1351_v47 = vpack.c.bf16 %v1348_v38, %v1348_v38  ;;  %v1952_v48 = vunpack.c.h.bf16 %v1955_v34 }
  0x74   : >> { %v1264_v49 = vpack.c.b16 %v1263_v40, %v1263_v40  ;;  %v1341_v51 = vmax.f32 %v1338_v43, 0.0  ;;  %v1300_v52 = vrot.slane %v2527_v22, 1  ;;  %v1454_v13 = vunpack.c.l.bf16 %v1914_v39  ;;  %v1915_v39 = vld [vmem:[%s2627_s3 + $0x60] sm:$0xf] }
  0x75   : >> { %1891 = vmatmul.msk.bf16.vlgmr.msrb.gmra.mxu3 %vm510_vm3, %v2502_v50  ;;  %1882 = vmatmul.msk.bf16.vlgmr.msrb.gmra.mxu0 %vm510_vm3, %v2466_v60  ;;  %v1180_v45 = vsel %vm553_vm4, %v1178_v16, %v1179_v30  ;;  %v1270_v53 = vor.u32 %v1269_v41, %v1265_v36  ;;  %v1357_v54 = vunpack.c.l.b16 %v1350_v44  ;;  %v1358_v55 = vunpack.c.l.b16 %v1351_v47 }
  0x76   : >> { %1438 = vmatpush.bf16.msrb.mxu3 %v1429_v27  ;;  %1316 = vmatpush.bf16.msrb.mxu0 %v1307_v57  ;;  %v1272_v56 = vshll.u32 %v1264_v49, 16  ;;  %v1349_v58 = vmul.f32 %v1346_v46, %v1341_v51  ;;  %v1301_v59 = vrot.slane %v1264_v49, 1  ;;  %v1455_v60 = vsub.f32 %v1951_v42, %v2258_v17  ;;  %v1919_v27 = vld [vmem:[%s2627_s3 + $0x68] sm:$0xf] }
  0x77   : >> { %v2555_v62 = vpack.c.b16 %v1358_v55, %v1357_v54  ;;  %v1456_v63 = vsub.f32 %v1952_v48, %v2258_v17  ;;  %v1457_v0 = vsub.f32 %v1454_v13, %v2258_v17  ;;  %v1465_v1 = vstv %s1464_s15 }
  0x78   : >> { %v1274_v2 = vrot.slane %v1272_v56, 1  ;;  %v1352_v57 = vpack.c.bf16 %v1349_v58, %v1349_v58  ;;  %v1302_v3 = vsel %vm553_vm4, %v1300_v52, %v1301_v59  ;;  %v1458_v8 = vmul.f32 %v1455_v60, %v2261_v18 }
  0x79   : >> { %v1387_v9 = vshrl.u32 %v2555_v62, 16  ;;  %v1389_v10 = vshll.u32 %v2555_v62, 16  ;;  %v1524_v11 = vsel %vm514_vm2, %v1917_v61, 0  ;;  %v1459_v12 = vmul.f32 %v1456_v63, %v2261_v18 }
  0x7a   : >> { %v1275_v14 = vsel %vm497_vm5, %v1270_v53, %v1274_v2  ;;  %v1385_v15 = vunpack.c.l.b16 %v1352_v57  ;;  %v1460_v17 = vmul.f32 %v1457_v0, %v2261_v18  ;;  %v1461_v16 = vmax.f32 %v1458_v8, 0.0 }
  0x7b   : >> { %v1391_v19 = vrot.slane %v1389_v10, 1  ;;  %v1462_v20 = vmax.f32 %v1459_v12, 0.0  ;;  %v1466_v21 = vmul.f32 %v1465_v1, %v2156_v4  ;;  %v1468_v24 = vmul.f32 %v1465_v1, %v2161_v5 }
  0x7c   : >> { %v1386_v25 = vpack.c.b16 %v1385_v15, %v1385_v15  ;;  %v1422_v28 = vrot.slane %v2555_v62, 1  ;;  %v1463_v29 = vmax.f32 %v1460_v17, 0.0  ;;  %v1148_v18 = vor.u32 %v2530_v26, %v1143_v23 }
  0x7d   : >> { %v1152_v30 = vrot.slane %v1150_v35, 1  ;;  %v1469_v31 = vmul.f32 %v1466_v21, %v1461_v16  ;;  %v1470_v32 = vmul.f32 %v1465_v1, %v1462_v20  ;;  %v1392_v33 = vor.u32 %v1391_v19, %v1387_v9 }
  0x7e   : >> { %1895 = vmatmul.msk.bf16.vlgmr.msra.gmra.mxu1 %vm510_vm3, %v1180_v45  ;;  %v1394_v34 = vshll.u32 %v1386_v25, 16  ;;  %v1423_v36 = vrot.slane %v1386_v25, 1  ;;  %v1471_v37 = vmul.f32 %v1468_v24, %v1463_v29  ;;  %v1551_v38 = vsel %vm514_vm2, %v1919_v27, 0 }
  0x7f   : >> { %1533 = vmatpush.bf16.msra.mxu1 %v1524_v11  ;;  %v1472_v40 = vpack.c.bf16 %v1469_v31, %v1469_v31  ;;  %v1473_v41 = vpack.c.bf16 %v1470_v32, %v1470_v32  ;;  %v1153_v26 = vsel %vm497_vm5, %v1148_v18, %v1152_v30  ;;  %v1486_v47 = vsel %vm514_vm2, %v1915_v39, 0 }
  0x80   : >> { %v1396_v43 = vrot.slane %v1394_v34, 1  ;;  %v1424_v50 = vsel %vm553_vm4, %v1422_v28, %v1423_v36  ;;  %v1474_v23 = vpack.c.bf16 %v1471_v37, %v1471_v37  ;;  %vm1574_vm6 = vcmask 60416  }
  0x81   : >> { %v1479_v35 = vunpack.c.l.b16 %v1472_v40  ;;  %v1480_v46 = vunpack.c.l.b16 %v1473_v41  ;;  %vm1593_vm7 = vcmask 1040384  }
  0x82   : >> { %1898 = vmatmul.msk.bf16.vlgmr.msra.gmra.mxu2 %vm510_vm3, %v2527_v22  ;;  %v1397_v44 = vsel %vm497_vm5, %v1392_v33, %v1396_v43  ;;  %v1507_v42 = vunpack.c.l.b16 %v1474_v23 }
  0x83   : >> { %1560 = vmatpush.bf16.msra.mxu2 %v1551_v38  ;;  %v1481_v48 = vpack.c.b16 %v1480_v46, %v1479_v35 }
  0x84   : >> { %v1508_v49 = vpack.c.b16 %v1507_v42, %v1507_v42 }
  0x85   : >> { %1900 = vmatmul.msk.bf16.vlgmr.msra.gmra.mxu3 %vm510_vm3, %v1275_v14  ;;  %1893 = vmatmul.msk.bf16.vlgmr.msra.gmra.mxu0 %vm510_vm3, %v1153_v26  ;;  %v1509_v51 = vshrl.u32 %v1481_v48, 16  ;;  %v1511_v52 = vshll.u32 %v1481_v48, 16  ;;  %v1544_v22 = vrot.slane %v1481_v48, 1 }
  0x86   : >> { %1495 = vmatpush.bf16.msra.mxu0 %v1486_v47  ;;  %v1516_v13 = vshll.u32 %v1508_v49, 16  ;;  %v1545_v45 = vrot.slane %v1508_v49, 1 }
  0x87   : >> { %v1513_v53 = vrot.slane %v1511_v52, 1 }
  0x88   : >> { %v1518_v54 = vrot.slane %v1516_v13, 1  ;;  %v1546_v55 = vsel %vm553_vm4, %v1544_v22, %v1545_v45 }
  0x89   : >> { %v1514_v56 = vor.u32 %v1513_v53, %v1509_v51 }
  0x8b   : >> { %v1519_v58 = vsel %vm497_vm5, %v1514_v56, %v1518_v54 }
  0x8e   : >> { %1907 = vmatmul.msk.bf16.vlgmr.msrb.gmra.mxu1 %vm510_vm3, %v2555_v62 }
  0x92   : >> { %1909 = vmatmul.msk.bf16.vlgmr.msrb.gmra.mxu2 %vm510_vm3, %v1397_v44 }
  0x95   : >> { %1911 = vmatmul.msk.bf16.vlgmr.msrb.gmra.mxu3 %vm510_vm3, %v1424_v50  ;;  %1902 = vmatmul.msk.bf16.vlgmr.msrb.gmra.mxu0 %vm510_vm3, %v1302_v3 }
  0x9e   : >> { %1918 = vmatmul.msk.bf16.vlgmr.msra.gmra.mxu1 %vm510_vm3, %v1519_v58 }
  0xa2   : >> { %1920 = vmatmul.msk.bf16.vlgmr.msra.gmra.mxu2 %vm510_vm3, %v1546_v55 }
  0xa5   : >> { %1916 = vmatmul.msk.bf16.vlgmr.msra.gmra.mxu0 %vm510_vm3, %v1481_v48 }
  0xbb   : >> { %v546_v59 = vpop.f32.mrf.mxu1 }
  0xc2   : >> { %v527_v61 = vpop.f32.mrf.mxu0 }
  0xc3   : >> { %v548_v60 = vpop.f32.mrf.mxu1  ;;  %v547_v9 = vadd.f32 %v546_v59, %v527_v61 }
  0xc4   : >> { %v636_v0 = vpop.f32.mrf.mxu3 }
  0xc5   : >> { %v572_v63 = vpop.f32.mrf.mxu2 }
  0xc6   : >> { %v577_v3 = vadd.f32 %v572_v63, %v547_v9 }
  0xc8   : >> { %v641_v15 = vadd.f32 %v636_v0, %v577_v3 }
  0xca   : >> { %v529_v1 = vpop.f32.mrf.mxu0 }
  0xcb   : >> { %v701_v2 = vpop.f32.mrf.mxu1  ;;  %v549_v17 = vadd.f32 %v548_v60, %v529_v1 }
  0xcc   : >> { %v638_v57 = vpop.f32.mrf.mxu3 }
  0xcd   : >> { %v574_v62 = vpop.f32.mrf.mxu2 }
  0xce   : >> { %v578_v21 = vadd.f32 %v574_v62, %v549_v17 }
  0xd0   : >> { %v642_v28 = vadd.f32 %v638_v57, %v578_v21 }
  0xd2   : >> { %v674_v8 = vpop.f32.mrf.mxu0 }
  0xd3   : >> { %v703_v10 = vpop.f32.mrf.mxu1  ;;  %v679_v19 = vadd.f32 %v674_v8, %v641_v15 }
  0xd5   : >> { %v765_v11 = vpop.f32.mrf.mxu2  ;;  %v706_v25 = vadd.f32 %v701_v2, %v679_v19 }
  0xd7   : >> { %v770_v18 = vadd.f32 %v765_v11, %v706_v25 }
  0xd8   : >> { %v803_v12 = vpop.f32.mrf.mxu3 }
  0xd9   : >> { %v808_v33 = vadd.f32 %v803_v12, %v770_v18 }
  0xda   : >> { %v676_v14 = vpop.f32.mrf.mxu0 }
  0xdb   : >> { %v887_v16 = vpop.f32.mrf.mxu1  ;;  %v680_v30 = vadd.f32 %v676_v14, %v642_v28 }
  0xdd   : >> { %v767_v20 = vpop.f32.mrf.mxu2  ;;  %v707_v34 = vadd.f32 %v703_v10, %v680_v30 }
  0xdf   : >> { %v771_v39 = vadd.f32 %v767_v20, %v707_v34 }
  0xe0   : >> { %v805_v24 = vpop.f32.mrf.mxu3 }
  0xe1   : >> { %v809_v50 = vadd.f32 %v805_v24, %v771_v39 }
  0xe2   : >> { %v830_v27 = vpop.f32.mrf.mxu0 }
  0xe3   : >> { %v889_v29 = vpop.f32.mrf.mxu1  ;;  %v835_v37 = vadd.f32 %v830_v27, %v808_v33 }
  0xe5   : >> { %v925_v31 = vpop.f32.mrf.mxu2  ;;  %v892_v41 = vadd.f32 %v887_v16, %v835_v37 }
  0xe7   : >> { %v930_v26 = vadd.f32 %v925_v31, %v892_v41 }
  0xe8   : >> { %v952_v32 = vpop.f32.mrf.mxu3 }
  0xe9   : >> { %v957_v47 = vadd.f32 %v952_v32, %v930_v26 }
  0xea   : >> { %v832_v36 = vpop.f32.mrf.mxu0 }
  0xeb   : >> { %v1047_v38 = vpop.f32.mrf.mxu1  ;;  %v836_v35 = vadd.f32 %v832_v36, %v809_v50 }
  0xed   : >> { %v927_v40 = vpop.f32.mrf.mxu2  ;;  %v893_v42 = vadd.f32 %v889_v29, %v836_v35 }
  0xef   : >> { %v931_v52 = vadd.f32 %v927_v40, %v893_v42 }
  0xf0   : >> { %v954_v43 = vpop.f32.mrf.mxu3 }
  0xf1   : >> { %v958_v53 = vadd.f32 %v954_v43, %v931_v52 }
  0xf2   : >> { %v1009_v23 = vpop.f32.mrf.mxu0 }
  0xf3   : >> { %v1049_v46 = vpop.f32.mrf.mxu1  ;;  %v1014_v49 = vadd.f32 %v1009_v23, %v957_v47 }
  0xf5   : >> { %v1074_v44 = vpop.f32.mrf.mxu2  ;;  %v1052_v13 = vadd.f32 %v1047_v38, %v1014_v49 }
  0xf7   : >> { %v1079_v55 = vadd.f32 %v1074_v44, %v1052_v13 }
  0xf8   : >> { %v1131_v48 = vpop.f32.mrf.mxu3 }
  0xf9   : >> { %v1136_v61 = vadd.f32 %v1131_v48, %v1079_v55 }
  0xfa   : >> { %v1011_v51 = vpop.f32.mrf.mxu0 }
  0xfb   : >> { %v1196_v22 = vpop.f32.mrf.mxu1  ;;  %v1015_v56 = vadd.f32 %v1011_v51, %v958_v53 }
  0xfd   : >> { %v1076_v45 = vpop.f32.mrf.mxu2  ;;  %v1053_v60 = vadd.f32 %v1049_v46, %v1015_v56 }
  0xff   : >> { %v1080_v2 = vadd.f32 %v1076_v45, %v1053_v60 }
 0x100   : >> { %v1133_v54 = vpop.f32.mrf.mxu3 }
 0x101   : >> { %v1137_v8 = vadd.f32 %v1133_v54, %v1080_v2 }
 0x102   : >> { %v1169_v58 = vpop.f32.mrf.mxu0 }
 0x103   : >> { %v1198_v59 = vpop.f32.mrf.mxu1  ;;  %v1174_v0 = vadd.f32 %v1169_v58, %v1136_v61 }
 0x105   : >> { %v1253_v63 = vpop.f32.mrf.mxu2  ;;  %v1201_v57 = vadd.f32 %v1196_v22, %v1174_v0 }
 0x107   : >> { %v1258_v11 = vadd.f32 %v1253_v63, %v1201_v57 }
 0x108   : >> { %v1291_v1 = vpop.f32.mrf.mxu3 }
 0x109   : >> { %v1296_v15 = vadd.f32 %v1291_v1, %v1258_v11 }
 0x10a   : >> { %v1171_v62 = vpop.f32.mrf.mxu0 }
 0x10b   : >> { %v1375_v10 = vpop.f32.mrf.mxu1  ;;  %v1175_v3 = vadd.f32 %v1171_v62, %v1137_v8 }
 0x10d   : >> { %v1255_v9 = vpop.f32.mrf.mxu2  ;;  %v1202_v17 = vadd.f32 %v1198_v59, %v1175_v3 }
 0x10f   : >> { %v1259_v20 = vadd.f32 %v1255_v9, %v1202_v17 }
 0x110   : >> { %v1293_v12 = vpop.f32.mrf.mxu3 }
 0x111   : >> { %v1297_v27 = vadd.f32 %v1293_v12, %v1259_v20 }
 0x112   : >> { %v1318_v14 = vpop.f32.mrf.mxu0 }
 0x113   : >> { %v1323_v16 = vadd.f32 %v1318_v14, %v1296_v15  ;;  %v1377_v21 = vpop.f32.mrf.mxu1 }
 0x115   : >> { %v1413_v19 = vpop.f32.mrf.mxu2  ;;  %v1380_v24 = vadd.f32 %v1375_v10, %v1323_v16 }
 0x117   : >> { %v1418_v29 = vadd.f32 %v1413_v19, %v1380_v24 }
 0x118   : >> { %v1440_v28 = vpop.f32.mrf.mxu3 }
 0x119   : >> { %v1445_v31 = vadd.f32 %v1440_v28, %v1418_v29 }
 0x11a   : >> { %v1320_v25 = vpop.f32.mrf.mxu0 }
 0x11b   : >> { %v1324_v18 = vadd.f32 %v1320_v25, %v1297_v27  ;;  %v1535_v33 = vpop.f32.mrf.mxu1 }
 0x11d   : >> { %v1415_v30 = vpop.f32.mrf.mxu2  ;;  %v1381_v32 = vadd.f32 %v1377_v21, %v1324_v18 }
 0x11f   : >> { %v1419_v37 = vadd.f32 %v1415_v30, %v1381_v32 }
 0x120   : >> { %v1442_v40 = vpop.f32.mrf.mxu3 }
 0x121   : >> { %v1446_v43 = vadd.f32 %v1442_v40, %v1419_v37 }
 0x122   : >> { %v1497_v34 = vpop.f32.mrf.mxu0 }
 0x123   : >> { %v1502_v36 = vadd.f32 %v1497_v34, %v1445_v31  ;;  %v1537_v35 = vpop.f32.mrf.mxu1 }
 0x125   : >> { %v1540_v38 = vadd.f32 %v1535_v33, %v1502_v36  ;;  %v1562_v39 = vpop.f32.mrf.mxu2 }
 0x127   : >> { %v1567_v41 = vadd.f32 %v1562_v39, %v1540_v38 }
 0x129   : >> { %v1569_v50 = vpack.c.bf16 %v1567_v41, %v1567_v41  ;;  %v1584_v42 = vmul.f32 %v1567_v41, %v1567_v41 }
 0x12a   : >> { %v1499_v23 = vpop.f32.mrf.mxu0 }
 0x12b   : >> { %1575 = vst.msk [vmem:[%s1573_s30] sm:$0xf] %vm1574_vm6, %v1569_v50  ;;  %v1503_v26 = vadd.f32 %v1499_v23, %v1446_v43 }
 0x12d   : >> { %v1541_v46 = vadd.f32 %v1537_v35, %v1503_v26  ;;  %v1564_v44 = vpop.f32.mrf.mxu2 }
 0x12f   : >> { %v1568_v47 = vadd.f32 %v1564_v44, %v1541_v46 }
 0x131   : >> { %v1570_v48 = vpack.c.bf16 %v1568_v47, %v1568_v47  ;;  %v1577_v49 = vadd.f32 %v1568_v47, %v1567_v41  ;;  %v1585_v51 = vmul.f32 %v1568_v47, %v1568_v47 }
 0x133   : >> { %1576 = vst.msk [vmem:[%s1573_s30 + $0x4] sm:$0xf] %vm1574_vm6, %v1570_v48  ;;  %v1578_v52 = vrot.slane %v1577_v49, 4  ;;  %v1586_v22 = vadd.f32 %v1585_v51, %v1584_v42 }
 0x135   : >> { %v1579_v13 = vadd.f32 %v1578_v52, %v1577_v49  ;;  %v1587_v45 = vrot.slane %v1586_v22, 4 }
 0x137   : >> { %v1580_v53 = vrot.slane %v1579_v13, 2  ;;  %v1588_v54 = vadd.f32 %v1587_v45, %v1586_v22 }
 0x139   : >> { %v1581_v55 = vadd.f32 %v1580_v53, %v1579_v13  ;;  %v1589_v56 = vrot.slane %v1588_v54, 2 }
 0x13b   : >> { %v1582_v58 = vrot.slane %v1581_v55, 1  ;;  %v1590_v59 = vadd.f32 %v1589_v56, %v1588_v54 }
 0x13d   : >> { %v1591_v61 = vrot.slane %v1590_v59, 1  ;;  %v1583_v60 = vadd.f32 %v1582_v58, %v1581_v55 }
 0x13f   : >> { %v1592_v63 = vadd.f32 %v1591_v61, %v1590_v59 }
 0x140   : > { %447 = sbr.rel (!%p445_p0) target bundleno = 41 (0x29), region = 134 }
 0x141   : >> { %v1594_v0 = vsel %vm1593_vm7, %v1583_v60, %v1592_v63 }
 0x142   : >> { %v1595_v1 = vadd.f32 %v2067_v7, %v1594_v0  }
 0x144   : >> { %v2645_v7 = vmov %v1595_v1  ;;  %1596 = vst [vmem:[%s2202_s10] sm:$0x3] (%p445_p0), %v1595_v1 }
 0x145 PF: > { %s17_s25 = sadd.s32 1, %s2063_s25   ;;  %s2647_s22 = sld [smem:[#allocation2_spill]] }
 0x146   : > { %p14_p1 = scmp.ge.s32.totalorder %s17_s25, 34   ;;  %s2648_s14 = sld [smem:[#allocation3_spill]] }
 0x147   : > { %s2649_s24 = sld [smem:[#allocation4_spill]]  ;;  %s2650_s21 = smov %s2055_s23 }
 0x148   :  { %16 = sbr.rel (!%p14_p1) target bundleno = 4 (0x4), region = 145 }
 0x14c   : > { %s2651_s23 = smov %s2648_s14 }

</bundles_post_ra>
